<compile_context>
chip_gen: v6e
topology: v6e:2x2x1
jax: 0.10.0
libtpu: 0.0.40
codegen_flags: <defaults>
</compile_context>

<pallas_src>
import functools
import math

import jax
import jax.numpy as jnp
from jax.experimental import pallas as pl
from jax.experimental.pallas import tpu as pltpu

LOG2 = math.log(2.0)
OUT_LANES = 128          # lane-dense output slab width


# --------------------------------------------------------------------------- helpers
def _ssp(x):
    """Shifted softplus log(0.5*exp(x) + 0.5), numerically stable (f32 VPU/EUP path)."""
    return jnp.maximum(x, 0.0) + jnp.log1p(jnp.exp(-jnp.abs(x))) - jnp.float32(LOG2)


def _softplus_inverse(x):
    x = jnp.asarray(x, jnp.float32)
    return jnp.log(jnp.expm1(x))


def _round_up(x, m):
    return ((x + m - 1) // m) * m


# --------------------------------------------------------------------------- fused kernel
def _physnet_fused_kernel(
    src_ref, dst_ref, dstrow_ref, z_ref, ambrow_ref,
    r_ref, emb_ref, scale_ref, shift_ref,
    centers_ref, widths_ref,
    wrbf_ref, wj_ref, bj_ref, wi_ref, bi_ref,
    riw1_ref, rib1_ref, riw2_ref, rib2_ref,
    gate_ref, wu_ref, bu_ref,
    raw1_ref, rab1_ref, raw2_ref, rab2_ref,
    row1_ref, rob1_ref, row2_ref, rob2_ref,
    olw_ref, olb_ref, ofw_ref, ofb_ref,
    o_ref,
    *, cutoff, n_res_interact, n_res_atom, n_res_out, n_lin_out,
):
    f32 = jnp.float32
    bf16 = jnp.bfloat16

    def mm(a, b):
        # bf16 MXU operands, f32 accumulation (single-pass MXU on v5e/v6e/v7x).
        return jnp.dot(a.astype(bf16), b.astype(bf16), preferred_element_type=f32)

    def gather_exact(onehot, table_f32):
        # Exact f32 gather / segment-sum on the MXU: split the f32 table into bf16 hi+lo
        # parts; one-hot (or {-1,0,1}) entries are exact in bf16, so two bf16 matmuls with
        # f32 accumulation reproduce the f32 table values to ~f32 precision.
        oh = onehot.astype(bf16)
        hi = table_f32.astype(bf16)
        lo = (table_f32 - hi.astype(f32)).astype(bf16)
        return (jnp.dot(oh, hi, preferred_element_type=f32)
                + jnp.dot(oh, lo, preferred_element_type=f32))

    def residual(x, w1, b1, w2, b2):
        # PhysNet residual layer: x + W2 ssp(W1 ssp(x) + b1) + b2
        h = mm(_ssp(x), w1) + b1
        h = mm(_ssp(h), w2) + b2
        return x + h

    E = src_ref.shape[0]
    A = r_ref.shape[0]
    NE = emb_ref.shape[0]
    NM = o_ref.shape[0]
    P = ofw_ref.shape[2]
    num_modules = wrbf_ref.shape[0]

    # ---- gather / scatter / segment operators built in-kernel from int32 index vectors
    #      (no O(E*A) one-hot HBM traffic, no host-side one_hot / transpose HLOs). ----
    one = jnp.float32(1.0)
    zero = jnp.float32(0.0)
    lane_EA = jax.lax.broadcasted_iota(jnp.int32, (E, A), 1)
    gsrc = jnp.where(lane_EA == src_ref[...], one, zero)        # (E, A)  gather vi[src]
    gdst = jnp.where(lane_EA == dst_ref[...], one, zero)        # (E, A)  gather R[dst]
    sub_AE = jax.lax.broadcasted_iota(jnp.int32, (A, E), 0)
    gdstT = jnp.where(sub_AE == dstrow_ref[...], one, zero)     # (A, E)  scatter-add -> dst
    lane_AN = jax.lax.broadcasted_iota(jnp.int32, (A, NE), 1)
    zoh = jnp.where(lane_AN == z_ref[...], one, zero)           # (A, NE) embedding gather
    sub_MA = jax.lax.broadcasted_iota(jnp.int32, (NM, A), 0)
    mol_oh = jnp.where(sub_MA == ambrow_ref[...], one, zero)    # (NM, A) atom -> molecule

    # ---- distance (PairwiseDistance, eps=1e-6 added to the difference) + RBF expansion ----
    R = r_ref[...]                                               # (A, 3) f32
    diff = gather_exact(gsrc - gdst, R) + 1e-6                   # exact R[src]-R[dst]
    d = jnp.sqrt(jnp.sum(diff * diff, axis=-1, keepdims=True))   # (E, 1)
    u = d * (1.0 / cutoff)
    phi = 1.0 + u * u * u * (-10.0 + u * (15.0 - 6.0 * u))       # Horner: 1-6u^5+15u^4-10u^3
    phi = jnp.where(d < cutoff, phi, 0.0)
    centers = centers_ref[...]                                   # (1, K), hoisted loads
    widths = widths_ref[...]
    # NOTE: widths/centers used exactly as stored, matching the literal torch reference.
    t = jnp.exp(-d) - centers
    rbf = phi * jnp.exp(-widths * t * t)                         # (E, K)

    # ---- embedding / per-atom scale & shift gathers (exact split-f32 MXU gathers) ----
    vi = gather_exact(zoh, emb_ref[...])                         # (A, F)
    scale_z = gather_exact(zoh, scale_ref[...])                  # (A, P)
    shift_z = gather_exact(zoh, shift_ref[...])                  # (A, P)

    out_sum = jnp.zeros((A, P), f32)
    for m in range(num_modules):                                 # static, unrolled
        # -------- interaction block --------
        xj = mm(gsrc, vi)                                        # gather vi[src]   (E, F)
        g = mm(rbf, wrbf_ref[m])                                 # filter from RBF  (E, F)
        h = mm(_ssp(xj), wj_ref[m]) + bj_ref[m]
        msg = g * h                                              # per-edge message
        agg = mm(gdstT, msg)                                     # scatter-add to nodes (A, F)
        v = agg + mm(_ssp(vi), wi_ref[m]) + bi_ref[m]
        for r in range(n_res_interact):
            v = residual(v, riw1_ref[m, r], rib1_ref[m, r], riw2_ref[m, r], rib2_ref[m, r])
        vi = gate_ref[m] * vi + mm(_ssp(v), wu_ref[m]) + bu_ref[m]
        # -------- atom-wise residual stack --------
        for r in range(n_res_atom):
            vi = residual(vi, raw1_ref[m, r], rab1_ref[m, r], raw2_ref[m, r], rab2_ref[m, r])
        # -------- output block --------
        y = vi
        for r in range(n_res_out):
            y = residual(y, row1_ref[m, r], rob1_ref[m, r], row2_ref[m, r], rob2_ref[m, r])
        for l in range(n_lin_out - 1):
            y = mm(_ssp(y), olw_ref[m, l]) + olb_ref[m, l]
        out_sum = out_sum + mm(_ssp(y), ofw_ref[m]) + ofb_ref[m]

    # ---- scale/shift, dipole, molecule segment sums; lane-dense 128-wide output slab ----
    atom_out = scale_z * out_sum + shift_z                       # (A, P) f32
    o_ref[...] = jnp.zeros((NM, OUT_LANES), f32)                 # one full unmasked store
    o_ref[:, :P] = gather_exact(mol_oh, atom_out)                # molecule properties
    if P > 1:
        d_atom = atom_out[:, P - 1:P] * R                        # (A, 3) dipole contributions
        o_ref[:, P:P + 3] = gather_exact(mol_oh, d_atom)


# --------------------------------------------------------------------------- parameters
def init_params(key, n_atom_embed, F, K, P, num_modules,
                n_res_atom, n_res_interact, n_res_out, n_lin_out, cutoff):
    ks = jax.random.split(key, 13)
    M = num_modules

    def lin(k, *shape, fan_in):
        w = jax.random.normal(k, shape, jnp.float32) / math.sqrt(fan_in)
        b = jnp.zeros(shape[:-2] + (1, shape[-1]), jnp.float32)
        return w, b

    p = {}
    p["embedding"] = jax.random.uniform(
        ks[0], (n_atom_embed, F), jnp.float32, -math.sqrt(3.0), math.sqrt(3.0))
    # exactly as in PhysNetDemo.__init__
    centers = jnp.linspace(1.0, math.exp(-cutoff), K).astype(jnp.float32)
    centers = jax.nn.softplus(_softplus_inverse(centers))
    width_val = _softplus_inverse((0.5 / ((1.0 - math.exp(-cutoff)) / K)) ** 2)
    p["centers"] = centers.reshape(1, K)
    p["widths"] = jnp.full((1, K), width_val, jnp.float32)
    p["cutoff"] = float(cutoff)                       # static (requires_grad=False in torch)
    p["scale"] = jnp.ones((n_atom_embed, P), jnp.float32)
    p["shift"] = jnp.zeros((n_atom_embed, P), jnp.float32)

    # ---- per-module weights, stacked along a leading (num_modules, ...) axis ----
    p["W_rbf"] = jax.random.normal(ks[1], (M, K, F), jnp.float32) / math.sqrt(K)
    p["W_j"], p["b_j"] = lin(ks[2], M, F, F, fan_in=F)
    p["W_i"], p["b_i"] = lin(ks[3], M, F, F, fan_in=F)
    ri_n = max(n_res_interact, 1)                     # dummy slot if the stack is empty
    p["ri_w1"], p["ri_b1"] = lin(ks[4], M, ri_n, F, F, fan_in=F)
    p["ri_w2"], p["ri_b2"] = lin(ks[5], M, ri_n, F, F, fan_in=F)
    p["gate"] = jnp.ones((M, 1, F), jnp.float32)
    p["W_u"], p["b_u"] = lin(ks[6], M, F, F, fan_in=F)
    ra_n = max(n_res_atom, 1)
    p["ra_w1"], p["ra_b1"] = lin(ks[7], M, ra_n, F, F, fan_in=F)
    p["ra_w2"], p["ra_b2"] = lin(ks[8], M, ra_n, F, F, fan_in=F)
    ro_n = max(n_res_out, 1)
    p["ro_w1"], p["ro_b1"] = lin(ks[9], M, ro_n, F, F, fan_in=F)
    p["ro_w2"], p["ro_b2"] = lin(ks[10], M, ro_n, F, F, fan_in=F)
    ol_n = max(n_lin_out - 1, 1)
    p["ol_w"], p["ol_b"] = lin(ks[11], M, ol_n, F, F, fan_in=F)
    p["of_w"], p["of_b"] = lin(ks[12], M, F, P, fan_in=F)

    # static hyper-parameters (python ints; params is closed over, never traced)
    p["n_res_interact"] = n_res_interact
    p["n_res_atom"] = n_res_atom
    p["n_res_out"] = n_res_out
    p["n_lin_out"] = n_lin_out
    return p


# --------------------------------------------------------------------------- forward
def physnet_forward(params, R, Z, edge_index, atom_mol_batch, n_mol):
    src = edge_index[0].astype(jnp.int32)
    dst = edge_index[1].astype(jnp.int32)
    E = src.shape[0]
    A = Z.shape[0]
    P = params["scale"].shape[1]
    assert P + 3 <= OUT_LANES, "dipole columns would overflow the 128-lane output slab"
    NM = _round_up(max(n_mol, 1), 8)

    # bf16 MXU operands for all weight matrices (biases / gate / tables stay f32 masters).
    bf = lambda x: x.astype(jnp.bfloat16)

    args = (
        src.reshape(E, 1), dst.reshape(E, 1), dst.reshape(1, E),
        Z.astype(jnp.int32).reshape(A, 1),
        atom_mol_batch.astype(jnp.int32).reshape(1, A),
        R.astype(jnp.float32),
        params["embedding"], params["scale"], params["shift"],
        params["centers"], params["widths"],
        bf(params["W_rbf"]), bf(params["W_j"]), params["b_j"], bf(params["W_i"]), params["b_i"],
        bf(params["ri_w1"]), params["ri_b1"], bf(params["ri_w2"]), params["ri_b2"],
        params["gate"], bf(params["W_u"]), params["b_u"],
        bf(params["ra_w1"]), params["ra_b1"], bf(params["ra_w2"]), params["ra_b2"],
        bf(params["ro_w1"]), params["ro_b1"], bf(params["ro_w2"]), params["ro_b2"],
        bf(params["ol_w"]), params["ol_b"], bf(params["of_w"]), params["of_b"],
    )

    kernel = functools.partial(
        _physnet_fused_kernel,
        cutoff=params["cutoff"],
        n_res_interact=params["n_res_interact"],
        n_res_atom=params["n_res_atom"],
        n_res_out=params["n_res_out"],
        n_lin_out=params["n_lin_out"],
    )

    # VMEM limit derived from the actual footprint (4x headroom for temporaries), clamped
    # against the v7x physical budget of 64 MiB (v5e/v6e have 128 MiB physical).
    out_bytes = NM * OUT_LANES * 4
    in_bytes = sum(int(a.size) * a.dtype.itemsize for a in args)
    vmem_limit = int(min(64 * 1024 * 1024, max(4 * 1024 * 1024, 4 * (in_bytes + out_bytes))))

    # TODO(synk): for large A add an atom-axis grid with dimension_semantics=("parallel",)
    # (or pl.core_map over a 2-TC mesh) so both v7x TensorCores are used.
    out = pl.pallas_call(
        kernel,
        out_shape=jax.ShapeDtypeStruct((NM, OUT_LANES), jnp.float32),
        compiler_params=pltpu.CompilerParams(vmem_limit_bytes=vmem_limit),
    )(*args)

    mol_props = out[:n_mol, :P]
    E_pred = mol_props[:, 0]
    F_pred = 0.0
    Q_pred = 0.0
    D_pred = 0.0
    if P > 1:
        Q_pred = mol_props[:, -1]
        D_pred = out[:n_mol, P:P + 3]
    return E_pred, F_pred, Q_pred, D_pred


# --------------------------------------------------------------------------- pure-JAX reference
def _reference_forward(params, R, Z, edge_index, atom_mol_batch, n_mol):
    src, dst = edge_index[0], edge_index[1]
    hp = jax.lax.Precision.HIGHEST

    def dot(a, b):
        return jnp.dot(a, b, precision=hp)

    def res(x, w1, b1, w2, b2):
        h = dot(_ssp(x), w1) + b1
        h = dot(_ssp(h), w2) + b2
        return x + h

    diff = R[src] - R[dst] + 1e-6
    d = jnp.sqrt(jnp.sum(diff * diff, axis=-1, keepdims=True))
    cutoff = params["cutoff"]
    u = d / cutoff
    phi = jnp.where(d < cutoff, 1.0 - 6.0 * u ** 5 + 15.0 * u ** 4 - 10.0 * u ** 3, 0.0)
    rbf = phi * jnp.exp(-params["widths"] * (jnp.exp(-d) - params["centers"]) ** 2)

    vi = params["embedding"][Z]
    P = params["scale"].shape[1]
    out_sum = jnp.zeros((Z.shape[0], P), jnp.float32)
    for m in range(params["W_rbf"].shape[0]):
        xj = vi[src]
        msg = dot(rbf, params["W_rbf"][m]) * (dot(_ssp(xj), params["W_j"][m]) + params["b_j"][m])
        agg = jax.ops.segment_sum(msg, dst, num_segments=Z.shape[0])
        v = agg + dot(_ssp(vi), params["W_i"][m]) + params["b_i"][m]
        for r in range(params["n_res_interact"]):
            v = res(v, params["ri_w1"][m, r], params["ri_b1"][m, r],
                    params["ri_w2"][m, r], params["ri_b2"][m, r])
        vi = params["gate"][m] * vi + dot(_ssp(v), params["W_u"][m]) + params["b_u"][m]
        for r in range(params["n_res_atom"]):
            vi = res(vi, params["ra_w1"][m, r], params["ra_b1"][m, r],
                     params["ra_w2"][m, r], params["ra_b2"][m, r])
        y = vi
        for r in range(params["n_res_out"]):
            y = res(y, params["ro_w1"][m, r], params["ro_b1"][m, r],
                    params["ro_w2"][m, r], params["ro_b2"][m, r])
        for l in range(params["n_lin_out"] - 1):
            y = dot(_ssp(y), params["ol_w"][m, l]) + params["ol_b"][m, l]
        out_sum = out_sum + dot(_ssp(y), params["of_w"][m]) + params["of_b"][m]

    atom_out = params["scale"][Z] * out_sum + params["shift"][Z]
    mol = jax.ops.segment_sum(atom_out, atom_mol_batch, num_segments=n_mol)
    E_pred = mol[:, 0]
    Q_pred = mol[:, -1]
    D_pred = jax.ops.segment_sum(atom_out[:, -1:] * R, atom_mol_batch, num_segments=n_mol)
    return E_pred, Q_pred, D_pred


# --------------------------------------------------------------------------- main
if __name__ == "__main__":
    # hyper-parameters (small shapes consistent with PhysNetDemo.__init__)
    # TODO(synk): pad F / K to multiples of 128 lanes when scaling past the demo config.
    n_atom_embed = 10
    num_features = 32
    num_output = 2              # > 1 so Q_pred / D_pred branches are exercised
    cut_off_radius = 10.0
    num_kernel = 16
    num_modules = 2
    num_res_atom = 1
    num_res_interact = 1
    num_res_out = 1
    num_lin_out = 2

    key = jax.random.PRNGKey(0)
    k_param, k_R, k_Z = jax.random.split(key, 3)

    params = init_params(k_param, n_atom_embed, num_features, num_kernel, num_output,
                         num_modules, num_res_atom, num_res_interact, num_res_out,
                         num_lin_out, cut_off_radius)

    # synthetic data: 2 molecules of 4 atoms each (N / Q fields of the torch "data"
    # object are unused by the reference forward and therefore omitted)
    n_mol = 2
    atoms_per_mol = 4
    n_atoms = n_mol * atoms_per_mol
    R = jax.random.normal(k_R, (n_atoms, 3), jnp.float32) * 2.0
    Z = jax.random.randint(k_Z, (n_atoms,), 1, n_atom_embed)
    atom_mol_batch = jnp.repeat(jnp.arange(n_mol, dtype=jnp.int32), atoms_per_mol)

    # fully-connected intra-molecule edges (no self-loops): edge_index [2, 24]
    edges = []
    for m in range(n_mol):
        base = m * atoms_per_mol
        for i in range(atoms_per_mol):
            for j in range(atoms_per_mol):
                if i != j:
                    edges.append((base + i, base + j))
    edge_index = jnp.array(edges, dtype=jnp.int32).T

    # jit the wrapper; the only host-side glue left is int reshapes + the one-time bf16
    # weight cast (constant-folded), all fused around the single Pallas launch.
    fwd = jax.jit(lambda R_, Z_, ei_, amb_: physnet_forward(params, R_, Z_, ei_, amb_, n_mol))

    E_pred, F_pred, Q_pred, D_pred = fwd(R, Z, edge_index, atom_mol_batch)
    (E_pred, Q_pred, D_pred) = jax.block_until_ready((E_pred, Q_pred, D_pred))

    assert E_pred.shape == (n_mol,)
    assert Q_pred.shape == (n_mol,)
    assert D_pred.shape == (n_mol, 3)
    assert bool(jnp.all(jnp.isfinite(E_pred)))
    assert bool(jnp.all(jnp.isfinite(Q_pred)))
    assert bool(jnp.all(jnp.isfinite(D_pred)))

    # correctness check against a pure-JAX f32 (Precision.HIGHEST) reference; the 5e-2
    # tolerance absorbs the bf16-MXU-operand precision of the kernel body.
    E_ref, Q_ref, D_ref = _reference_forward(params, R, Z, edge_index, atom_mol_batch, n_mol)
    assert bool(jnp.allclose(E_pred, E_ref, rtol=5e-2, atol=5e-2)), (E_pred, E_ref)
    assert bool(jnp.allclose(Q_pred, Q_ref, rtol=5e-2, atol=5e-2)), (Q_pred, Q_ref)
    assert bool(jnp.allclose(D_pred, D_ref, rtol=5e-2, atol=5e-2)), (D_pred, D_ref)

    print("KERNEL_OK")
</pallas_src>

<mosaic_0001>
module attributes {stable_mosaic.version = 11 : i64} {
  func.func @_physnet_fused_kernel(%arg0: memref<24x1xi32, #tpu.memory_space<vmem>>, %arg1: memref<24x1xi32, #tpu.memory_space<vmem>>, %arg2: memref<1x24xi32, #tpu.memory_space<vmem>>, %arg3: memref<8x1xi32, #tpu.memory_space<vmem>>, %arg4: memref<1x8xi32, #tpu.memory_space<vmem>>, %arg5: memref<8x3xf32, #tpu.memory_space<vmem>>, %arg6: memref<10x32xf32, #tpu.memory_space<vmem>>, %arg7: memref<10x2xf32, #tpu.memory_space<vmem>>, %arg8: memref<10x2xf32, #tpu.memory_space<vmem>>, %arg9: memref<1x16xf32, #tpu.memory_space<vmem>>, %arg10: memref<1x16xf32, #tpu.memory_space<vmem>>, %arg11: memref<2x16x32xbf16, #tpu.memory_space<vmem>>, %arg12: memref<2x32x32xbf16, #tpu.memory_space<vmem>>, %arg13: memref<2x1x32xf32, #tpu.memory_space<vmem>>, %arg14: memref<2x32x32xbf16, #tpu.memory_space<vmem>>, %arg15: memref<2x1x32xf32, #tpu.memory_space<vmem>>, %arg16: memref<2x1x32x32xbf16, #tpu.memory_space<vmem>>, %arg17: memref<2x1x1x32xf32, #tpu.memory_space<vmem>>, %arg18: memref<2x1x32x32xbf16, #tpu.memory_space<vmem>>, %arg19: memref<2x1x1x32xf32, #tpu.memory_space<vmem>>, %arg20: memref<2x1x32xf32, #tpu.memory_space<vmem>>, %arg21: memref<2x32x32xbf16, #tpu.memory_space<vmem>>, %arg22: memref<2x1x32xf32, #tpu.memory_space<vmem>>, %arg23: memref<2x1x32x32xbf16, #tpu.memory_space<vmem>>, %arg24: memref<2x1x1x32xf32, #tpu.memory_space<vmem>>, %arg25: memref<2x1x32x32xbf16, #tpu.memory_space<vmem>>, %arg26: memref<2x1x1x32xf32, #tpu.memory_space<vmem>>, %arg27: memref<2x1x32x32xbf16, #tpu.memory_space<vmem>>, %arg28: memref<2x1x1x32xf32, #tpu.memory_space<vmem>>, %arg29: memref<2x1x32x32xbf16, #tpu.memory_space<vmem>>, %arg30: memref<2x1x1x32xf32, #tpu.memory_space<vmem>>, %arg31: memref<2x1x32x32xbf16, #tpu.memory_space<vmem>>, %arg32: memref<2x1x1x32xf32, #tpu.memory_space<vmem>>, %arg33: memref<2x32x2xbf16, #tpu.memory_space<vmem>>, %arg34: memref<2x1x2xf32, #tpu.memory_space<vmem>>, %arg35: memref<8x128xf32, #tpu.memory_space<vmem>>) attributes {dimension_semantics = [], scalar_prefetch = 0 : i64, scratch_operands = 0 : i64, tpu.core_type = #tpu.core_type<tc>} {
    %0 = tpu.iota {dimensions = array<i32: 1>} : vector<24x8xi32>
    %c0 = arith.constant 0 : index
    %c0_0 = arith.constant 0 : index
    %1 = vector.load %arg0[%c0, %c0_0] : memref<24x1xi32, #tpu.memory_space<vmem>>, vector<24x1xi32>
    %2 = vector.broadcast %1 : vector<24x1xi32> to vector<24x8xi32>
    %3 = arith.cmpi eq, %0, %2 : vector<24x8xi32>
    %cst = arith.constant 1.000000e+00 : f32
    %cst_1 = arith.constant 0.000000e+00 : f32
    %4 = vector.broadcast %cst : f32 to vector<24x8xf32>
    %5 = vector.broadcast %cst_1 : f32 to vector<24x8xf32>
    %6 = arith.select %3, %4, %5 : vector<24x8xi1>, vector<24x8xf32>
    %c0_2 = arith.constant 0 : index
    %c0_3 = arith.constant 0 : index
    %7 = vector.load %arg1[%c0_2, %c0_3] : memref<24x1xi32, #tpu.memory_space<vmem>>, vector<24x1xi32>
    %8 = vector.broadcast %7 : vector<24x1xi32> to vector<24x8xi32>
    %9 = arith.cmpi eq, %0, %8 : vector<24x8xi32>
    %cst_4 = arith.constant 1.000000e+00 : f32
    %cst_5 = arith.constant 0.000000e+00 : f32
    %10 = vector.broadcast %cst_4 : f32 to vector<24x8xf32>
    %11 = vector.broadcast %cst_5 : f32 to vector<24x8xf32>
    %12 = arith.select %9, %10, %11 : vector<24x8xi1>, vector<24x8xf32>
    %13 = tpu.iota {dimensions = array<i32: 0>} : vector<8x24xi32>
    %c0_6 = arith.constant 0 : index
    %c0_7 = arith.constant 0 : index
    %14 = vector.load %arg2[%c0_6, %c0_7] : memref<1x24xi32, #tpu.memory_space<vmem>>, vector<1x24xi32>
    %15 = vector.broadcast %14 : vector<1x24xi32> to vector<8x24xi32>
    %16 = arith.cmpi eq, %13, %15 : vector<8x24xi32>
    %cst_8 = arith.constant 1.000000e+00 : f32
    %cst_9 = arith.constant 0.000000e+00 : f32
    %17 = vector.broadcast %cst_8 : f32 to vector<8x24xf32>
    %18 = vector.broadcast %cst_9 : f32 to vector<8x24xf32>
    %19 = arith.select %16, %17, %18 : vector<8x24xi1>, vector<8x24xf32>
    %20 = tpu.iota {dimensions = array<i32: 1>} : vector<8x10xi32>
    %c0_10 = arith.constant 0 : index
    %c0_11 = arith.constant 0 : index
    %21 = vector.load %arg3[%c0_10, %c0_11] : memref<8x1xi32, #tpu.memory_space<vmem>>, vector<8x1xi32>
    %22 = vector.broadcast %21 : vector<8x1xi32> to vector<8x10xi32>
    %23 = arith.cmpi eq, %20, %22 : vector<8x10xi32>
    %cst_12 = arith.constant 1.000000e+00 : f32
    %cst_13 = arith.constant 0.000000e+00 : f32
    %24 = vector.broadcast %cst_12 : f32 to vector<8x10xf32>
    %25 = vector.broadcast %cst_13 : f32 to vector<8x10xf32>
    %26 = arith.select %23, %24, %25 : vector<8x10xi1>, vector<8x10xf32>
    %27 = tpu.iota {dimensions = array<i32: 0>} : vector<8x8xi32>
    %c0_14 = arith.constant 0 : index
    %c0_15 = arith.constant 0 : index
    %28 = vector.load %arg4[%c0_14, %c0_15] : memref<1x8xi32, #tpu.memory_space<vmem>>, vector<1x8xi32>
    %29 = vector.broadcast %28 : vector<1x8xi32> to vector<8x8xi32>
    %30 = arith.cmpi eq, %27, %29 : vector<8x8xi32>
    %cst_16 = arith.constant 1.000000e+00 : f32
    %cst_17 = arith.constant 0.000000e+00 : f32
    %31 = vector.broadcast %cst_16 : f32 to vector<8x8xf32>
    %32 = vector.broadcast %cst_17 : f32 to vector<8x8xf32>
    %33 = arith.select %30, %31, %32 : vector<8x8xi1>, vector<8x8xf32>
    %c0_18 = arith.constant 0 : index
    %c0_19 = arith.constant 0 : index
    %34 = vector.load %arg5[%c0_18, %c0_19] : memref<8x3xf32, #tpu.memory_space<vmem>>, vector<8x3xf32>
    %35 = arith.subf %6, %12 : vector<24x8xf32>
    %36 = arith.truncf %35 : vector<24x8xf32> to vector<24x8xbf16>
    %37 = arith.truncf %34 : vector<8x3xf32> to vector<8x3xbf16>
    %38 = arith.extf %37 : vector<8x3xbf16> to vector<8x3xf32>
    %39 = arith.subf %34, %38 : vector<8x3xf32>
    %40 = arith.truncf %39 : vector<8x3xf32> to vector<8x3xbf16>
    %cst_20 = arith.constant dense<0.000000e+00> : vector<24x3xf32>
    %41 = tpu.matmul %36, %37, %cst_20 {dimension_numbers = #tpu.dot_dimension_numbers<[1], [0], [0], [1], [0, 0, 1, 1], [], []>} : vector<24x8xbf16>, vector<8x3xbf16>, vector<24x3xf32> -> vector<24x3xf32>
    %cst_21 = arith.constant dense<0.000000e+00> : vector<24x3xf32>
    %42 = tpu.matmul %36, %40, %cst_21 {dimension_numbers = #tpu.dot_dimension_numbers<[1], [0], [0], [1], [0, 0, 1, 1], [], []>} : vector<24x8xbf16>, vector<8x3xbf16>, vector<24x3xf32> -> vector<24x3xf32>
    %43 = arith.addf %41, %42 : vector<24x3xf32>
    %cst_22 = arith.constant 9.99999997E-7 : f32
    %44 = vector.broadcast %cst_22 : f32 to vector<24x3xf32>
    %45 = arith.addf %43, %44 : vector<24x3xf32>
    %46 = arith.mulf %45, %45 : vector<24x3xf32>
    %cst_23 = arith.constant dense<0.000000e+00> : vector<24xf32>
    %47 = vector.multi_reduction <add>, %46, %cst_23 [1] : vector<24x3xf32> to vector<24xf32>
    %48 = vector.shape_cast %47 : vector<24xf32> to vector<24x1xf32>
    %49 = math.sqrt %48 : vector<24x1xf32>
    %cst_24 = arith.constant 1.000000e-01 : f32
    %50 = vector.broadcast %cst_24 : f32 to vector<24x1xf32>
    %51 = arith.mulf %49, %50 : vector<24x1xf32>
    %52 = arith.mulf %51, %51 : vector<24x1xf32>
    %53 = arith.mulf %52, %51 : vector<24x1xf32>
    %cst_25 = arith.constant 6.000000e+00 : f32
    %54 = vector.broadcast %cst_25 : f32 to vector<24x1xf32>
    %55 = arith.mulf %54, %51 : vector<24x1xf32>
    %cst_26 = arith.constant 1.500000e+01 : f32
    %56 = vector.broadcast %cst_26 : f32 to vector<24x1xf32>
    %57 = arith.subf %56, %55 : vector<24x1xf32>
    %58 = arith.mulf %51, %57 : vector<24x1xf32>
    %cst_27 = arith.constant -1.000000e+01 : f32
    %59 = vector.broadcast %cst_27 : f32 to vector<24x1xf32>
    %60 = arith.addf %59, %58 : vector<24x1xf32>
    %61 = arith.mulf %53, %60 : vector<24x1xf32>
    %cst_28 = arith.constant 1.000000e+00 : f32
    %62 = vector.broadcast %cst_28 : f32 to vector<24x1xf32>
    %63 = arith.addf %62, %61 : vector<24x1xf32>
    %cst_29 = arith.constant 1.000000e+01 : f32
    %64 = vector.broadcast %cst_29 : f32 to vector<24x1xf32>
    %65 = arith.cmpf olt, %49, %64 : vector<24x1xf32>
    %cst_30 = arith.constant 0.000000e+00 : f32
    %66 = vector.broadcast %cst_30 : f32 to vector<24x1xf32>
    %67 = arith.select %65, %63, %66 : vector<24x1xi1>, vector<24x1xf32>
    %c0_31 = arith.constant 0 : index
    %c0_32 = arith.constant 0 : index
    %68 = vector.load %arg9[%c0_31, %c0_32] : memref<1x16xf32, #tpu.memory_space<vmem>>, vector<1x16xf32>
    %c0_33 = arith.constant 0 : index
    %c0_34 = arith.constant 0 : index
    %69 = vector.load %arg10[%c0_33, %c0_34] : memref<1x16xf32, #tpu.memory_space<vmem>>, vector<1x16xf32>
    %cst_35 = arith.constant 0.000000e+00 : f32
    %70 = vector.broadcast %cst_35 : f32 to vector<24x1xf32>
    %71 = arith.subf %70, %49 : vector<24x1xf32>
    %72 = math.exp %71 : vector<24x1xf32>
    %73 = vector.broadcast %72 : vector<24x1xf32> to vector<24x16xf32>
    %74 = vector.broadcast %68 : vector<1x16xf32> to vector<24x16xf32>
    %75 = arith.subf %73, %74 : vector<24x16xf32>
    %cst_36 = arith.constant 0.000000e+00 : f32
    %76 = vector.broadcast %cst_36 : f32 to vector<1x16xf32>
    %77 = arith.subf %76, %69 : vector<1x16xf32>
    %78 = vector.broadcast %77 : vector<1x16xf32> to vector<24x16xf32>
    %79 = arith.mulf %78, %75 : vector<24x16xf32>
    %80 = arith.mulf %79, %75 : vector<24x16xf32>
    %81 = math.exp %80 : vector<24x16xf32>
    %82 = vector.broadcast %67 : vector<24x1xf32> to vector<24x16xf32>
    %83 = arith.mulf %82, %81 : vector<24x16xf32>
    %c0_37 = arith.constant 0 : index
    %c0_38 = arith.constant 0 : index
    %84 = vector.load %arg6[%c0_37, %c0_38] : memref<10x32xf32, #tpu.memory_space<vmem>>, vector<10x32xf32>
    %85 = arith.truncf %26 : vector<8x10xf32> to vector<8x10xbf16>
    %86 = arith.truncf %84 : vector<10x32xf32> to vector<10x32xbf16>
    %87 = arith.extf %86 : vector<10x32xbf16> to vector<10x32xf32>
    %88 = arith.subf %84, %87 : vector<10x32xf32>
    %89 = arith.truncf %88 : vector<10x32xf32> to vector<10x32xbf16>
    %cst_39 = arith.constant dense<0.000000e+00> : vector<8x32xf32>
    %90 = tpu.matmul %85, %86, %cst_39 {dimension_numbers = #tpu.dot_dimension_numbers<[1], [0], [0], [1], [0, 0, 1, 1], [], []>} : vector<8x10xbf16>, vector<10x32xbf16>, vector<8x32xf32> -> vector<8x32xf32>
    %cst_40 = arith.constant dense<0.000000e+00> : vector<8x32xf32>
    %91 = tpu.matmul %85, %89, %cst_40 {dimension_numbers = #tpu.dot_dimension_numbers<[1], [0], [0], [1], [0, 0, 1, 1], [], []>} : vector<8x10xbf16>, vector<10x32xbf16>, vector<8x32xf32> -> vector<8x32xf32>
    %92 = arith.addf %90, %91 : vector<8x32xf32>
    %c0_41 = arith.constant 0 : index
    %c0_42 = arith.constant 0 : index
    %93 = vector.load %arg7[%c0_41, %c0_42] : memref<10x2xf32, #tpu.memory_space<vmem>>, vector<10x2xf32>
    %94 = arith.truncf %26 : vector<8x10xf32> to vector<8x10xbf16>
    %95 = arith.truncf %93 : vector<10x2xf32> to vector<10x2xbf16>
    %96 = arith.extf %95 : vector<10x2xbf16> to vector<10x2xf32>
    %97 = arith.subf %93, %96 : vector<10x2xf32>
    %98 = arith.truncf %97 : vector<10x2xf32> to vector<10x2xbf16>
    %cst_43 = arith.constant dense<0.000000e+00> : vector<8x2xf32>
    %99 = tpu.matmul %94, %95, %cst_43 {dimension_numbers = #tpu.dot_dimension_numbers<[1], [0], [0], [1], [0, 0, 1, 1], [], []>} : vector<8x10xbf16>, vector<10x2xbf16>, vector<8x2xf32> -> vector<8x2xf32>
    %cst_44 = arith.constant dense<0.000000e+00> : vector<8x2xf32>
    %100 = tpu.matmul %94, %98, %cst_44 {dimension_numbers = #tpu.dot_dimension_numbers<[1], [0], [0], [1], [0, 0, 1, 1], [], []>} : vector<8x10xbf16>, vector<10x2xbf16>, vector<8x2xf32> -> vector<8x2xf32>
    %101 = arith.addf %99, %100 : vector<8x2xf32>
    %c0_45 = arith.constant 0 : index
    %c0_46 = arith.constant 0 : index
    %102 = vector.load %arg8[%c0_45, %c0_46] : memref<10x2xf32, #tpu.memory_space<vmem>>, vector<10x2xf32>
    %103 = arith.truncf %26 : vector<8x10xf32> to vector<8x10xbf16>
    %104 = arith.truncf %102 : vector<10x2xf32> to vector<10x2xbf16>
    %105 = arith.extf %104 : vector<10x2xbf16> to vector<10x2xf32>
    %106 = arith.subf %102, %105 : vector<10x2xf32>
    %107 = arith.truncf %106 : vector<10x2xf32> to vector<10x2xbf16>
    %cst_47 = arith.constant dense<0.000000e+00> : vector<8x2xf32>
    %108 = tpu.matmul %103, %104, %cst_47 {dimension_numbers = #tpu.dot_dimension_numbers<[1], [0], [0], [1], [0, 0, 1, 1], [], []>} : vector<8x10xbf16>, vector<10x2xbf16>, vector<8x2xf32> -> vector<8x2xf32>
    %cst_48 = arith.constant dense<0.000000e+00> : vector<8x2xf32>
    %109 = tpu.matmul %103, %107, %cst_48 {dimension_numbers = #tpu.dot_dimension_numbers<[1], [0], [0], [1], [0, 0, 1, 1], [], []>} : vector<8x10xbf16>, vector<10x2xbf16>, vector<8x2xf32> -> vector<8x2xf32>
    %110 = arith.addf %108, %109 : vector<8x2xf32>
    %cst_49 = arith.constant 0.000000e+00 : f32
    %111 = vector.broadcast %cst_49 : f32 to vector<8x2xf32>
    %112 = arith.truncf %6 : vector<24x8xf32> to vector<24x8xbf16>
    %113 = arith.truncf %92 : vector<8x32xf32> to vector<8x32xbf16>
    %cst_50 = arith.constant dense<0.000000e+00> : vector<24x32xf32>
    %114 = tpu.matmul %112, %113, %cst_50 {dimension_numbers = #tpu.dot_dimension_numbers<[1], [0], [0], [1], [0, 0, 1, 1], [], []>} : vector<24x8xbf16>, vector<8x32xbf16>, vector<24x32xf32> -> vector<24x32xf32>
    %c0_51 = arith.constant 0 : index
    %c0_52 = arith.constant 0 : index
    %c0_53 = arith.constant 0 : index
    %115 = vector.load %arg11[%c0_51, %c0_52, %c0_53] : memref<2x16x32xbf16, #tpu.memory_space<vmem>>, vector<1x16x32xbf16>
    %116 = vector.shape_cast %115 : vector<1x16x32xbf16> to vector<16x32xbf16>
    %117 = arith.truncf %83 : vector<24x16xf32> to vector<24x16xbf16>
    %cst_54 = arith.constant dense<0.000000e+00> : vector<24x32xf32>
    %118 = tpu.matmul %117, %116, %cst_54 {dimension_numbers = #tpu.dot_dimension_numbers<[1], [0], [0], [1], [0, 0, 1, 1], [], []>} : vector<24x16xbf16>, vector<16x32xbf16>, vector<24x32xf32> -> vector<24x32xf32>
    %cst_55 = arith.constant 0.000000e+00 : f32
    %119 = vector.broadcast %cst_55 : f32 to vector<24x32xf32>
    %120 = arith.maximumf %114, %119 : vector<24x32xf32>
    %121 = math.absf %114 : vector<24x32xf32>
    %cst_56 = arith.constant 0.000000e+00 : f32
    %122 = vector.broadcast %cst_56 : f32 to vector<24x32xf32>
    %123 = arith.subf %122, %121 : vector<24x32xf32>
    %124 = math.exp %123 : vector<24x32xf32>
    %125 = math.log1p %124 : vector<24x32xf32>
    %126 = arith.addf %120, %125 : vector<24x32xf32>
    %cst_57 = arith.constant 0.693147182 : f32
    %127 = vector.broadcast %cst_57 : f32 to vector<24x32xf32>
    %128 = arith.subf %126, %127 : vector<24x32xf32>
    %c0_58 = arith.constant 0 : index
    %c0_59 = arith.constant 0 : index
    %c0_60 = arith.constant 0 : index
    %129 = vector.load %arg12[%c0_58, %c0_59, %c0_60] : memref<2x32x32xbf16, #tpu.memory_space<vmem>>, vector<1x32x32xbf16>
    %130 = vector.shape_cast %129 : vector<1x32x32xbf16> to vector<32x32xbf16>
    %131 = arith.truncf %128 : vector<24x32xf32> to vector<24x32xbf16>
    %cst_61 = arith.constant dense<0.000000e+00> : vector<24x32xf32>
    %132 = tpu.matmul %131, %130, %cst_61 {dimension_numbers = #tpu.dot_dimension_numbers<[1], [0], [0], [1], [0, 0, 1, 1], [], []>} : vector<24x32xbf16>, vector<32x32xbf16>, vector<24x32xf32> -> vector<24x32xf32>
    %c0_62 = arith.constant 0 : index
    %c0_63 = arith.constant 0 : index
    %c0_64 = arith.constant 0 : index
    %133 = vector.load %arg13[%c0_62, %c0_63, %c0_64] : memref<2x1x32xf32, #tpu.memory_space<vmem>>, vector<1x1x32xf32>
    %134 = vector.shape_cast %133 : vector<1x1x32xf32> to vector<1x32xf32>
    %135 = vector.broadcast %134 : vector<1x32xf32> to vector<24x32xf32>
    %136 = arith.addf %132, %135 : vector<24x32xf32>
    %137 = arith.mulf %118, %136 : vector<24x32xf32>
    %138 = arith.truncf %19 : vector<8x24xf32> to vector<8x24xbf16>
    %139 = arith.truncf %137 : vector<24x32xf32> to vector<24x32xbf16>
    %cst_65 = arith.constant dense<0.000000e+00> : vector<8x32xf32>
    %140 = tpu.matmul %138, %139, %cst_65 {dimension_numbers = #tpu.dot_dimension_numbers<[1], [0], [0], [1], [0, 0, 1, 1], [], []>} : vector<8x24xbf16>, vector<24x32xbf16>, vector<8x32xf32> -> vector<8x32xf32>
    %cst_66 = arith.constant 0.000000e+00 : f32
    %141 = vector.broadcast %cst_66 : f32 to vector<8x32xf32>
    %142 = arith.maximumf %92, %141 : vector<8x32xf32>
    %143 = math.absf %92 : vector<8x32xf32>
    %cst_67 = arith.constant 0.000000e+00 : f32
    %144 = vector.broadcast %cst_67 : f32 to vector<8x32xf32>
    %145 = arith.subf %144, %143 : vector<8x32xf32>
    %146 = math.exp %145 : vector<8x32xf32>
    %147 = math.log1p %146 : vector<8x32xf32>
    %148 = arith.addf %142, %147 : vector<8x32xf32>
    %cst_68 = arith.constant 0.693147182 : f32
    %149 = vector.broadcast %cst_68 : f32 to vector<8x32xf32>
    %150 = arith.subf %148, %149 : vector<8x32xf32>
    %c0_69 = arith.constant 0 : index
    %c0_70 = arith.constant 0 : index
    %c0_71 = arith.constant 0 : index
    %151 = vector.load %arg14[%c0_69, %c0_70, %c0_71] : memref<2x32x32xbf16, #tpu.memory_space<vmem>>, vector<1x32x32xbf16>
    %152 = vector.shape_cast %151 : vector<1x32x32xbf16> to vector<32x32xbf16>
    %153 = arith.truncf %150 : vector<8x32xf32> to vector<8x32xbf16>
    %cst_72 = arith.constant dense<0.000000e+00> : vector<8x32xf32>
    %154 = tpu.matmul %153, %152, %cst_72 {dimension_numbers = #tpu.dot_dimension_numbers<[1], [0], [0], [1], [0, 0, 1, 1], [], []>} : vector<8x32xbf16>, vector<32x32xbf16>, vector<8x32xf32> -> vector<8x32xf32>
    %155 = arith.addf %140, %154 : vector<8x32xf32>
    %c0_73 = arith.constant 0 : index
    %c0_74 = arith.constant 0 : index
    %c0_75 = arith.constant 0 : index
    %156 = vector.load %arg15[%c0_73, %c0_74, %c0_75] : memref<2x1x32xf32, #tpu.memory_space<vmem>>, vector<1x1x32xf32>
    %157 = vector.shape_cast %156 : vector<1x1x32xf32> to vector<1x32xf32>
    %158 = vector.broadcast %157 : vector<1x32xf32> to vector<8x32xf32>
    %159 = arith.addf %155, %158 : vector<8x32xf32>
    %c0_76 = arith.constant 0 : index
    %c0_77 = arith.constant 0 : index
    %c0_78 = arith.constant 0 : index
    %c0_79 = arith.constant 0 : index
    %160 = vector.load %arg16[%c0_76, %c0_77, %c0_78, %c0_79] : memref<2x1x32x32xbf16, #tpu.memory_space<vmem>>, vector<1x1x32x32xbf16>
    %161 = vector.shape_cast %160 : vector<1x1x32x32xbf16> to vector<32x32xbf16>
    %c0_80 = arith.constant 0 : index
    %c0_81 = arith.constant 0 : index
    %c0_82 = arith.constant 0 : index
    %c0_83 = arith.constant 0 : index
    %162 = vector.load %arg17[%c0_80, %c0_81, %c0_82, %c0_83] : memref<2x1x1x32xf32, #tpu.memory_space<vmem>>, vector<1x1x1x32xf32>
    %163 = vector.shape_cast %162 : vector<1x1x1x32xf32> to vector<1x32xf32>
    %c0_84 = arith.constant 0 : index
    %c0_85 = arith.constant 0 : index
    %c0_86 = arith.constant 0 : index
    %c0_87 = arith.constant 0 : index
    %164 = vector.load %arg18[%c0_84, %c0_85, %c0_86, %c0_87] : memref<2x1x32x32xbf16, #tpu.memory_space<vmem>>, vector<1x1x32x32xbf16>
    %165 = vector.shape_cast %164 : vector<1x1x32x32xbf16> to vector<32x32xbf16>
    %c0_88 = arith.constant 0 : index
    %c0_89 = arith.constant 0 : index
    %c0_90 = arith.constant 0 : index
    %c0_91 = arith.constant 0 : index
    %166 = vector.load %arg19[%c0_88, %c0_89, %c0_90, %c0_91] : memref<2x1x1x32xf32, #tpu.memory_space<vmem>>, vector<1x1x1x32xf32>
    %167 = vector.shape_cast %166 : vector<1x1x1x32xf32> to vector<1x32xf32>
    %cst_92 = arith.constant 0.000000e+00 : f32
    %168 = vector.broadcast %cst_92 : f32 to vector<8x32xf32>
    %169 = arith.maximumf %159, %168 : vector<8x32xf32>
    %170 = math.absf %159 : vector<8x32xf32>
    %cst_93 = arith.constant 0.000000e+00 : f32
    %171 = vector.broadcast %cst_93 : f32 to vector<8x32xf32>
    %172 = arith.subf %171, %170 : vector<8x32xf32>
    %173 = math.exp %172 : vector<8x32xf32>
    %174 = math.log1p %173 : vector<8x32xf32>
    %175 = arith.addf %169, %174 : vector<8x32xf32>
    %cst_94 = arith.constant 0.693147182 : f32
    %176 = vector.broadcast %cst_94 : f32 to vector<8x32xf32>
    %177 = arith.subf %175, %176 : vector<8x32xf32>
    %178 = arith.truncf %177 : vector<8x32xf32> to vector<8x32xbf16>
    %cst_95 = arith.constant dense<0.000000e+00> : vector<8x32xf32>
    %179 = tpu.matmul %178, %161, %cst_95 {dimension_numbers = #tpu.dot_dimension_numbers<[1], [0], [0], [1], [0, 0, 1, 1], [], []>} : vector<8x32xbf16>, vector<32x32xbf16>, vector<8x32xf32> -> vector<8x32xf32>
    %180 = vector.broadcast %163 : vector<1x32xf32> to vector<8x32xf32>
    %181 = arith.addf %179, %180 : vector<8x32xf32>
    %cst_96 = arith.constant 0.000000e+00 : f32
    %182 = vector.broadcast %cst_96 : f32 to vector<8x32xf32>
    %183 = arith.maximumf %181, %182 : vector<8x32xf32>
    %184 = math.absf %181 : vector<8x32xf32>
    %cst_97 = arith.constant 0.000000e+00 : f32
    %185 = vector.broadcast %cst_97 : f32 to vector<8x32xf32>
    %186 = arith.subf %185, %184 : vector<8x32xf32>
    %187 = math.exp %186 : vector<8x32xf32>
    %188 = math.log1p %187 : vector<8x32xf32>
    %189 = arith.addf %183, %188 : vector<8x32xf32>
    %cst_98 = arith.constant 0.693147182 : f32
    %190 = vector.broadcast %cst_98 : f32 to vector<8x32xf32>
    %191 = arith.subf %189, %190 : vector<8x32xf32>
    %192 = arith.truncf %191 : vector<8x32xf32> to vector<8x32xbf16>
    %cst_99 = arith.constant dense<0.000000e+00> : vector<8x32xf32>
    %193 = tpu.matmul %192, %165, %cst_99 {dimension_numbers = #tpu.dot_dimension_numbers<[1], [0], [0], [1], [0, 0, 1, 1], [], []>} : vector<8x32xbf16>, vector<32x32xbf16>, vector<8x32xf32> -> vector<8x32xf32>
    %194 = vector.broadcast %167 : vector<1x32xf32> to vector<8x32xf32>
    %195 = arith.addf %193, %194 : vector<8x32xf32>
    %196 = arith.addf %159, %195 : vector<8x32xf32>
    %c0_100 = arith.constant 0 : index
    %c0_101 = arith.constant 0 : index
    %c0_102 = arith.constant 0 : index
    %197 = vector.load %arg20[%c0_100, %c0_101, %c0_102] : memref<2x1x32xf32, #tpu.memory_space<vmem>>, vector<1x1x32xf32>
    %198 = vector.shape_cast %197 : vector<1x1x32xf32> to vector<1x32xf32>
    %199 = vector.broadcast %198 : vector<1x32xf32> to vector<8x32xf32>
    %200 = arith.mulf %199, %92 : vector<8x32xf32>
    %cst_103 = arith.constant 0.000000e+00 : f32
    %201 = vector.broadcast %cst_103 : f32 to vector<8x32xf32>
    %202 = arith.maximumf %196, %201 : vector<8x32xf32>
    %203 = math.absf %196 : vector<8x32xf32>
    %cst_104 = arith.constant 0.000000e+00 : f32
    %204 = vector.broadcast %cst_104 : f32 to vector<8x32xf32>
    %205 = arith.subf %204, %203 : vector<8x32xf32>
    %206 = math.exp %205 : vector<8x32xf32>
    %207 = math.log1p %206 : vector<8x32xf32>
    %208 = arith.addf %202, %207 : vector<8x32xf32>
    %cst_105 = arith.constant 0.693147182 : f32
    %209 = vector.broadcast %cst_105 : f32 to vector<8x32xf32>
    %210 = arith.subf %208, %209 : vector<8x32xf32>
    %c0_106 = arith.constant 0 : index
    %c0_107 = arith.constant 0 : index
    %c0_108 = arith.constant 0 : index
    %211 = vector.load %arg21[%c0_106, %c0_107, %c0_108] : memref<2x32x32xbf16, #tpu.memory_space<vmem>>, vector<1x32x32xbf16>
    %212 = vector.shape_cast %211 : vector<1x32x32xbf16> to vector<32x32xbf16>
    %213 = arith.truncf %210 : vector<8x32xf32> to vector<8x32xbf16>
    %cst_109 = arith.constant dense<0.000000e+00> : vector<8x32xf32>
    %214 = tpu.matmul %213, %212, %cst_109 {dimension_numbers = #tpu.dot_dimension_numbers<[1], [0], [0], [1], [0, 0, 1, 1], [], []>} : vector<8x32xbf16>, vector<32x32xbf16>, vector<8x32xf32> -> vector<8x32xf32>
    %215 = arith.addf %200, %214 : vector<8x32xf32>
    %c0_110 = arith.constant 0 : index
    %c0_111 = arith.constant 0 : index
    %c0_112 = arith.constant 0 : index
    %216 = vector.load %arg22[%c0_110, %c0_111, %c0_112] : memref<2x1x32xf32, #tpu.memory_space<vmem>>, vector<1x1x32xf32>
    %217 = vector.shape_cast %216 : vector<1x1x32xf32> to vector<1x32xf32>
    %218 = vector.broadcast %217 : vector<1x32xf32> to vector<8x32xf32>
    %219 = arith.addf %215, %218 : vector<8x32xf32>
    %c0_113 = arith.constant 0 : index
    %c0_114 = arith.constant 0 : index
    %c0_115 = arith.constant 0 : index
    %c0_116 = arith.constant 0 : index
    %220 = vector.load %arg23[%c0_113, %c0_114, %c0_115, %c0_116] : memref<2x1x32x32xbf16, #tpu.memory_space<vmem>>, vector<1x1x32x32xbf16>
    %221 = vector.shape_cast %220 : vector<1x1x32x32xbf16> to vector<32x32xbf16>
    %c0_117 = arith.constant 0 : index
    %c0_118 = arith.constant 0 : index
    %c0_119 = arith.constant 0 : index
    %c0_120 = arith.constant 0 : index
    %222 = vector.load %arg24[%c0_117, %c0_118, %c0_119, %c0_120] : memref<2x1x1x32xf32, #tpu.memory_space<vmem>>, vector<1x1x1x32xf32>
    %223 = vector.shape_cast %222 : vector<1x1x1x32xf32> to vector<1x32xf32>
    %c0_121 = arith.constant 0 : index
    %c0_122 = arith.constant 0 : index
    %c0_123 = arith.constant 0 : index
    %c0_124 = arith.constant 0 : index
    %224 = vector.load %arg25[%c0_121, %c0_122, %c0_123, %c0_124] : memref<2x1x32x32xbf16, #tpu.memory_space<vmem>>, vector<1x1x32x32xbf16>
    %225 = vector.shape_cast %224 : vector<1x1x32x32xbf16> to vector<32x32xbf16>
    %c0_125 = arith.constant 0 : index
    %c0_126 = arith.constant 0 : index
    %c0_127 = arith.constant 0 : index
    %c0_128 = arith.constant 0 : index
    %226 = vector.load %arg26[%c0_125, %c0_126, %c0_127, %c0_128] : memref<2x1x1x32xf32, #tpu.memory_space<vmem>>, vector<1x1x1x32xf32>
    %227 = vector.shape_cast %226 : vector<1x1x1x32xf32> to vector<1x32xf32>
    %cst_129 = arith.constant 0.000000e+00 : f32
    %228 = vector.broadcast %cst_129 : f32 to vector<8x32xf32>
    %229 = arith.maximumf %219, %228 : vector<8x32xf32>
    %230 = math.absf %219 : vector<8x32xf32>
    %cst_130 = arith.constant 0.000000e+00 : f32
    %231 = vector.broadcast %cst_130 : f32 to vector<8x32xf32>
    %232 = arith.subf %231, %230 : vector<8x32xf32>
    %233 = math.exp %232 : vector<8x32xf32>
    %234 = math.log1p %233 : vector<8x32xf32>
    %235 = arith.addf %229, %234 : vector<8x32xf32>
    %cst_131 = arith.constant 0.693147182 : f32
    %236 = vector.broadcast %cst_131 : f32 to vector<8x32xf32>
    %237 = arith.subf %235, %236 : vector<8x32xf32>
    %238 = arith.truncf %237 : vector<8x32xf32> to vector<8x32xbf16>
    %cst_132 = arith.constant dense<0.000000e+00> : vector<8x32xf32>
    %239 = tpu.matmul %238, %221, %cst_132 {dimension_numbers = #tpu.dot_dimension_numbers<[1], [0], [0], [1], [0, 0, 1, 1], [], []>} : vector<8x32xbf16>, vector<32x32xbf16>, vector<8x32xf32> -> vector<8x32xf32>
    %240 = vector.broadcast %223 : vector<1x32xf32> to vector<8x32xf32>
    %241 = arith.addf %239, %240 : vector<8x32xf32>
    %cst_133 = arith.constant 0.000000e+00 : f32
    %242 = vector.broadcast %cst_133 : f32 to vector<8x32xf32>
    %243 = arith.maximumf %241, %242 : vector<8x32xf32>
    %244 = math.absf %241 : vector<8x32xf32>
    %cst_134 = arith.constant 0.000000e+00 : f32
    %245 = vector.broadcast %cst_134 : f32 to vector<8x32xf32>
    %246 = arith.subf %245, %244 : vector<8x32xf32>
    %247 = math.exp %246 : vector<8x32xf32>
    %248 = math.log1p %247 : vector<8x32xf32>
    %249 = arith.addf %243, %248 : vector<8x32xf32>
    %cst_135 = arith.constant 0.693147182 : f32
    %250 = vector.broadcast %cst_135 : f32 to vector<8x32xf32>
    %251 = arith.subf %249, %250 : vector<8x32xf32>
    %252 = arith.truncf %251 : vector<8x32xf32> to vector<8x32xbf16>
    %cst_136 = arith.constant dense<0.000000e+00> : vector<8x32xf32>
    %253 = tpu.matmul %252, %225, %cst_136 {dimension_numbers = #tpu.dot_dimension_numbers<[1], [0], [0], [1], [0, 0, 1, 1], [], []>} : vector<8x32xbf16>, vector<32x32xbf16>, vector<8x32xf32> -> vector<8x32xf32>
    %254 = vector.broadcast %227 : vector<1x32xf32> to vector<8x32xf32>
    %255 = arith.addf %253, %254 : vector<8x32xf32>
    %256 = arith.addf %219, %255 : vector<8x32xf32>
    %c0_137 = arith.constant 0 : index
    %c0_138 = arith.constant 0 : index
    %c0_139 = arith.constant 0 : index
    %c0_140 = arith.constant 0 : index
    %257 = vector.load %arg27[%c0_137, %c0_138, %c0_139, %c0_140] : memref<2x1x32x32xbf16, #tpu.memory_space<vmem>>, vector<1x1x32x32xbf16>
    %258 = vector.shape_cast %257 : vector<1x1x32x32xbf16> to vector<32x32xbf16>
    %c0_141 = arith.constant 0 : index
    %c0_142 = arith.constant 0 : index
    %c0_143 = arith.constant 0 : index
    %c0_144 = arith.constant 0 : index
    %259 = vector.load %arg28[%c0_141, %c0_142, %c0_143, %c0_144] : memref<2x1x1x32xf32, #tpu.memory_space<vmem>>, vector<1x1x1x32xf32>
    %260 = vector.shape_cast %259 : vector<1x1x1x32xf32> to vector<1x32xf32>
    %c0_145 = arith.constant 0 : index
    %c0_146 = arith.constant 0 : index
    %c0_147 = arith.constant 0 : index
    %c0_148 = arith.constant 0 : index
    %261 = vector.load %arg29[%c0_145, %c0_146, %c0_147, %c0_148] : memref<2x1x32x32xbf16, #tpu.memory_space<vmem>>, vector<1x1x32x32xbf16>
    %262 = vector.shape_cast %261 : vector<1x1x32x32xbf16> to vector<32x32xbf16>
    %c0_149 = arith.constant 0 : index
    %c0_150 = arith.constant 0 : index
    %c0_151 = arith.constant 0 : index
    %c0_152 = arith.constant 0 : index
    %263 = vector.load %arg30[%c0_149, %c0_150, %c0_151, %c0_152] : memref<2x1x1x32xf32, #tpu.memory_space<vmem>>, vector<1x1x1x32xf32>
    %264 = vector.shape_cast %263 : vector<1x1x1x32xf32> to vector<1x32xf32>
    %cst_153 = arith.constant 0.000000e+00 : f32
    %265 = vector.broadcast %cst_153 : f32 to vector<8x32xf32>
    %266 = arith.maximumf %256, %265 : vector<8x32xf32>
    %267 = math.absf %256 : vector<8x32xf32>
    %cst_154 = arith.constant 0.000000e+00 : f32
    %268 = vector.broadcast %cst_154 : f32 to vector<8x32xf32>
    %269 = arith.subf %268, %267 : vector<8x32xf32>
    %270 = math.exp %269 : vector<8x32xf32>
    %271 = math.log1p %270 : vector<8x32xf32>
    %272 = arith.addf %266, %271 : vector<8x32xf32>
    %cst_155 = arith.constant 0.693147182 : f32
    %273 = vector.broadcast %cst_155 : f32 to vector<8x32xf32>
    %274 = arith.subf %272, %273 : vector<8x32xf32>
    %275 = arith.truncf %274 : vector<8x32xf32> to vector<8x32xbf16>
    %cst_156 = arith.constant dense<0.000000e+00> : vector<8x32xf32>
    %276 = tpu.matmul %275, %258, %cst_156 {dimension_numbers = #tpu.dot_dimension_numbers<[1], [0], [0], [1], [0, 0, 1, 1], [], []>} : vector<8x32xbf16>, vector<32x32xbf16>, vector<8x32xf32> -> vector<8x32xf32>
    %277 = vector.broadcast %260 : vector<1x32xf32> to vector<8x32xf32>
    %278 = arith.addf %276, %277 : vector<8x32xf32>
    %cst_157 = arith.constant 0.000000e+00 : f32
    %279 = vector.broadcast %cst_157 : f32 to vector<8x32xf32>
    %280 = arith.maximumf %278, %279 : vector<8x32xf32>
    %281 = math.absf %278 : vector<8x32xf32>
    %cst_158 = arith.constant 0.000000e+00 : f32
    %282 = vector.broadcast %cst_158 : f32 to vector<8x32xf32>
    %283 = arith.subf %282, %281 : vector<8x32xf32>
    %284 = math.exp %283 : vector<8x32xf32>
    %285 = math.log1p %284 : vector<8x32xf32>
    %286 = arith.addf %280, %285 : vector<8x32xf32>
    %cst_159 = arith.constant 0.693147182 : f32
    %287 = vector.broadcast %cst_159 : f32 to vector<8x32xf32>
    %288 = arith.subf %286, %287 : vector<8x32xf32>
    %289 = arith.truncf %288 : vector<8x32xf32> to vector<8x32xbf16>
    %cst_160 = arith.constant dense<0.000000e+00> : vector<8x32xf32>
    %290 = tpu.matmul %289, %262, %cst_160 {dimension_numbers = #tpu.dot_dimension_numbers<[1], [0], [0], [1], [0, 0, 1, 1], [], []>} : vector<8x32xbf16>, vector<32x32xbf16>, vector<8x32xf32> -> vector<8x32xf32>
    %291 = vector.broadcast %264 : vector<1x32xf32> to vector<8x32xf32>
    %292 = arith.addf %290, %291 : vector<8x32xf32>
    %293 = arith.addf %256, %292 : vector<8x32xf32>
    %cst_161 = arith.constant 0.000000e+00 : f32
    %294 = vector.broadcast %cst_161 : f32 to vector<8x32xf32>
    %295 = arith.maximumf %293, %294 : vector<8x32xf32>
    %296 = math.absf %293 : vector<8x32xf32>
    %cst_162 = arith.constant 0.000000e+00 : f32
    %297 = vector.broadcast %cst_162 : f32 to vector<8x32xf32>
    %298 = arith.subf %297, %296 : vector<8x32xf32>
    %299 = math.exp %298 : vector<8x32xf32>
    %300 = math.log1p %299 : vector<8x32xf32>
    %301 = arith.addf %295, %300 : vector<8x32xf32>
    %cst_163 = arith.constant 0.693147182 : f32
    %302 = vector.broadcast %cst_163 : f32 to vector<8x32xf32>
    %303 = arith.subf %301, %302 : vector<8x32xf32>
    %c0_164 = arith.constant 0 : index
    %c0_165 = arith.constant 0 : index
    %c0_166 = arith.constant 0 : index
    %c0_167 = arith.constant 0 : index
    %304 = vector.load %arg31[%c0_164, %c0_165, %c0_166, %c0_167] : memref<2x1x32x32xbf16, #tpu.memory_space<vmem>>, vector<1x1x32x32xbf16>
    %305 = vector.shape_cast %304 : vector<1x1x32x32xbf16> to vector<32x32xbf16>
    %306 = arith.truncf %303 : vector<8x32xf32> to vector<8x32xbf16>
    %cst_168 = arith.constant dense<0.000000e+00> : vector<8x32xf32>
    %307 = tpu.matmul %306, %305, %cst_168 {dimension_numbers = #tpu.dot_dimension_numbers<[1], [0], [0], [1], [0, 0, 1, 1], [], []>} : vector<8x32xbf16>, vector<32x32xbf16>, vector<8x32xf32> -> vector<8x32xf32>
    %c0_169 = arith.constant 0 : index
    %c0_170 = arith.constant 0 : index
    %c0_171 = arith.constant 0 : index
    %c0_172 = arith.constant 0 : index
    %308 = vector.load %arg32[%c0_169, %c0_170, %c0_171, %c0_172] : memref<2x1x1x32xf32, #tpu.memory_space<vmem>>, vector<1x1x1x32xf32>
    %309 = vector.shape_cast %308 : vector<1x1x1x32xf32> to vector<1x32xf32>
    %310 = vector.broadcast %309 : vector<1x32xf32> to vector<8x32xf32>
    %311 = arith.addf %307, %310 : vector<8x32xf32>
    %cst_173 = arith.constant 0.000000e+00 : f32
    %312 = vector.broadcast %cst_173 : f32 to vector<8x32xf32>
    %313 = arith.maximumf %311, %312 : vector<8x32xf32>
    %314 = math.absf %311 : vector<8x32xf32>
    %cst_174 = arith.constant 0.000000e+00 : f32
    %315 = vector.broadcast %cst_174 : f32 to vector<8x32xf32>
    %316 = arith.subf %315, %314 : vector<8x32xf32>
    %317 = math.exp %316 : vector<8x32xf32>
    %318 = math.log1p %317 : vector<8x32xf32>
    %319 = arith.addf %313, %318 : vector<8x32xf32>
    %cst_175 = arith.constant 0.693147182 : f32
    %320 = vector.broadcast %cst_175 : f32 to vector<8x32xf32>
    %321 = arith.subf %319, %320 : vector<8x32xf32>
    %c0_176 = arith.constant 0 : index
    %c0_177 = arith.constant 0 : index
    %c0_178 = arith.constant 0 : index
    %322 = vector.load %arg33[%c0_176, %c0_177, %c0_178] : memref<2x32x2xbf16, #tpu.memory_space<vmem>>, vector<1x32x2xbf16>
    %323 = vector.shape_cast %322 : vector<1x32x2xbf16> to vector<32x2xbf16>
    %324 = arith.truncf %321 : vector<8x32xf32> to vector<8x32xbf16>
    %cst_179 = arith.constant dense<0.000000e+00> : vector<8x2xf32>
    %325 = tpu.matmul %324, %323, %cst_179 {dimension_numbers = #tpu.dot_dimension_numbers<[1], [0], [0], [1], [0, 0, 1, 1], [], []>} : vector<8x32xbf16>, vector<32x2xbf16>, vector<8x2xf32> -> vector<8x2xf32>
    %326 = arith.addf %111, %325 : vector<8x2xf32>
    %c0_180 = arith.constant 0 : index
    %c0_181 = arith.constant 0 : index
    %c0_182 = arith.constant 0 : index
    %327 = vector.load %arg34[%c0_180, %c0_181, %c0_182] : memref<2x1x2xf32, #tpu.memory_space<vmem>>, vector<1x1x2xf32>
    %328 = vector.shape_cast %327 : vector<1x1x2xf32> to vector<1x2xf32>
    %329 = vector.broadcast %328 : vector<1x2xf32> to vector<8x2xf32>
    %330 = arith.addf %326, %329 : vector<8x2xf32>
    %331 = arith.truncf %6 : vector<24x8xf32> to vector<24x8xbf16>
    %332 = arith.truncf %256 : vector<8x32xf32> to vector<8x32xbf16>
    %cst_183 = arith.constant dense<0.000000e+00> : vector<24x32xf32>
    %333 = tpu.matmul %331, %332, %cst_183 {dimension_numbers = #tpu.dot_dimension_numbers<[1], [0], [0], [1], [0, 0, 1, 1], [], []>} : vector<24x8xbf16>, vector<8x32xbf16>, vector<24x32xf32> -> vector<24x32xf32>
    %c1 = arith.constant 1 : index
    %c0_184 = arith.constant 0 : index
    %c0_185 = arith.constant 0 : index
    %334 = vector.load %arg11[%c1, %c0_184, %c0_185] : memref<2x16x32xbf16, #tpu.memory_space<vmem>>, vector<1x16x32xbf16>
    %335 = vector.shape_cast %334 : vector<1x16x32xbf16> to vector<16x32xbf16>
    %336 = arith.truncf %83 : vector<24x16xf32> to vector<24x16xbf16>
    %cst_186 = arith.constant dense<0.000000e+00> : vector<24x32xf32>
    %337 = tpu.matmul %336, %335, %cst_186 {dimension_numbers = #tpu.dot_dimension_numbers<[1], [0], [0], [1], [0, 0, 1, 1], [], []>} : vector<24x16xbf16>, vector<16x32xbf16>, vector<24x32xf32> -> vector<24x32xf32>
    %cst_187 = arith.constant 0.000000e+00 : f32
    %338 = vector.broadcast %cst_187 : f32 to vector<24x32xf32>
    %339 = arith.maximumf %333, %338 : vector<24x32xf32>
    %340 = math.absf %333 : vector<24x32xf32>
    %cst_188 = arith.constant 0.000000e+00 : f32
    %341 = vector.broadcast %cst_188 : f32 to vector<24x32xf32>
    %342 = arith.subf %341, %340 : vector<24x32xf32>
    %343 = math.exp %342 : vector<24x32xf32>
    %344 = math.log1p %343 : vector<24x32xf32>
    %345 = arith.addf %339, %344 : vector<24x32xf32>
    %cst_189 = arith.constant 0.693147182 : f32
    %346 = vector.broadcast %cst_189 : f32 to vector<24x32xf32>
    %347 = arith.subf %345, %346 : vector<24x32xf32>
    %c1_190 = arith.constant 1 : index
    %c0_191 = arith.constant 0 : index
    %c0_192 = arith.constant 0 : index
    %348 = vector.load %arg12[%c1_190, %c0_191, %c0_192] : memref<2x32x32xbf16, #tpu.memory_space<vmem>>, vector<1x32x32xbf16>
    %349 = vector.shape_cast %348 : vector<1x32x32xbf16> to vector<32x32xbf16>
    %350 = arith.truncf %347 : vector<24x32xf32> to vector<24x32xbf16>
    %cst_193 = arith.constant dense<0.000000e+00> : vector<24x32xf32>
    %351 = tpu.matmul %350, %349, %cst_193 {dimension_numbers = #tpu.dot_dimension_numbers<[1], [0], [0], [1], [0, 0, 1, 1], [], []>} : vector<24x32xbf16>, vector<32x32xbf16>, vector<24x32xf32> -> vector<24x32xf32>
    %c1_194 = arith.constant 1 : index
    %c0_195 = arith.constant 0 : index
    %c0_196 = arith.constant 0 : index
    %352 = vector.load %arg13[%c1_194, %c0_195, %c0_196] : memref<2x1x32xf32, #tpu.memory_space<vmem>>, vector<1x1x32xf32>
    %353 = vector.shape_cast %352 : vector<1x1x32xf32> to vector<1x32xf32>
    %354 = vector.broadcast %353 : vector<1x32xf32> to vector<24x32xf32>
    %355 = arith.addf %351, %354 : vector<24x32xf32>
    %356 = arith.mulf %337, %355 : vector<24x32xf32>
    %357 = arith.truncf %19 : vector<8x24xf32> to vector<8x24xbf16>
    %358 = arith.truncf %356 : vector<24x32xf32> to vector<24x32xbf16>
    %cst_197 = arith.constant dense<0.000000e+00> : vector<8x32xf32>
    %359 = tpu.matmul %357, %358, %cst_197 {dimension_numbers = #tpu.dot_dimension_numbers<[1], [0], [0], [1], [0, 0, 1, 1], [], []>} : vector<8x24xbf16>, vector<24x32xbf16>, vector<8x32xf32> -> vector<8x32xf32>
    %cst_198 = arith.constant 0.000000e+00 : f32
    %360 = vector.broadcast %cst_198 : f32 to vector<8x32xf32>
    %361 = arith.maximumf %256, %360 : vector<8x32xf32>
    %362 = math.absf %256 : vector<8x32xf32>
    %cst_199 = arith.constant 0.000000e+00 : f32
    %363 = vector.broadcast %cst_199 : f32 to vector<8x32xf32>
    %364 = arith.subf %363, %362 : vector<8x32xf32>
    %365 = math.exp %364 : vector<8x32xf32>
    %366 = math.log1p %365 : vector<8x32xf32>
    %367 = arith.addf %361, %366 : vector<8x32xf32>
    %cst_200 = arith.constant 0.693147182 : f32
    %368 = vector.broadcast %cst_200 : f32 to vector<8x32xf32>
    %369 = arith.subf %367, %368 : vector<8x32xf32>
    %c1_201 = arith.constant 1 : index
    %c0_202 = arith.constant 0 : index
    %c0_203 = arith.constant 0 : index
    %370 = vector.load %arg14[%c1_201, %c0_202, %c0_203] : memref<2x32x32xbf16, #tpu.memory_space<vmem>>, vector<1x32x32xbf16>
    %371 = vector.shape_cast %370 : vector<1x32x32xbf16> to vector<32x32xbf16>
    %372 = arith.truncf %369 : vector<8x32xf32> to vector<8x32xbf16>
    %cst_204 = arith.constant dense<0.000000e+00> : vector<8x32xf32>
    %373 = tpu.matmul %372, %371, %cst_204 {dimension_numbers = #tpu.dot_dimension_numbers<[1], [0], [0], [1], [0, 0, 1, 1], [], []>} : vector<8x32xbf16>, vector<32x32xbf16>, vector<8x32xf32> -> vector<8x32xf32>
    %374 = arith.addf %359, %373 : vector<8x32xf32>
    %c1_205 = arith.constant 1 : index
    %c0_206 = arith.constant 0 : index
    %c0_207 = arith.constant 0 : index
    %375 = vector.load %arg15[%c1_205, %c0_206, %c0_207] : memref<2x1x32xf32, #tpu.memory_space<vmem>>, vector<1x1x32xf32>
    %376 = vector.shape_cast %375 : vector<1x1x32xf32> to vector<1x32xf32>
    %377 = vector.broadcast %376 : vector<1x32xf32> to vector<8x32xf32>
    %378 = arith.addf %374, %377 : vector<8x32xf32>
    %c1_208 = arith.constant 1 : index
    %c0_209 = arith.constant 0 : index
    %c0_210 = arith.constant 0 : index
    %c0_211 = arith.constant 0 : index
    %379 = vector.load %arg16[%c1_208, %c0_209, %c0_210, %c0_211] : memref<2x1x32x32xbf16, #tpu.memory_space<vmem>>, vector<1x1x32x32xbf16>
    %380 = vector.shape_cast %379 : vector<1x1x32x32xbf16> to vector<32x32xbf16>
    %c1_212 = arith.constant 1 : index
    %c0_213 = arith.constant 0 : index
    %c0_214 = arith.constant 0 : index
    %c0_215 = arith.constant 0 : index
    %381 = vector.load %arg17[%c1_212, %c0_213, %c0_214, %c0_215] : memref<2x1x1x32xf32, #tpu.memory_space<vmem>>, vector<1x1x1x32xf32>
    %382 = vector.shape_cast %381 : vector<1x1x1x32xf32> to vector<1x32xf32>
    %c1_216 = arith.constant 1 : index
    %c0_217 = arith.constant 0 : index
    %c0_218 = arith.constant 0 : index
    %c0_219 = arith.constant 0 : index
    %383 = vector.load %arg18[%c1_216, %c0_217, %c0_218, %c0_219] : memref<2x1x32x32xbf16, #tpu.memory_space<vmem>>, vector<1x1x32x32xbf16>
    %384 = vector.shape_cast %383 : vector<1x1x32x32xbf16> to vector<32x32xbf16>
    %c1_220 = arith.constant 1 : index
    %c0_221 = arith.constant 0 : index
    %c0_222 = arith.constant 0 : index
    %c0_223 = arith.constant 0 : index
    %385 = vector.load %arg19[%c1_220, %c0_221, %c0_222, %c0_223] : memref<2x1x1x32xf32, #tpu.memory_space<vmem>>, vector<1x1x1x32xf32>
    %386 = vector.shape_cast %385 : vector<1x1x1x32xf32> to vector<1x32xf32>
    %cst_224 = arith.constant 0.000000e+00 : f32
    %387 = vector.broadcast %cst_224 : f32 to vector<8x32xf32>
    %388 = arith.maximumf %378, %387 : vector<8x32xf32>
    %389 = math.absf %378 : vector<8x32xf32>
    %cst_225 = arith.constant 0.000000e+00 : f32
    %390 = vector.broadcast %cst_225 : f32 to vector<8x32xf32>
    %391 = arith.subf %390, %389 : vector<8x32xf32>
    %392 = math.exp %391 : vector<8x32xf32>
    %393 = math.log1p %392 : vector<8x32xf32>
    %394 = arith.addf %388, %393 : vector<8x32xf32>
    %cst_226 = arith.constant 0.693147182 : f32
    %395 = vector.broadcast %cst_226 : f32 to vector<8x32xf32>
    %396 = arith.subf %394, %395 : vector<8x32xf32>
    %397 = arith.truncf %396 : vector<8x32xf32> to vector<8x32xbf16>
    %cst_227 = arith.constant dense<0.000000e+00> : vector<8x32xf32>
    %398 = tpu.matmul %397, %380, %cst_227 {dimension_numbers = #tpu.dot_dimension_numbers<[1], [0], [0], [1], [0, 0, 1, 1], [], []>} : vector<8x32xbf16>, vector<32x32xbf16>, vector<8x32xf32> -> vector<8x32xf32>
    %399 = vector.broadcast %382 : vector<1x32xf32> to vector<8x32xf32>
    %400 = arith.addf %398, %399 : vector<8x32xf32>
    %cst_228 = arith.constant 0.000000e+00 : f32
    %401 = vector.broadcast %cst_228 : f32 to vector<8x32xf32>
    %402 = arith.maximumf %400, %401 : vector<8x32xf32>
    %403 = math.absf %400 : vector<8x32xf32>
    %cst_229 = arith.constant 0.000000e+00 : f32
    %404 = vector.broadcast %cst_229 : f32 to vector<8x32xf32>
    %405 = arith.subf %404, %403 : vector<8x32xf32>
    %406 = math.exp %405 : vector<8x32xf32>
    %407 = math.log1p %406 : vector<8x32xf32>
    %408 = arith.addf %402, %407 : vector<8x32xf32>
    %cst_230 = arith.constant 0.693147182 : f32
    %409 = vector.broadcast %cst_230 : f32 to vector<8x32xf32>
    %410 = arith.subf %408, %409 : vector<8x32xf32>
    %411 = arith.truncf %410 : vector<8x32xf32> to vector<8x32xbf16>
    %cst_231 = arith.constant dense<0.000000e+00> : vector<8x32xf32>
    %412 = tpu.matmul %411, %384, %cst_231 {dimension_numbers = #tpu.dot_dimension_numbers<[1], [0], [0], [1], [0, 0, 1, 1], [], []>} : vector<8x32xbf16>, vector<32x32xbf16>, vector<8x32xf32> -> vector<8x32xf32>
    %413 = vector.broadcast %386 : vector<1x32xf32> to vector<8x32xf32>
    %414 = arith.addf %412, %413 : vector<8x32xf32>
    %415 = arith.addf %378, %414 : vector<8x32xf32>
    %c1_232 = arith.constant 1 : index
    %c0_233 = arith.constant 0 : index
    %c0_234 = arith.constant 0 : index
    %416 = vector.load %arg20[%c1_232, %c0_233, %c0_234] : memref<2x1x32xf32, #tpu.memory_space<vmem>>, vector<1x1x32xf32>
    %417 = vector.shape_cast %416 : vector<1x1x32xf32> to vector<1x32xf32>
    %418 = vector.broadcast %417 : vector<1x32xf32> to vector<8x32xf32>
    %419 = arith.mulf %418, %256 : vector<8x32xf32>
    %cst_235 = arith.constant 0.000000e+00 : f32
    %420 = vector.broadcast %cst_235 : f32 to vector<8x32xf32>
    %421 = arith.maximumf %415, %420 : vector<8x32xf32>
    %422 = math.absf %415 : vector<8x32xf32>
    %cst_236 = arith.constant 0.000000e+00 : f32
    %423 = vector.broadcast %cst_236 : f32 to vector<8x32xf32>
    %424 = arith.subf %423, %422 : vector<8x32xf32>
    %425 = math.exp %424 : vector<8x32xf32>
    %426 = math.log1p %425 : vector<8x32xf32>
    %427 = arith.addf %421, %426 : vector<8x32xf32>
    %cst_237 = arith.constant 0.693147182 : f32
    %428 = vector.broadcast %cst_237 : f32 to vector<8x32xf32>
    %429 = arith.subf %427, %428 : vector<8x32xf32>
    %c1_238 = arith.constant 1 : index
    %c0_239 = arith.constant 0 : index
    %c0_240 = arith.constant 0 : index
    %430 = vector.load %arg21[%c1_238, %c0_239, %c0_240] : memref<2x32x32xbf16, #tpu.memory_space<vmem>>, vector<1x32x32xbf16>
    %431 = vector.shape_cast %430 : vector<1x32x32xbf16> to vector<32x32xbf16>
    %432 = arith.truncf %429 : vector<8x32xf32> to vector<8x32xbf16>
    %cst_241 = arith.constant dense<0.000000e+00> : vector<8x32xf32>
    %433 = tpu.matmul %432, %431, %cst_241 {dimension_numbers = #tpu.dot_dimension_numbers<[1], [0], [0], [1], [0, 0, 1, 1], [], []>} : vector<8x32xbf16>, vector<32x32xbf16>, vector<8x32xf32> -> vector<8x32xf32>
    %434 = arith.addf %419, %433 : vector<8x32xf32>
    %c1_242 = arith.constant 1 : index
    %c0_243 = arith.constant 0 : index
    %c0_244 = arith.constant 0 : index
    %435 = vector.load %arg22[%c1_242, %c0_243, %c0_244] : memref<2x1x32xf32, #tpu.memory_space<vmem>>, vector<1x1x32xf32>
    %436 = vector.shape_cast %435 : vector<1x1x32xf32> to vector<1x32xf32>
    %437 = vector.broadcast %436 : vector<1x32xf32> to vector<8x32xf32>
    %438 = arith.addf %434, %437 : vector<8x32xf32>
    %c1_245 = arith.constant 1 : index
    %c0_246 = arith.constant 0 : index
    %c0_247 = arith.constant 0 : index
    %c0_248 = arith.constant 0 : index
    %439 = vector.load %arg23[%c1_245, %c0_246, %c0_247, %c0_248] : memref<2x1x32x32xbf16, #tpu.memory_space<vmem>>, vector<1x1x32x32xbf16>
    %440 = vector.shape_cast %439 : vector<1x1x32x32xbf16> to vector<32x32xbf16>
    %c1_249 = arith.constant 1 : index
    %c0_250 = arith.constant 0 : index
    %c0_251 = arith.constant 0 : index
    %c0_252 = arith.constant 0 : index
    %441 = vector.load %arg24[%c1_249, %c0_250, %c0_251, %c0_252] : memref<2x1x1x32xf32, #tpu.memory_space<vmem>>, vector<1x1x1x32xf32>
    %442 = vector.shape_cast %441 : vector<1x1x1x32xf32> to vector<1x32xf32>
    %c1_253 = arith.constant 1 : index
    %c0_254 = arith.constant 0 : index
    %c0_255 = arith.constant 0 : index
    %c0_256 = arith.constant 0 : index
    %443 = vector.load %arg25[%c1_253, %c0_254, %c0_255, %c0_256] : memref<2x1x32x32xbf16, #tpu.memory_space<vmem>>, vector<1x1x32x32xbf16>
    %444 = vector.shape_cast %443 : vector<1x1x32x32xbf16> to vector<32x32xbf16>
    %c1_257 = arith.constant 1 : index
    %c0_258 = arith.constant 0 : index
    %c0_259 = arith.constant 0 : index
    %c0_260 = arith.constant 0 : index
    %445 = vector.load %arg26[%c1_257, %c0_258, %c0_259, %c0_260] : memref<2x1x1x32xf32, #tpu.memory_space<vmem>>, vector<1x1x1x32xf32>
    %446 = vector.shape_cast %445 : vector<1x1x1x32xf32> to vector<1x32xf32>
    %cst_261 = arith.constant 0.000000e+00 : f32
    %447 = vector.broadcast %cst_261 : f32 to vector<8x32xf32>
    %448 = arith.maximumf %438, %447 : vector<8x32xf32>
    %449 = math.absf %438 : vector<8x32xf32>
    %cst_262 = arith.constant 0.000000e+00 : f32
    %450 = vector.broadcast %cst_262 : f32 to vector<8x32xf32>
    %451 = arith.subf %450, %449 : vector<8x32xf32>
    %452 = math.exp %451 : vector<8x32xf32>
    %453 = math.log1p %452 : vector<8x32xf32>
    %454 = arith.addf %448, %453 : vector<8x32xf32>
    %cst_263 = arith.constant 0.693147182 : f32
    %455 = vector.broadcast %cst_263 : f32 to vector<8x32xf32>
    %456 = arith.subf %454, %455 : vector<8x32xf32>
    %457 = arith.truncf %456 : vector<8x32xf32> to vector<8x32xbf16>
    %cst_264 = arith.constant dense<0.000000e+00> : vector<8x32xf32>
    %458 = tpu.matmul %457, %440, %cst_264 {dimension_numbers = #tpu.dot_dimension_numbers<[1], [0], [0], [1], [0, 0, 1, 1], [], []>} : vector<8x32xbf16>, vector<32x32xbf16>, vector<8x32xf32> -> vector<8x32xf32>
    %459 = vector.broadcast %442 : vector<1x32xf32> to vector<8x32xf32>
    %460 = arith.addf %458, %459 : vector<8x32xf32>
    %cst_265 = arith.constant 0.000000e+00 : f32
    %461 = vector.broadcast %cst_265 : f32 to vector<8x32xf32>
    %462 = arith.maximumf %460, %461 : vector<8x32xf32>
    %463 = math.absf %460 : vector<8x32xf32>
    %cst_266 = arith.constant 0.000000e+00 : f32
    %464 = vector.broadcast %cst_266 : f32 to vector<8x32xf32>
    %465 = arith.subf %464, %463 : vector<8x32xf32>
    %466 = math.exp %465 : vector<8x32xf32>
    %467 = math.log1p %466 : vector<8x32xf32>
    %468 = arith.addf %462, %467 : vector<8x32xf32>
    %cst_267 = arith.constant 0.693147182 : f32
    %469 = vector.broadcast %cst_267 : f32 to vector<8x32xf32>
    %470 = arith.subf %468, %469 : vector<8x32xf32>
    %471 = arith.truncf %470 : vector<8x32xf32> to vector<8x32xbf16>
    %cst_268 = arith.constant dense<0.000000e+00> : vector<8x32xf32>
    %472 = tpu.matmul %471, %444, %cst_268 {dimension_numbers = #tpu.dot_dimension_numbers<[1], [0], [0], [1], [0, 0, 1, 1], [], []>} : vector<8x32xbf16>, vector<32x32xbf16>, vector<8x32xf32> -> vector<8x32xf32>
    %473 = vector.broadcast %446 : vector<1x32xf32> to vector<8x32xf32>
    %474 = arith.addf %472, %473 : vector<8x32xf32>
    %475 = arith.addf %438, %474 : vector<8x32xf32>
    %c1_269 = arith.constant 1 : index
    %c0_270 = arith.constant 0 : index
    %c0_271 = arith.constant 0 : index
    %c0_272 = arith.constant 0 : index
    %476 = vector.load %arg27[%c1_269, %c0_270, %c0_271, %c0_272] : memref<2x1x32x32xbf16, #tpu.memory_space<vmem>>, vector<1x1x32x32xbf16>
    %477 = vector.shape_cast %476 : vector<1x1x32x32xbf16> to vector<32x32xbf16>
    %c1_273 = arith.constant 1 : index
    %c0_274 = arith.constant 0 : index
    %c0_275 = arith.constant 0 : index
    %c0_276 = arith.constant 0 : index
    %478 = vector.load %arg28[%c1_273, %c0_274, %c0_275, %c0_276] : memref<2x1x1x32xf32, #tpu.memory_space<vmem>>, vector<1x1x1x32xf32>
    %479 = vector.shape_cast %478 : vector<1x1x1x32xf32> to vector<1x32xf32>
    %c1_277 = arith.constant 1 : index
    %c0_278 = arith.constant 0 : index
    %c0_279 = arith.constant 0 : index
    %c0_280 = arith.constant 0 : index
    %480 = vector.load %arg29[%c1_277, %c0_278, %c0_279, %c0_280] : memref<2x1x32x32xbf16, #tpu.memory_space<vmem>>, vector<1x1x32x32xbf16>
    %481 = vector.shape_cast %480 : vector<1x1x32x32xbf16> to vector<32x32xbf16>
    %c1_281 = arith.constant 1 : index
    %c0_282 = arith.constant 0 : index
    %c0_283 = arith.constant 0 : index
    %c0_284 = arith.constant 0 : index
    %482 = vector.load %arg30[%c1_281, %c0_282, %c0_283, %c0_284] : memref<2x1x1x32xf32, #tpu.memory_space<vmem>>, vector<1x1x1x32xf32>
    %483 = vector.shape_cast %482 : vector<1x1x1x32xf32> to vector<1x32xf32>
    %cst_285 = arith.constant 0.000000e+00 : f32
    %484 = vector.broadcast %cst_285 : f32 to vector<8x32xf32>
    %485 = arith.maximumf %475, %484 : vector<8x32xf32>
    %486 = math.absf %475 : vector<8x32xf32>
    %cst_286 = arith.constant 0.000000e+00 : f32
    %487 = vector.broadcast %cst_286 : f32 to vector<8x32xf32>
    %488 = arith.subf %487, %486 : vector<8x32xf32>
    %489 = math.exp %488 : vector<8x32xf32>
    %490 = math.log1p %489 : vector<8x32xf32>
    %491 = arith.addf %485, %490 : vector<8x32xf32>
    %cst_287 = arith.constant 0.693147182 : f32
    %492 = vector.broadcast %cst_287 : f32 to vector<8x32xf32>
    %493 = arith.subf %491, %492 : vector<8x32xf32>
    %494 = arith.truncf %493 : vector<8x32xf32> to vector<8x32xbf16>
    %cst_288 = arith.constant dense<0.000000e+00> : vector<8x32xf32>
    %495 = tpu.matmul %494, %477, %cst_288 {dimension_numbers = #tpu.dot_dimension_numbers<[1], [0], [0], [1], [0, 0, 1, 1], [], []>} : vector<8x32xbf16>, vector<32x32xbf16>, vector<8x32xf32> -> vector<8x32xf32>
    %496 = vector.broadcast %479 : vector<1x32xf32> to vector<8x32xf32>
    %497 = arith.addf %495, %496 : vector<8x32xf32>
    %cst_289 = arith.constant 0.000000e+00 : f32
    %498 = vector.broadcast %cst_289 : f32 to vector<8x32xf32>
    %499 = arith.maximumf %497, %498 : vector<8x32xf32>
    %500 = math.absf %497 : vector<8x32xf32>
    %cst_290 = arith.constant 0.000000e+00 : f32
    %501 = vector.broadcast %cst_290 : f32 to vector<8x32xf32>
    %502 = arith.subf %501, %500 : vector<8x32xf32>
    %503 = math.exp %502 : vector<8x32xf32>
    %504 = math.log1p %503 : vector<8x32xf32>
    %505 = arith.addf %499, %504 : vector<8x32xf32>
    %cst_291 = arith.constant 0.693147182 : f32
    %506 = vector.broadcast %cst_291 : f32 to vector<8x32xf32>
    %507 = arith.subf %505, %506 : vector<8x32xf32>
    %508 = arith.truncf %507 : vector<8x32xf32> to vector<8x32xbf16>
    %cst_292 = arith.constant dense<0.000000e+00> : vector<8x32xf32>
    %509 = tpu.matmul %508, %481, %cst_292 {dimension_numbers = #tpu.dot_dimension_numbers<[1], [0], [0], [1], [0, 0, 1, 1], [], []>} : vector<8x32xbf16>, vector<32x32xbf16>, vector<8x32xf32> -> vector<8x32xf32>
    %510 = vector.broadcast %483 : vector<1x32xf32> to vector<8x32xf32>
    %511 = arith.addf %509, %510 : vector<8x32xf32>
    %512 = arith.addf %475, %511 : vector<8x32xf32>
    %cst_293 = arith.constant 0.000000e+00 : f32
    %513 = vector.broadcast %cst_293 : f32 to vector<8x32xf32>
    %514 = arith.maximumf %512, %513 : vector<8x32xf32>
    %515 = math.absf %512 : vector<8x32xf32>
    %cst_294 = arith.constant 0.000000e+00 : f32
    %516 = vector.broadcast %cst_294 : f32 to vector<8x32xf32>
    %517 = arith.subf %516, %515 : vector<8x32xf32>
    %518 = math.exp %517 : vector<8x32xf32>
    %519 = math.log1p %518 : vector<8x32xf32>
    %520 = arith.addf %514, %519 : vector<8x32xf32>
    %cst_295 = arith.constant 0.693147182 : f32
    %521 = vector.broadcast %cst_295 : f32 to vector<8x32xf32>
    %522 = arith.subf %520, %521 : vector<8x32xf32>
    %c1_296 = arith.constant 1 : index
    %c0_297 = arith.constant 0 : index
    %c0_298 = arith.constant 0 : index
    %c0_299 = arith.constant 0 : index
    %523 = vector.load %arg31[%c1_296, %c0_297, %c0_298, %c0_299] : memref<2x1x32x32xbf16, #tpu.memory_space<vmem>>, vector<1x1x32x32xbf16>
    %524 = vector.shape_cast %523 : vector<1x1x32x32xbf16> to vector<32x32xbf16>
    %525 = arith.truncf %522 : vector<8x32xf32> to vector<8x32xbf16>
    %cst_300 = arith.constant dense<0.000000e+00> : vector<8x32xf32>
    %526 = tpu.matmul %525, %524, %cst_300 {dimension_numbers = #tpu.dot_dimension_numbers<[1], [0], [0], [1], [0, 0, 1, 1], [], []>} : vector<8x32xbf16>, vector<32x32xbf16>, vector<8x32xf32> -> vector<8x32xf32>
    %c1_301 = arith.constant 1 : index
    %c0_302 = arith.constant 0 : index
    %c0_303 = arith.constant 0 : index
    %c0_304 = arith.constant 0 : index
    %527 = vector.load %arg32[%c1_301, %c0_302, %c0_303, %c0_304] : memref<2x1x1x32xf32, #tpu.memory_space<vmem>>, vector<1x1x1x32xf32>
    %528 = vector.shape_cast %527 : vector<1x1x1x32xf32> to vector<1x32xf32>
    %529 = vector.broadcast %528 : vector<1x32xf32> to vector<8x32xf32>
    %530 = arith.addf %526, %529 : vector<8x32xf32>
    %cst_305 = arith.constant 0.000000e+00 : f32
    %531 = vector.broadcast %cst_305 : f32 to vector<8x32xf32>
    %532 = arith.maximumf %530, %531 : vector<8x32xf32>
    %533 = math.absf %530 : vector<8x32xf32>
    %cst_306 = arith.constant 0.000000e+00 : f32
    %534 = vector.broadcast %cst_306 : f32 to vector<8x32xf32>
    %535 = arith.subf %534, %533 : vector<8x32xf32>
    %536 = math.exp %535 : vector<8x32xf32>
    %537 = math.log1p %536 : vector<8x32xf32>
    %538 = arith.addf %532, %537 : vector<8x32xf32>
    %cst_307 = arith.constant 0.693147182 : f32
    %539 = vector.broadcast %cst_307 : f32 to vector<8x32xf32>
    %540 = arith.subf %538, %539 : vector<8x32xf32>
    %c1_308 = arith.constant 1 : index
    %c0_309 = arith.constant 0 : index
    %c0_310 = arith.constant 0 : index
    %541 = vector.load %arg33[%c1_308, %c0_309, %c0_310] : memref<2x32x2xbf16, #tpu.memory_space<vmem>>, vector<1x32x2xbf16>
    %542 = vector.shape_cast %541 : vector<1x32x2xbf16> to vector<32x2xbf16>
    %543 = arith.truncf %540 : vector<8x32xf32> to vector<8x32xbf16>
    %cst_311 = arith.constant dense<0.000000e+00> : vector<8x2xf32>
    %544 = tpu.matmul %543, %542, %cst_311 {dimension_numbers = #tpu.dot_dimension_numbers<[1], [0], [0], [1], [0, 0, 1, 1], [], []>} : vector<8x32xbf16>, vector<32x2xbf16>, vector<8x2xf32> -> vector<8x2xf32>
    %545 = arith.addf %330, %544 : vector<8x2xf32>
    %c1_312 = arith.constant 1 : index
    %c0_313 = arith.constant 0 : index
    %c0_314 = arith.constant 0 : index
    %546 = vector.load %arg34[%c1_312, %c0_313, %c0_314] : memref<2x1x2xf32, #tpu.memory_space<vmem>>, vector<1x1x2xf32>
    %547 = vector.shape_cast %546 : vector<1x1x2xf32> to vector<1x2xf32>
    %548 = vector.broadcast %547 : vector<1x2xf32> to vector<8x2xf32>
    %549 = arith.addf %545, %548 : vector<8x2xf32>
    %550 = arith.mulf %101, %549 : vector<8x2xf32>
    %551 = arith.addf %550, %110 : vector<8x2xf32>
    %cst_315 = arith.constant 0.000000e+00 : f32
    %552 = vector.broadcast %cst_315 : f32 to vector<8x128xf32>
    %c0_316 = arith.constant 0 : index
    %c0_317 = arith.constant 0 : index
    %553 = vector.load %arg35[%c0_316, %c0_317] : memref<8x128xf32, #tpu.memory_space<vmem>>, vector<8x128xf32>
    tpu.vector_store %arg35[%c0_316, %c0_317], %552 {strides = array<i32>} : memref<8x128xf32, #tpu.memory_space<vmem>>, vector<8x128xf32>,
    %554 = arith.truncf %33 : vector<8x8xf32> to vector<8x8xbf16>
    %555 = arith.truncf %551 : vector<8x2xf32> to vector<8x2xbf16>
    %556 = arith.extf %555 : vector<8x2xbf16> to vector<8x2xf32>
    %557 = arith.subf %551, %556 : vector<8x2xf32>
    %558 = arith.truncf %557 : vector<8x2xf32> to vector<8x2xbf16>
    %cst_318 = arith.constant dense<0.000000e+00> : vector<8x2xf32>
    %559 = tpu.matmul %554, %555, %cst_318 {dimension_numbers = #tpu.dot_dimension_numbers<[1], [0], [0], [1], [0, 0, 1, 1], [], []>} : vector<8x8xbf16>, vector<8x2xbf16>, vector<8x2xf32> -> vector<8x2xf32>
    %cst_319 = arith.constant dense<0.000000e+00> : vector<8x2xf32>
    %560 = tpu.matmul %554, %558, %cst_319 {dimension_numbers = #tpu.dot_dimension_numbers<[1], [0], [0], [1], [0, 0, 1, 1], [], []>} : vector<8x8xbf16>, vector<8x2xbf16>, vector<8x2xf32> -> vector<8x2xf32>
    %561 = arith.addf %559, %560 : vector<8x2xf32>
    %c0_320 = arith.constant 0 : index
    %c0_321 = arith.constant 0 : index
    %562 = vector.load %arg35[%c0_320, %c0_321] : memref<8x128xf32, #tpu.memory_space<vmem>>, vector<8x2xf32>
    tpu.vector_store %arg35[%c0_320, %c0_321], %561 {strides = array<i32>} : memref<8x128xf32, #tpu.memory_space<vmem>>, vector<8x2xf32>,
    %563 = vector.extract_strided_slice %551 {offsets = [0, 1], sizes = [8, 1], strides = [1, 1]} : vector<8x2xf32> to vector<8x1xf32>
    %564 = vector.broadcast %563 : vector<8x1xf32> to vector<8x3xf32>
    %565 = arith.mulf %564, %34 : vector<8x3xf32>
    %566 = arith.truncf %33 : vector<8x8xf32> to vector<8x8xbf16>
    %567 = arith.truncf %565 : vector<8x3xf32> to vector<8x3xbf16>
    %568 = arith.extf %567 : vector<8x3xbf16> to vector<8x3xf32>
    %569 = arith.subf %565, %568 : vector<8x3xf32>
    %570 = arith.truncf %569 : vector<8x3xf32> to vector<8x3xbf16>
    %cst_322 = arith.constant dense<0.000000e+00> : vector<8x3xf32>
    %571 = tpu.matmul %566, %567, %cst_322 {dimension_numbers = #tpu.dot_dimension_numbers<[1], [0], [0], [1], [0, 0, 1, 1], [], []>} : vector<8x8xbf16>, vector<8x3xbf16>, vector<8x3xf32> -> vector<8x3xf32>
    %cst_323 = arith.constant dense<0.000000e+00> : vector<8x3xf32>
    %572 = tpu.matmul %566, %570, %cst_323 {dimension_numbers = #tpu.dot_dimension_numbers<[1], [0], [0], [1], [0, 0, 1, 1], [], []>} : vector<8x8xbf16>, vector<8x3xbf16>, vector<8x3xf32> -> vector<8x3xf32>
    %573 = arith.addf %571, %572 : vector<8x3xf32>
    %c0_324 = arith.constant 0 : index
    %c2 = arith.constant 2 : index
    %574 = vector.load %arg35[%c0_324, %c2] : memref<8x128xf32, #tpu.memory_space<vmem>>, vector<8x3xf32>
    tpu.vector_store %arg35[%c0_324, %c2], %573 {strides = array<i32>} : memref<8x128xf32, #tpu.memory_space<vmem>>, vector<8x3xf32>,
    return
  }
}

</mosaic_0001>

<bundles_post_ra>
// kernel: _lambda_.1
= control target key start
LH: loop header
LB: loop body
LE: loop exit
PB: predicated region body
PF: predicated region fallthrough
CT: control target
= control target key end

     0   :  { %s4405_s6 = smov 1   ;;  %s4406_s10 = smov 2   ;;  %s5082_s0 = inlined_call_operand.smem [shape: u32[36], index: -1, kind: input, shape index: {}] }
   0x1   :  { %s4467_s5 = sld [smem:[%s5082_s0]]   ;;  %s4407_s14 = smov 3  }
   0x2   :  { %s4472_s9 = sld [smem:[%s5082_s0 + %s4405_s6]]   ;;  %s4408_s18 = smov 4  }
   0x3   :  { %s4477_s13 = sld [smem:[%s5082_s0 + %s4406_s10]]   ;;  %s4409_s22 = smov 5  }
   0x4   :  { %s4482_s17 = sld [smem:[%s5082_s0 + %s4407_s14]]   ;;  %s4410_s26 = smov 6  }
   0x5   :  { %s4487_s21 = sld [smem:[%s5082_s0 + %s4408_s18]]   ;;  %s4411_s30 = smov 7  }
   0x6   :  { %s4492_s25 = sld [smem:[%s5082_s0 + %s4409_s22]]   ;;  %s4412_s4 = smov 8  }
   0x7   :  { %s4497_s29 = sld [smem:[%s5082_s0 + %s4410_s26]]   ;;  %s4413_s10 = smov 9  }
   0x8   :  { %s4502_s3 = sld [smem:[%s5082_s0 + %s4411_s30]]   ;;  %s4414_s15 = smov 10  }
   0x9   :  { %5099 = sst [smem:[#allocation24_spill]] %s4477_s13  ;;  %s4415_s20 = smov 11  }
   0xa   :  { %s4507_s8 = sld [smem:[%s5082_s0 + %s4412_s4]]   ;;  %s4416_s26 = smov 12  }
   0xb   :  { %s4512_s14 = sld [smem:[%s5082_s0 + %s4413_s10]]   ;;  %s4417_s1 = smov 13  }
   0xc   :  { %s4517_s19 = sld [smem:[%s5082_s0 + %s4414_s15]]   ;;  %s4418_s7 = smov 14  }
   0xd   :  { %s4522_s24 = sld [smem:[%s5082_s0 + %s4415_s20]]   ;;  %s4419_s15 = smov 15  }
   0xe   :  { %5100 = sst [smem:[#allocation25_spill]] %s4502_s3  ;;  %s4420_s22 = smov 16  }
   0xf   :  { %s4527_s30 = sld [smem:[%s5082_s0 + %s4416_s26]]   ;;  %s4421_s28 = smov 17  }
  0x10   :  { %5101 = sst [smem:[#allocation26_spill]] %s4507_s8 }
  0x11   :  { %s4532_s6 = sld [smem:[%s5082_s0 + %s4417_s1]]  }
  0x12   :  { %5102 = sst [smem:[#allocation27_spill]] %s4517_s19 }
  0x13   :  { %5103 = sst [smem:[#allocation28_spill]] %s4522_s24 }
  0x14   :  { %s4537_s12 = sld [smem:[%s5082_s0 + %s4418_s7]]   ;;  %s4422_s7 = smov 18  }
  0x15   :  { %s4542_s20 = sld [smem:[%s5082_s0 + %s4419_s15]]   ;;  %s4423_s15 = smov 19  }
  0x16   :  { %s4547_s27 = sld [smem:[%s5082_s0 + %s4420_s22]]   ;;  %s4424_s22 = smov 20  }
  0x17   :  { %5104 = sst [smem:[#allocation29_spill]] %s4532_s6 }
  0x18   :  { %s4552_s4 = sld [smem:[%s5082_s0 + %s4421_s28]]   ;;  %s4425_s28 = smov 21  }
  0x19   :  { %s4557_s13 = sld [smem:[%s5082_s0 + %s4422_s7]]   ;;  %s4426_s7 = smov 22  }
  0x1a   :  { %s4567_s6 = sld [smem:[%s5082_s0 + %s4424_s22]]   ;;  %s4428_s22 = smov 24  }
  0x1b   :  { %5105 = sst [smem:[#allocation30_spill]] %s4542_s20 }
  0x1c   :  { %s4562_s20 = sld [smem:[%s5082_s0 + %s4423_s15]]   ;;  %s4427_s15 = smov 23  }
  0x1d   :  { %s4577_s19 = sld [smem:[%s5082_s0 + %s4426_s7]]   ;;  %s4430_s7 = smov 26  }
  0x1e   :  { %5106 = sst [smem:[#allocation31_spill]] %s4552_s4 }
  0x1f   :  { %s4572_s4 = sld [smem:[%s5082_s0 + %s4425_s28]]   ;;  %s4429_s28 = smov 25  }
  0x20   :  { %5108 = sst [smem:[#allocation33_spill]] %s4567_s6 }
  0x21   :  { %s4587_s6 = sld [smem:[%s5082_s0 + %s4428_s22]]   ;;  %s4432_s22 = smov 28  }
  0x22   :  { %5107 = sst [smem:[#allocation32_spill]] %s4562_s20 }
  0x23   :  { %5109 = sst [smem:[#allocation34_spill]] %s4577_s19 }
  0x24   :  { %s4582_s20 = sld [smem:[%s5082_s0 + %s4427_s15]]   ;;  %s4431_s15 = smov 27  }
  0x25   :  { %s4592_s24 = sld [smem:[%s5082_s0 + %s4429_s28]]   ;;  %s4433_s28 = smov 29  }
  0x26   :  { %s4597_s19 = sld [smem:[%s5082_s0 + %s4430_s7]]   ;;  %s4434_s7 = smov 30  }
  0x27   :  { %5110 = sst [smem:[#allocation35_spill]] %s4587_s6 }
  0x28   :  { %s4602_s8 = sld [smem:[%s5082_s0 + %s4431_s15]]   ;;  %s4435_s15 = smov 31  }
  0x29   :  { %s4607_s6 = sld [smem:[%s5082_s0 + %s4432_s22]]   ;;  %s4436_s22 = smov 32  }
  0x2a   :  { %s4612_s3 = sld [smem:[%s5082_s0 + %s4433_s28]]   ;;  %s4437_s28 = smov 33  }
  0x2c   :  { %5111 = sst [smem:[#allocation36_spill]] %s4597_s19 }
  0x2d   :  { %s4617_s19 = sld [smem:[%s5082_s0 + %s4434_s7]]   ;;  %s4438_s7 = smov 34  }
  0x2e   :  { %5112 = sst [smem:[#allocation37_spill]] %s4602_s8 }
  0x2f   :  { %5113 = sst [smem:[#allocation38_spill]] %s4607_s6 }
  0x30   :  { %5114 = sst [smem:[#allocation39_spill]] %s4612_s3 }
  0x31   :  { %s4622_s8 = sld [smem:[%s5082_s0 + %s4435_s15]]   ;;  %s4439_s15 = smov 35  }
  0x32   :  { %s4627_s6 = sld [smem:[%s5082_s0 + %s4436_s22]]  }
  0x33   :  { %5115 = sst [smem:[#allocation40_spill]] %s4617_s19 }
  0x34   :  { %s4632_s3 = sld [smem:[%s5082_s0 + %s4437_s28]]  }
  0x35   :  { %s4637_s19 = sld [smem:[%s5082_s0 + %s4438_s7]]  }
  0x37   :  { %5116 = sst [smem:[#allocation41_spill]] %s4622_s8 }
  0x38   :  { %s4642_s8 = sld [smem:[%s5082_s0 + %s4439_s15]]  }
  0x39   :  { %76 = vsyncpa [#allocation3], 0 }
  0x3a   :  { %77 = vsyncpa [#allocation5], 0 }
  0x3b   :  { %78 = vsyncpa [#allocation8], 0 }
  0x3c   :  { %79 = vsyncpa [#allocation11], 0 }
  0x3d   :  { %80 = vsyncpa [#allocation14], 0 }
  0x3e   :  { %81 = vsyncpa [#allocation17], 0  ;;  %s4440_s22 = smov [#allocation4]  }
  0x3f   :  { %s107_s23 = sshll.u32 %s4440_s22, 4  ;;  %s108_s23 = int_to_ptr.vmem [resolvable:$true] %s107_s23 }
  0x40   :  { %s4201_s26 = scalar_lea.vmem %s108_s23, 256  ;;  %p4206_p1 = scmp.lt.s32.totalorder %s108_s23, %s108_s23 }
  0x41   :  { %p4202_p0 = scmp.ne.s32.totalorder %s108_s23, %s4201_s26  ;;  %p4207_p2 = scmp.lt.s32.totalorder %s4201_s26, %s4201_s26 }
  0x43   :  { %p4208_p3 = por %p4207_p2, %p4206_p1 }
  0x45   :  { %p4209_p4 = pnand %p4208_p3, %p4202_p0 }
  0x47   :  { %4212 = shalt.err (!%p4209_p4)
}
  0x48   :  { %s4441_s28 = smov 128   ;;  %s4442_s0 = smov 8  }
  0x49   :  { %113 = dma.hbm_to_vmem [thread:$0]  %s4497_s29, 256, %s108_s23, [#allocation5], %s4441_s28, %s4441_s28, %s4442_s0  }
  0x4a   :  { %s4443_s1 = smov [#allocation7]  }
  0x4b   :  { %s137_s2 = sshll.u32 %s4443_s1, 4  ;;  %s138_s2 = int_to_ptr.vmem [resolvable:$true] %s137_s2 }
  0x4c   :  { %s4221_s7 = scalar_lea.vmem %s138_s2, 512  ;;  %p4226_p6 = scmp.lt.s32.totalorder %s138_s2, %s138_s2 }
  0x4d   :  { %p4222_p5 = scmp.ne.s32.totalorder %s138_s2, %s4221_s7  ;;  %p4227_p7 = scmp.lt.s32.totalorder %s4221_s7, %s4221_s7 }
  0x4f   :  { %p4228_p8 = por %p4227_p7, %p4226_p6 }
  0x51   :  { %p4229_p9 = pnand %p4228_p8, %p4222_p5 }
  0x53   :  { %4232 = shalt.err (!%p4229_p9)
}
  0x54   :  { %s4444_s10 = smov 64   ;;  %s4445_s11 = smov 4  }
  0x55   :  { %143 = dma.hbm_to_vmem [thread:$0]  %s4527_s30, 512, %s138_s2, [#allocation8], %s4444_s10, %s4444_s10, %s4445_s11  }
  0x56   :  { %s4446_s15 = smov [#allocation10]   ;;  %s4447_s29 = smov [#allocation13]  }
  0x57   :  { %s165_s16 = sshll.u32 %s4446_s15, 4  ;;  %s195_s18 = sshll.u32 %s4447_s29, 4  ;;  %s166_s16 = int_to_ptr.vmem [resolvable:$true] %s165_s16  ;;  %s196_s18 = int_to_ptr.vmem [resolvable:$true] %s195_s18 }
  0x58   :  { %s4241_s22 = scalar_lea.vmem %s166_s16, 512  ;;  %p4246_p11 = scmp.lt.s32.totalorder %s166_s16, %s166_s16 }
  0x59   :  { %p4242_p10 = scmp.ne.s32.totalorder %s166_s16, %s4241_s22  ;;  %p4247_p12 = scmp.lt.s32.totalorder %s4241_s22, %s4241_s22 }
  0x5b   :  { %p4248_p13 = por %p4247_p12, %p4246_p11 }
  0x5d   :  { %p4249_p0 = pnand %p4248_p13, %p4242_p10 }
  0x5f   :  { %4252 = shalt.err (!%p4249_p0)
}
  0x60   :  { %171 = dma.hbm_to_vmem [thread:$0]  %s4547_s27, 512, %s166_s16, [#allocation11], %s4444_s10, %s4444_s10, %s4445_s11  }
  0x61   :  { %s4261_s23 = scalar_lea.vmem %s196_s18, 512  ;;  %p4266_p2 = scmp.lt.s32.totalorder %s196_s18, %s196_s18 }
  0x62   :  { %p4262_p1 = scmp.ne.s32.totalorder %s196_s18, %s4261_s23  ;;  %p4267_p3 = scmp.lt.s32.totalorder %s4261_s23, %s4261_s23 }
  0x64   :  { %p4268_p4 = por %p4267_p3, %p4266_p2 }
  0x66   :  { %p4269_p5 = pnand %p4268_p4, %p4262_p1 }
  0x68   :  { %4272 = shalt.err (!%p4269_p5)
}
  0x69   :  { %201 = dma.hbm_to_vmem [thread:$0]  %s4572_s4, 512, %s196_s18, [#allocation14], %s4444_s10, %s4444_s10, %s4445_s11  }
  0x6a   :  { %s4448_s30 = smov [#allocation2]   ;;  %s4449_s28 = smov [#allocation6]  }
  0x6b   :  { %s96_s26 = sshll.u32 %s4448_s30, 4  ;;  %s124_s0 = sshll.u32 %s4449_s28, 4  ;;  %s97_s26 = int_to_ptr.vmem [resolvable:$true] %s96_s26  ;;  %s125_s0 = int_to_ptr.vmem [resolvable:$true] %s124_s0 }
  0x6c   :  { %s4281_s1 = scalar_lea.vmem %s97_s26, 16  ;;  %s4285_s27 = scalar_lea.vmem %s97_s26, 32 }
  0x6d   :  { %p4282_p6 = scmp.ne.s32.totalorder %s97_s26, %s4281_s1  ;;  %p4286_p7 = scmp.lt.s32.totalorder %s97_s26, %s97_s26 }
  0x6e   :  { %p4287_p8 = scmp.lt.s32.totalorder %s4285_s27, %s4281_s1 }
  0x70   :  { %p4288_p9 = por %p4287_p8, %p4286_p7 }
  0x72   :  { %p4289_p10 = pnand %p4288_p9, %p4282_p6 }
  0x74   :  { %4292 = shalt.err (!%p4289_p10)
}
  0x75   :  { %99 = dma.hbm_to_vmem [thread:$0]  %s4487_s21, 16, %s97_s26, [#allocation3]  }
  0x76   :  { %s4301_s2 = scalar_lea.vmem %s125_s0, 16  ;;  %s4305_s7 = scalar_lea.vmem %s125_s0, 32 }
  0x77   :  { %p4302_p11 = scmp.ne.s32.totalorder %s125_s0, %s4301_s2  ;;  %p4306_p12 = scmp.lt.s32.totalorder %s125_s0, %s125_s0 }
  0x78   :  { %p4307_p13 = scmp.lt.s32.totalorder %s4305_s7, %s4301_s2 }
  0x7a   :  { %p4308_p0 = por %p4307_p13, %p4306_p12 }
  0x7c   :  { %p4309_p1 = pnand %p4308_p0, %p4302_p11 }
  0x7e   :  { %4312 = shalt.err (!%p4309_p1)
}
  0x7f   :  { %127 = dma.hbm_to_vmem [thread:$0]  %s4512_s14, 16, %s125_s0, [#allocation5]  }
  0x80   :  { %s4450_s4 = smov [#allocation9]   ;;  %s4451_s16 = smov [#allocation12]  }
  0x81   :  { %s151_s15 = sshll.u32 %s4450_s4, 4  ;;  %s179_s29 = sshll.u32 %s4451_s16, 4  ;;  %s152_s15 = int_to_ptr.vmem [resolvable:$true] %s151_s15  ;;  %s180_s29 = int_to_ptr.vmem [resolvable:$true] %s179_s29 }
  0x82   :  { %s4321_s18 = scalar_lea.vmem %s152_s15, 512  ;;  %p4326_p3 = scmp.lt.s32.totalorder %s152_s15, %s152_s15 }
  0x83   :  { %p4322_p2 = scmp.ne.s32.totalorder %s152_s15, %s4321_s18  ;;  %p4327_p4 = scmp.lt.s32.totalorder %s4321_s18, %s4321_s18 }
  0x85   :  { %p4328_p5 = por %p4327_p4, %p4326_p3 }
  0x87   :  { %p4329_p6 = pnand %p4328_p5, %p4322_p2 }
  0x89   :  { %4332 = shalt.err (!%p4329_p6)
}
  0x8a   :  { %157 = dma.hbm_to_vmem [thread:$0]  %s4537_s12, 512, %s152_s15, [#allocation8], %s4444_s10, %s4444_s10, %s4445_s11  }
  0x8b   :  { %s4341_s21 = scalar_lea.vmem %s180_s29, 512  ;;  %p4346_p8 = scmp.lt.s32.totalorder %s180_s29, %s180_s29 }
  0x8c   :  { %p4342_p7 = scmp.ne.s32.totalorder %s180_s29, %s4341_s21  ;;  %p4347_p9 = scmp.lt.s32.totalorder %s4341_s21, %s4341_s21 }
  0x8e   :  { %p4348_p10 = por %p4347_p9, %p4346_p8 }
  0x90   :  { %p4349_p11 = pnand %p4348_p10, %p4342_p7 }
  0x92   :  { %4352 = shalt.err (!%p4349_p11)
}
  0x93   :  { %185 = dma.hbm_to_vmem [thread:$0]  %s4557_s13, 512, %s180_s29, [#allocation11], %s4444_s10, %s4444_s10, %s4445_s11  }
  0x94   :  { %s4452_s14 = smov [#allocation15]   ;;  %s4453_s23 = smov [#allocation16]  }
  0x95   :  { %s209_s22 = sshll.u32 %s4452_s14, 4  ;;  %s223_s30 = sshll.u32 %s4453_s23, 4  ;;  %s210_s22 = int_to_ptr.vmem [resolvable:$true] %s209_s22  ;;  %s224_s30 = int_to_ptr.vmem [resolvable:$true] %s223_s30 }
  0x96   :  { %s4361_s26 = scalar_lea.vmem %s210_s22, 512  ;;  %p4366_p13 = scmp.lt.s32.totalorder %s210_s22, %s210_s22 }
  0x97   :  { %p4362_p12 = scmp.ne.s32.totalorder %s210_s22, %s4361_s26  ;;  %p4367_p0 = scmp.lt.s32.totalorder %s4361_s26, %s4361_s26 }
  0x99   :  { %p4368_p1 = por %p4367_p0, %p4366_p13 }
  0x9b   :  { %p4369_p2 = pnand %p4368_p1, %p4362_p12 }
  0x9d   :  { %4372 = shalt.err (!%p4369_p2)
}
  0x9e   :  { %215 = dma.hbm_to_vmem [thread:$0]  %s4582_s20, 512, %s210_s22, [#allocation14], %s4444_s10, %s4444_s10, %s4445_s11  }
  0x9f   :  { %s4381_s12 = scalar_lea.vmem %s224_s30, 512  ;;  %p4386_p4 = scmp.lt.s32.totalorder %s224_s30, %s224_s30 }
  0xa0   :  { %p4382_p3 = scmp.ne.s32.totalorder %s224_s30, %s4381_s12  ;;  %p4387_p5 = scmp.lt.s32.totalorder %s4381_s12, %s4381_s12 }
  0xa2   :  { %p4388_p6 = por %p4387_p5, %p4386_p4 }
  0xa4   :  { %p4389_p7 = pnand %p4388_p6, %p4382_p3 }
  0xa6   :  { %4392 = shalt.err (!%p4389_p7)
}
  0xa7   :  { %229 = dma.hbm_to_vmem [thread:$0]  %s4592_s24, 512, %s224_s30, [#allocation17], %s4444_s10, %s4444_s10, %s4445_s11  }
  0xa8   :  { %4393 = dma.done.wait [#allocation3], 16  }
  0xa9   :  { %4394 = vsyncadd [#allocation3], 4294967280 }
  0xaa   :  { %4395 = dma.done.wait [#allocation5], 272  }
  0xab   :  { %4396 = vsyncadd [#allocation5], 4294967024 }
  0xac   :  { %4397 = dma.done.wait [#allocation8], 1024  }
  0xad   :  { %4398 = vsyncadd [#allocation8], 4294966272 }
  0xae   :  { %4399 = dma.done.wait [#allocation11], 1024  }
  0xaf   :  { %4400 = vsyncadd [#allocation11], 4294966272 }
  0xb0   :  { %4401 = dma.done.wait [#allocation14], 1024  }
  0xb1   :  { %4402 = vsyncadd [#allocation14], 4294966272 }
  0xb2   :  { %4403 = dma.done.wait [#allocation17], 512  }
  0xb3   :  { %4404 = vsyncadd [#allocation17], 4294966784  ;;  %v4454_v0 = vmov 0   ;;  %v4455_v1 = vmov 0.0   ;;  %v299_v2 = vld [vmem:[%s4472_s9] sm:$0xff]  ;;  %v300_v4 = vld [vmem:[%s4472_s9 + $0x8] sm:$0xff]  ;;  %v279_v18 = vlaneseq }
  0xb4   :  { %4023 = vset.pattern.permute.xlu1 %v4454_v0  ;;  %4022 = vset.pattern.permute.xlu0 %v4454_v0  ;;  %3144 = vst [vmem:[%s4642_s8] sm:$0xff] %v4455_v1  ;;  %v281_v3 = vld [vmem:[%s4467_s5] sm:$0xff]  ;;  %v282_v5 = vld [vmem:[%s4467_s5 + $0x8] sm:$0xff]  ;;  %v301_v9 = vld [vmem:[%s4472_s9 + $0x10] sm:$0xff]  ;;  %vm356_vm0 = vcmask 1043456   ;;  %s5117_s13 = sld [smem:[#allocation25_spill]]  ;;  %vm349_vm5 = vcmask 64512  }
  0xb5   :  { %303 = vperm.xlu1 %4023, %v299_v2   ;;  %285 = vperm.xlu0 %4022, %v281_v3   ;;  %v339_v6 = vld [vmem:[%s4492_s25] sm:$0xff]  ;;  %v283_v10 = vld [vmem:[%s4467_s5 + $0x10] sm:$0xff]  ;;  %v572_v17 = vld [vmem:[#allocation4 + $0x8] sm:$0x3]  ;;  %v280_v20 = vand.u32 127, %v279_v18  ;;  %s5118_s5 = sld [smem:[#allocation26_spill]] }
  0xb6   :  { %v345_v7 = vpack.c.bf16 %v339_v6, %v339_v6  ;;  %v326_v13 = vld [vmem:[%s4482_s17] sm:$0xff]  ;;  %vm584_vm6 = vcmask 1044480   ;;  %vm4456_vm10 = vmmov 0   ;;  %vm580_vm11 = vcmask 80896   ;;  %s5119_s9 = sld [smem:[#allocation28_spill]] }
  0xb7   :  { %v571_v16 = vld [vmem:[#allocation4] sm:$0xff]  ;;  %vm465_vm12 = vcmask 23552   ;;  %s5120_s17 = sld [smem:[#allocation27_spill]] }
  0xb8   :  { %v346_v8 = vunpack.c.l.bf16 %v345_v7  ;;  %3965 = vmatprep.subr.msk.bf16.mxu1 %vm356_vm0, %v345_v7  ;;  %v409_v12 = vsel %vm356_vm0, %v345_v7, 0  ;;  %v574_v19 = vpack.c.bf16 %v572_v17, %v571_v16  ;;  %s5121_s24 = sld [smem:[#allocation29_spill]] }
  0xb9   :  { %306 = vperm.xlu1 %4023, %v300_v4   ;;  %288 = vperm.xlu0 %4022, %v282_v5   ;;  %s5122_s20 = sld [smem:[#allocation24_spill]] }
  0xba   :  { %v347_v11 = vsub.f32 %v339_v6, %v346_v8  ;;  %3683 = vmatpush3.bf16.msra.mxu1 %v409_v12  ;;  %v575_v21 = vunpack.c.l.bf16 %v574_v19  ;;  %v576_v24 = vunpack.c.h.bf16 %v574_v19  ;;  %v671_v25 = vld [vmem:[%s5117_s13] sm:$0xff]  ;;  %v672_v26 = vld [vmem:[%s5117_s13 + $0x8] sm:$0x3]  ;;  %v629_v51 = vsel %vm584_vm6, %v574_v19, 0  ;;  %s5123_s10 = sld [smem:[#allocation30_spill]] }
  0xbb   :  { %3694 = vmatprep.subr.bf16.mxu1 %v4455_v1  ;;  %v673_v33 = vpack.c.bf16 %v672_v26, %v671_v25  ;;  %v765_v46 = vld [vmem:[%s5118_s5] sm:$0xff]  ;;  %v766_v47 = vld [vmem:[%s5118_s5 + $0x8] sm:$0x3]  ;;  %s5124_s11 = sld [smem:[#allocation31_spill]] }
  0xbc   :  { %v348_v14 = vpack.c.bf16 %v347_v11, %v347_v11  ;;  %v577_v27 = vsub.f32 %v571_v16, %v575_v21  ;;  %v578_v32 = vsub.f32 %v572_v17, %v576_v24  ;;  %v767_v55 = vpack.c.bf16 %v766_v47, %v765_v46  ;;  %s5125_s28 = sld [smem:[#allocation32_spill]] }
  0xbd   :  { %309 = vperm.xlu1 %4023, %v301_v9   ;;  %291 = vperm.xlu0 %4022, %v283_v10   ;;  %v674_v41 = vunpack.c.l.bf16 %v673_v33  ;;  %v675_v43 = vunpack.c.h.bf16 %v673_v33  ;;  %v723_v60 = vsel %vm584_vm6, %v673_v33, 0  ;;  %s5126_s0 = sld [smem:[#allocation33_spill]] }
  0xbe   :  { %3964 = vmatprep.subr.msk.bf16.mxu0 %vm356_vm0, %v348_v14  ;;  %v358_v15 = vsel %vm356_vm0, %v348_v14, 0  ;;  %v579_v40 = vpack.c.bf16 %v578_v32, %v577_v27  ;;  %v768_v57 = vunpack.c.l.bf16 %v767_v55  ;;  %v769_v58 = vunpack.c.h.bf16 %v767_v55  ;;  %s5127_s1 = sld [smem:[#allocation34_spill]] }
  0xbf   :  { %3677 = vmatpush3.bf16.msra.mxu0 %v358_v15  ;;  %v676_v53 = vsub.f32 %v671_v25, %v674_v41  ;;  %v677_v54 = vsub.f32 %v672_v26, %v675_v43  ;;  %v817_v4 = vsel %vm584_vm6, %v767_v55, 0  ;;  %s5128_s27 = sld [smem:[#allocation35_spill]] }
  0xc0   :  { %3688 = vmatprep.subr.bf16.mxu0 %v4455_v1  ;;  %v586_v50 = vsel %vm584_vm6, %v579_v40, 0  ;;  %v770_v63 = vsub.f32 %v765_v46, %v768_v57  ;;  %v771_v0 = vsub.f32 %v766_v47, %v769_v58  ;;  %v4026_v57 = vld [vmem:[%s5119_s9] sm:$0xff]   ;;  %s5129_s2 = sld [smem:[#allocation37_spill]] }
  0xc1   :  { %328 = vperm.xlu0 %4022, %v326_v13   ;;  %v678_v56 = vpack.c.bf16 %v677_v54, %v676_v53  ;;  %v4029_v58 = vld [vmem:[#allocation7 + $0x8] sm:$0xff]   ;;  %s5130_s7 = sld [smem:[#allocation36_spill]] }
  0xc2   :  { %v772_v2 = vpack.c.bf16 %v771_v0, %v770_v63  ;;  %s5131_s4 = sld [smem:[#allocation41_spill]] }
  0xc3   :  { %v680_v62 = vsel %vm584_vm6, %v678_v56, 0  ;;  %s5132_s15 = sld [smem:[#allocation39_spill]] }
  0xc4   :  { %v774_v3 = vsel %vm584_vm6, %v772_v2, 0  ;;  %s5133_s16 = sld [smem:[#allocation38_spill]] }
  0xc5   :  { %s5134_s29 = sld [smem:[#allocation40_spill]] }
 0x130   :  { %v304_v22 = vpop.permute.xlu1 %303  ;;  %v286_v23 = vpop.permute.xlu0 %285 }
 0x131   :  { %vm311_vm1 = vcmp.eq.s32.totalorder %v280_v20, %v304_v22  ;;  %vm293_vm2 = vcmp.eq.s32.totalorder %v280_v20, %v286_v23 }
 0x132   :  { %v314_v28 = vsel %vm311_vm1, 1.0, %v4455_v1  ;;  %v4696_v29 = vsel %vm293_vm2, 1.0, %v4455_v1 }
 0x133   :  { %v340_v36 = vsub.f32 %v4696_v29, %v314_v28 }
 0x134   :  { %v307_v30 = vpop.permute.xlu1 %306  ;;  %v289_v31 = vpop.permute.xlu0 %288 }
 0x135   :  { %vm312_vm3 = vcmp.eq.s32.totalorder %v280_v20, %v307_v30  ;;  %vm294_vm4 = vcmp.eq.s32.totalorder %v280_v20, %v289_v31 }
 0x136   :  { %v315_v34 = vsel %vm312_vm3, 1.0, %v4455_v1  ;;  %v4700_v35 = vsel %vm294_vm4, 1.0, %v4455_v1 }
 0x137   :  { %v341_v37 = vsub.f32 %v4700_v35, %v315_v34  ;;  %v4744_v5 = vpack.c.bf16 %v4700_v35, %v4696_v29 }
 0x138   :  { %v310_v38 = vpop.permute.xlu1 %309  ;;  %v292_v39 = vpop.permute.xlu0 %291 }
 0x139   :  { %vm313_vm7 = vcmp.eq.s32.totalorder %v280_v20, %v310_v38  ;;  %vm295_vm8 = vcmp.eq.s32.totalorder %v280_v20, %v292_v39  ;;  %v343_v42 = vpack.c.bf16 %v341_v37, %v340_v36 }
 0x13a   :  { %v316_v44 = vsel %vm313_vm7, 1.0, %v4455_v1  ;;  %v4706_v45 = vsel %vm295_vm8, 1.0, %v4455_v1  ;;  %vm929_vm7 = vcmask 130048  }
 0x13b   :  { %v342_v48 = vsub.f32 %v4706_v45, %v316_v44  ;;  %3678 = vmatprep.mubr.msk.bf16.mxu0 %vm349_vm5, %v343_v42  ;;  %3684 = vmatprep.mubr.msk.bf16.mxu1 %vm349_vm5, %v343_v42  ;;  %v4760_v37 = vpack.c.bf16 %v4706_v45, %v4706_v45 }
 0x13c   :  { %v329_v49 = vpop.permute.xlu0 %328 }
 0x13d   :  { %v344_v52 = vpack.c.bf16 %v342_v48, %v342_v48  ;;  %vm330_vm9 = vcmp.eq.s32.totalorder %v280_v20, %v329_v49 }
 0x13e   :  { %v331_v59 = vsel %vm330_vm9, 1.0, %v4455_v1 }
 0x13f   :  { %3679 = vmatmul.mubr.msk.bf16.vlgmr.msra.gmra.mxu0 %vm349_vm5, %v344_v52  ;;  %3685 = vmatmul.mubr.msk.bf16.vlgmr.msra.gmra.mxu1 %vm349_vm5, %v344_v52  ;;  %v573_v61 = vpack.c.bf16 %v331_v59, %v331_v59  ;;  %v4030_v59 = vld [vmem:[#allocation7] sm:$0xff]  }
 0x140   :  { %3689 = vmatpush3.bf16.msra.mxu0 %v586_v50  ;;  %3695 = vmatpush3.bf16.msra.mxu1 %v629_v51 }
 0x141   :  { %3690 = vmatprep.mubr.msk.bf16.mxu0 %vm4456_vm10, %v4455_v1  ;;  %3696 = vmatprep.mubr.msk.bf16.mxu1 %vm4456_vm10, %v4455_v1 }
 0x142   :  { %3700 = vmatprep.subr.bf16.mxu0 %v4455_v1  ;;  %3706 = vmatprep.subr.bf16.mxu1 %v4455_v1 }
 0x147   :  { %3691 = vmatmul.mubr.msk.bf16.vlgmr.msra.gmra.mxu0 %vm580_vm11, %v573_v61  ;;  %3697 = vmatmul.mubr.msk.bf16.vlgmr.msra.gmra.mxu1 %vm580_vm11, %v573_v61 }
 0x148   :  { %3701 = vmatpush3.bf16.msra.mxu0 %v680_v62  ;;  %3707 = vmatpush3.bf16.msra.mxu1 %v723_v60 }
 0x149   :  { %3702 = vmatprep.mubr.msk.bf16.mxu0 %vm4456_vm10, %v4455_v1  ;;  %3708 = vmatprep.mubr.msk.bf16.mxu1 %vm4456_vm10, %v4455_v1 }
 0x14a   :  { %3712 = vmatprep.subr.bf16.mxu0 %v4455_v1  ;;  %3718 = vmatprep.subr.bf16.mxu1 %v4455_v1 }
 0x14f   :  { %3703 = vmatmul.mubr.msk.bf16.vlgmr.msra.gmra.mxu0 %vm580_vm11, %v573_v61  ;;  %3709 = vmatmul.mubr.msk.bf16.vlgmr.msra.gmra.mxu1 %vm580_vm11, %v573_v61 }
 0x150   :  { %3713 = vmatpush3.bf16.msra.mxu0 %v774_v3  ;;  %3719 = vmatpush3.bf16.msra.mxu1 %v817_v4 }
 0x151   :  { %3714 = vmatprep.mubr.msk.bf16.mxu0 %vm4456_vm10, %v4455_v1  ;;  %3720 = vmatprep.mubr.msk.bf16.mxu1 %vm4456_vm10, %v4455_v1 }
 0x152   :  { %3730 = vmatprep.subr.bf16.mxu1 %v4026_v57 }
 0x157   :  { %3715 = vmatmul.mubr.msk.bf16.vlgmr.msra.gmra.mxu0 %vm580_vm11, %v573_v61  ;;  %3721 = vmatmul.mubr.msk.bf16.vlgmr.msra.gmra.mxu1 %vm580_vm11, %v573_v61  ;;  %vm1057_vm11 = vcmask 261120  }
 0x158   :  { %3726 = vmatprep.mubr.msk.bf16.mxu0 %vm349_vm5, %v4744_v5  ;;  %3731 = vmatpush3.bf16.msra.mxu1 %v4026_v57 }
 0x159   :  { %3744 = vmatprep.subr.bf16.mxu1 %v4455_v1 }
 0x1ff   :  { %v3680_v6 = vpop.f32.mrf.mxu0  ;;  %v3686_v7 = vpop.f32.mrf.mxu1 }
 0x200   :  { %v454_v13 = vadd.f32 %v3686_v7, %v3680_v6 }
 0x201   :  { %v394_v8 = vpop.f32.mrf.mxu0  ;;  %v445_v9 = vpop.f32.mrf.mxu1 }
 0x202   :  { %v446_v10 = vadd.f32 %v445_v9, %v394_v8  ;;  %v461_v22 = vadd.f32 1e-06, %v454_v13 }
 0x203   :  { %v3681_v11 = vpop.f32.mrf.mxu0  ;;  %v3687_v12 = vpop.f32.mrf.mxu1 }
 0x204   :  { %v459_v14 = vadd.f32 1e-06, %v446_v10  ;;  %v464_v32 = vmul.f32 %v461_v22, %v461_v22 }
 0x205   :  { %v397_v15 = vpop.f32.mrf.mxu0  ;;  %v448_v16 = vpop.f32.mrf.mxu1 }
 0x206   :  { %v462_v17 = vmul.f32 %v459_v14, %v459_v14  ;;  %v449_v19 = vadd.f32 %v448_v16, %v397_v15  ;;  %v472_v41 = vsel %vm465_vm12, %v464_v32, 0.0 }
 0x207   :  { %v622_v20 = vpop.f32.mrf.mxu0  ;;  %v665_v21 = vpop.f32.mrf.mxu1 }
 0x208   :  { %v460_v23 = vadd.f32 1e-06, %v449_v19  ;;  %v4750_v24 = vadd.f32 %v665_v21, %v622_v20  ;;  %v466_v25 = vsel %vm465_vm12, %v462_v17, 0.0 }
 0x209   :  { %467 = vadd.xlane.f32.xlu1 %v466_v25  ;;  %v3692_v26 = vpop.f32.mrf.mxu0  ;;  %v3698_v27 = vpop.f32.mrf.mxu1 }
 0x20a   :  { %v463_v28 = vmul.f32 %v460_v23, %v460_v23  ;;  %v861_v29 = vpack.c.bf16 %v4750_v24, %v4750_v24  ;;  %v1119_v0 = vand.u32 2147483647, %v4750_v24  ;;  %v4783_v26 = vshrl.u32 %v279_v18, 7 }
 0x20b   :  { %v625_v30 = vpop.f32.mrf.mxu0  ;;  %v668_v31 = vpop.f32.mrf.mxu1 }
 0x20c   :  { %3966 = vmatprep.subr.msk.bf16.mxu0 %vm356_vm0, %v861_v29  ;;  %v469_v33 = vsel %vm465_vm12, %v463_v28, 0.0  ;;  %v869_v34 = vsel %vm356_vm0, %v861_v29, 0  ;;  %v1120_v8 = vsub.f32 0.0, %v1119_v0  ;;  %v530_v28 = vld [vmem:[%s5120_s17] sm:$0x1]  ;;  %v553_v30 = vsub.s32 0, %v4783_v26 }
 0x20d   :  { %470 = vadd.xlane.f32.xlu0 %v469_v33  ;;  %v3693_v35 = vpop.f32.mrf.mxu0  ;;  %v3699_v36 = vpop.f32.mrf.mxu1  ;;  %3725 = vmatpush3.bf16.msra.mxu0 %v869_v34  ;;  %v549_v29 = vsub.f32 0.0, %v530_v28  ;;  %v3394_v33 = vld [vmem:[#allocation6] ss:$0 sm:$0xff] }
 0x20e   :  { %3736 = vmatprep.subr.bf16.mxu0 %v4029_v58  ;;  %v1121_v16 = vmul.f32 1.442695, %v1120_v8 }
 0x20f   :  { %v716_v38 = vpop.f32.mrf.mxu0  ;;  %v759_v39 = vpop.f32.mrf.mxu1  ;;  %v554_v34 = vrot.slane %v549_v29, %v553_v30 }
 0x210   :  { %v4762_v40 = vadd.f32 %v759_v39, %v716_v38  ;;  %3727 = vmatmul.mubr.msk.bf16.vlgmr.msra.gmra.mxu0 %vm349_vm5, %v4760_v37 }
 0x211   :  { %473 = vadd.xlane.f32.xlu0 %v472_v41  ;;  %v3704_v42 = vpop.f32.mrf.mxu0  ;;  %v3710_v43 = vpop.f32.mrf.mxu1  ;;  %3737 = vmatpush3.bf16.msra.mxu0 %v4029_v58 }
 0x212   :  { %3738 = vmatprep.subr.bf16.mxu0 %v4030_v59 }
 0x213   :  { %v719_v44 = vpop.f32.mrf.mxu0  ;;  %v762_v46 = vpop.f32.mrf.mxu1 }
 0x215   :  { %v3705_v47 = vpop.f32.mrf.mxu0  ;;  %v3711_v48 = vpop.f32.mrf.mxu1  ;;  %3739 = vmatpush3.bf16.msra.mxu0 %v4030_v59 }
 0x216   :  { %3752 = vmatprep.subr.bf16.mxu0 %v4455_v1 }
 0x217   :  { %v810_v49 = vpop.f32.mrf.mxu0  ;;  %v853_v45 = vpop.f32.mrf.mxu1 }
 0x218   :  { %v4767_v50 = vadd.f32 %v853_v45, %v810_v49 }
 0x219   :  { %v3716_v51 = vpop.f32.mrf.mxu0  ;;  %v3722_v52 = vpop.f32.mrf.mxu1 }
 0x21b   :  { %v813_v53 = vpop.f32.mrf.mxu0  ;;  %v856_v54 = vpop.f32.mrf.mxu1 }
 0x21d   :  { %v3717_v55 = vpop.f32.mrf.mxu0  ;;  %v3723_v56 = vpop.f32.mrf.mxu1 }
 0x292   :  { %v468_v60 = vpop.xlane.xlu1 %467 }
 0x293   :  { %4072 = vrsqrt.f32 %v468_v60  ;;  %vm477_vm13 = vcmp.eq.f32.partialorder %v468_v60, inf  ;;  %v480_v3 = vand.u32 2147483648, %v468_v60  ;;  %vm479_vm14 = vcmp.eq.f32.partialorder %v468_v60, 0.0 }
 0x296   :  { %v471_v61 = vpop.xlane.xlu0 %470 }
 0x297   :  { %4074 = vrsqrt.f32 %v471_v61  ;;  %vm484_vm15 = vcmp.eq.f32.partialorder %v471_v61, inf  ;;  %v487_v11 = vand.u32 2147483648, %v471_v61  ;;  %vm486_vm1 = vcmp.eq.f32.partialorder %v471_v61, 0.0 }
 0x29a   :  { %v474_v62 = vpop.xlane.xlu0 %473 }
 0x29b   :  { %4076 = vrsqrt.f32 %v474_v62  ;;  %vm491_vm2 = vcmp.eq.f32.partialorder %v474_v62, inf  ;;  %v494_v19 = vand.u32 2147483648, %v474_v62  ;;  %vm493_vm3 = vcmp.eq.f32.partialorder %v474_v62, 0.0 }
 0x2a0   :  { %v4073_v63 = vpop.eup %4072 }
 0x2a1   :  { %v476_v2 = vmul.f32 %v4073_v63, %v468_v60 }
 0x2a3   :  { %v478_v4 = vsel %vm477_vm13, %v468_v60, %v476_v2 }
 0x2a4   :  { %v4075_v6 = vpop.eup %4074  ;;  %v4773_v7 = vsel %vm479_vm14, %v480_v3, %v478_v4 }
 0x2a5   :  { %v483_v9 = vmul.f32 %v4075_v6, %v471_v61  ;;  %v531_v10 = vsub.f32 0.0, %v4773_v7  ;;  %v496_v31 = vmul.f32 0.1, %v4773_v7  ;;  %vm523_vm4 = vcmp.lt.f32.partialorder %v4773_v7, 10.0 }
 0x2a7   :  { %v485_v12 = vsel %vm484_vm15, %v471_v61, %v483_v9  ;;  %v534_v13 = vmul.f32 1.442695, %v531_v10  ;;  %v505_v39 = vmul.f32 6.0, %v496_v31  ;;  %v499_v61 = vmul.f32 %v496_v31, %v496_v31 }
 0x2a8   :  { %v4077_v14 = vpop.eup %4076  ;;  %v4776_v15 = vsel %vm486_vm1, %v487_v11, %v485_v12  ;;  %vm1194_vm1 = vcmask 195584  }
 0x2a9   :  { %v490_v17 = vmul.f32 %v4077_v14, %v474_v62  ;;  %v532_v20 = vsub.f32 0.0, %v4776_v15  ;;  %4078 = vpow2.f32 %v534_v13  ;;  %v497_v32 = vmul.f32 0.1, %v4776_v15 }
 0x2aa   :  { %4080 = vpow2.f32 %v1121_v16  ;;  %v508_v49 = vsub.f32 15.0, %v505_v39  ;;  %v502_v8 = vmul.f32 %v499_v61, %v496_v31  ;;  %vm524_vm6 = vcmp.lt.f32.partialorder %v4776_v15, 10.0 }
 0x2ab   :  { %v492_v21 = vsel %vm491_vm2, %v474_v62, %v490_v17  ;;  %v536_v23 = vmul.f32 1.442695, %v532_v20  ;;  %v506_v18 = vmul.f32 6.0, %v497_v32  ;;  %v500_v62 = vmul.f32 %v497_v32, %v497_v32 }
 0x2ac   :  { %v4779_v22 = vsel %vm493_vm3, %v494_v19, %v492_v21  ;;  %v511_v57 = vmul.f32 %v508_v49, %v496_v31 }
 0x2ad   :  { %v533_v25 = vsub.f32 0.0, %v4779_v22  ;;  %4082 = vpow2.f32 %v536_v23  ;;  %v498_v36 = vmul.f32 0.1, %v4779_v22  ;;  %v509_v45 = vsub.f32 15.0, %v506_v18 }
 0x2ae   :  { %v514_v2 = vadd.f32 -10.0, %v511_v57  ;;  %v503_v9 = vmul.f32 %v500_v62, %v497_v32  ;;  %vm525_vm8 = vcmp.lt.f32.partialorder %v4779_v22, 10.0  ;;  %v4027_v22 = vld [vmem:[#allocation9 + $0x8] sm:$0xff]  }
 0x2af   :  { %v538_v27 = vmul.f32 1.442695, %v533_v25  ;;  %v507_v47 = vmul.f32 6.0, %v498_v36  ;;  %v512_v58 = vmul.f32 %v509_v45, %v497_v32  ;;  %v501_v6 = vmul.f32 %v498_v36, %v498_v36 }
 0x2b0   :  { %v517_v11 = vmul.f32 %v514_v2, %v502_v8 }
 0x2b1   :  { %4084 = vpow2.f32 %v538_v27  ;;  %v510_v56 = vsub.f32 15.0, %v507_v47  ;;  %v515_v3 = vadd.f32 -10.0, %v512_v58  ;;  %v504_v14 = vmul.f32 %v501_v6, %v498_v36 }
 0x2b2   :  { %v520_v17 = vadd.f32 1.0, %v517_v11 }
 0x2b3   :  { %v513_v0 = vmul.f32 %v510_v56, %v498_v36  ;;  %v518_v12 = vmul.f32 %v515_v3, %v503_v9  ;;  %v4028_v56 = vld [vmem:[#allocation9] sm:$0xff]  }
 0x2b4   :  { %v526_v32 = vsel %vm523_vm4, %v520_v17, 0.0 }
 0x2b5   :  { %v516_v10 = vadd.f32 -10.0, %v513_v0  ;;  %v521_v19 = vadd.f32 1.0, %v518_v12 }
 0x2b6   :  { %v4079_v35 = vpop.eup %4078 }
 0x2b7   :  { %v546_v38 = vsub.f32 %v4079_v35, %v3394_v33  ;;  %v4790_v41 = vpop.eup %4080  ;;  %v519_v16 = vmul.f32 %v516_v10, %v504_v14 }
 0x2b8   :  { %v1123_v48 = vadd.f32 1.0, %v4790_v41  ;;  %v1126_v13 = vmul.f32 -0.5, %v4790_v41  ;;  %v1129_v25 = vand.u32 2147483647, %v4790_v41 }
 0x2b9   :  { %v556_v42 = vmul.f32 %v554_v34, %v546_v38  ;;  %v522_v28 = vadd.f32 1.0, %v519_v16 }
 0x2ba   :  { %v4083_v43 = vpop.eup %4082  ;;  %4086 = vlog2.f32 %v1123_v48  ;;  %v1127_v21 = vadd.f32 1.0, %v1126_v13  ;;  %vm1130_vm9 = vcmp.lt.f32.partialorder %v1129_v25, 0.0004427343  ;;  %v1118_v48 = vmax.f32 %v4750_v24, 0.0 }
 0x2bb   :  { %v547_v44 = vsub.f32 %v4083_v43, %v3394_v33  ;;  %v559_v46 = vmul.f32 %v556_v42, %v546_v38  ;;  %v528_v43 = vsel %vm525_vm8, %v522_v28, 0.0 }
 0x2bd   :  { %v557_v52 = vmul.f32 %v554_v34, %v547_v44  ;;  %v562_v53 = vmul.f32 1.442695, %v559_v46 }
 0x2be   :  { %v4085_v51 = vpop.eup %4084 }
 0x2bf   :  { %v548_v54 = vsub.f32 %v4085_v51, %v3394_v33  ;;  %v560_v55 = vmul.f32 %v557_v52, %v547_v44  ;;  %4088 = vpow2.f32 %v562_v53  ;;  %v527_v33 = vsel %vm524_vm6, %v521_v19, 0.0 }
 0x2c1   :  { %v558_v59 = vmul.f32 %v554_v34, %v548_v54  ;;  %v564_v60 = vmul.f32 1.442695, %v560_v55  ;;  %v1128_v34 = vmul.f32 %v4790_v41, %v1127_v21 }
 0x2c3   :  { %v561_v63 = vmul.f32 %v558_v59, %v548_v54  ;;  %4090 = vpow2.f32 %v564_v60 }
 0x2c5   :  { %v566_v4 = vmul.f32 1.442695, %v561_v63 }
 0x2c7   :  { %4092 = vpow2.f32 %v566_v4  ;;  %v4087_v20 = vpop.eup %4086 }
 0x2c8   :  { %v1125_v30 = vmul.f32 0.6931472, %v4087_v20 }
 0x2ca   :  { %v1131_v44 = vsel %vm1130_vm9, %v1128_v34, %v1125_v30 }
 0x2cb   :  { %v1132_v52 = vadd.f32 %v1131_v44, %v1118_v48 }
 0x2cc   :  { %v4089_v23 = vpop.eup %4088 }
 0x2cd   :  { %v568_v36 = vmul.f32 %v4089_v23, %v526_v32  ;;  %v3414_v57 = vadd.f32 -0.6931472, %v1132_v52 }
 0x2cf   :  { %v1138_v58 = vpack.c.bf16 %v3414_v57, %v3414_v57 }
 0x2d0   :  { %v4795_v27 = vpop.f32.mrf.mxu0  ;;  %v4091_v29 = vpop.eup %4090 }
 0x2d1   :  { %v989_v31 = vand.u32 2147483647, %v4795_v27  ;;  %v569_v38 = vmul.f32 %v4091_v29, %v527_v33  ;;  %v986_v23 = vmax.f32 %v4795_v27, 0.0 }
 0x2d2   :  { %v4801_v35 = vpop.f32.mrf.mxu0 }
 0x2d3   :  { %v992_v39 = vsub.f32 0.0, %v989_v31  ;;  %v987_v18 = vand.u32 2147483647, %v4801_v35  ;;  %v4805_v42 = vpack.c.bf16 %v569_v38, %v568_v36  ;;  %v984_v29 = vmax.f32 %v4801_v35, 0.0 }
 0x2d4   :  { %v4093_v7 = vpop.eup %4092  ;;  %v3729_v15 = vpop.f32.mrf.mxu0 }
 0x2d5   :  { %v997_v46 = vmul.f32 1.442695, %v992_v39  ;;  %v990_v47 = vsub.f32 0.0, %v987_v18  ;;  %v570_v41 = vmul.f32 %v4093_v7, %v528_v43  ;;  %3732 = vmatprep.mubr.msk.bf16.mxu1 %vm929_vm7, %v4805_v42 }
 0x2d6   :  { %v908_v49 = vpop.f32.mrf.mxu0 }
 0x2d7   :  { %4094 = vpow2.f32 %v997_v46  ;;  %v993_v45 = vmul.f32 1.442695, %v990_v47  ;;  %v988_v51 = vand.u32 2147483647, %v908_v49  ;;  %v4810_v53 = vpack.c.bf16 %v570_v41, %v570_v41 }
 0x2d8   :  { %v985_v34 = vmax.f32 %v908_v49, 0.0 }
 0x2d9   :  { %4096 = vpow2.f32 %v993_v45  ;;  %v991_v54 = vsub.f32 0.0, %v988_v51  ;;  %3733 = vmatmul.mubr.msk.bf16.vlgmr.msra.gmra.mxu1 %vm929_vm7, %v4810_v53  ;;  %v3409_v45 = vld [vmem:[%s5121_s24] ss:$0 sm:$0xff] }
 0x2da   :  { %3745 = vmatpush3.bf16.msra.mxu1 %v4027_v22  ;;  %3748 = vmatprep.mubr.msk.bf16.mxu1 %vm4456_vm10, %v4455_v1 }
 0x2db   :  { %v995_v55 = vmul.f32 1.442695, %v991_v54  ;;  %3746 = vmatprep.subr.bf16.mxu1 %v4455_v1 }
 0x2dd   :  { %4098 = vpow2.f32 %v995_v55  ;;  %v3388_v55 = vld [vmem:[%s5122_s20] ss:$0 sm:$0xff] }
 0x2de   :  { %3747 = vmatpush3.bf16.msra.mxu1 %v4028_v56  ;;  %vm324_vm15 = vcmp.eq.s32.totalorder %v4783_v26, %v3388_v55 }
 0x2df   :  { %3760 = vmatprep.subr.bf16.mxu1 %v4455_v1 }
 0x2e1   :  { %3749 = vmatmul.mubr.msk.bf16.vlgmr.msra.gmra.mxu1 %vm1057_vm11, %v1138_v58 }
 0x2e2   :  { %3764 = vmatprep.mubr.msk.bf16.mxu1 %vm4456_vm10, %v4455_v1 }
 0x2e4   :  { %v4095_v59 = vpop.eup %4094 }
 0x2e5   :  { %v1017_v60 = vadd.f32 1.0, %v4095_v59  ;;  %v1020_v2 = vmul.f32 -0.5, %v4095_v59  ;;  %v1023_v6 = vand.u32 2147483647, %v4095_v59 }
 0x2e6   :  { %v4097_v61 = vpop.eup %4096 }
 0x2e7   :  { %4100 = vlog2.f32 %v1017_v60  ;;  %v999_v62 = vadd.f32 1.0, %v4097_v61  ;;  %v1002_v3 = vmul.f32 -0.5, %v4097_v61  ;;  %v1021_v4 = vadd.f32 1.0, %v1020_v2 }
 0x2e8   :  { %v1005_v11 = vand.u32 2147483647, %v4097_v61  ;;  %vm1024_vm12 = vcmp.lt.f32.partialorder %v1023_v6, 0.0004427343  ;;  %v4032_v6 = vld [vmem:[#allocation10] sm:$0xff]  }
 0x2e9   :  { %4102 = vlog2.f32 %v999_v62  ;;  %v1003_v8 = vadd.f32 1.0, %v1002_v3  ;;  %v1022_v14 = vmul.f32 %v4095_v59, %v1021_v4  ;;  %v4031_v4 = vld [vmem:[#allocation10 + $0x8] sm:$0xff]  }
 0x2ea   :  { %v4099_v63 = vpop.eup %4098  ;;  %vm1006_vm13 = vcmp.lt.f32.partialorder %v1005_v11, 0.0004427343  ;;  %3761 = vmatpush3.bf16.msra.mxu1 %v4031_v4 }
 0x2eb   :  { %v1008_v0 = vadd.f32 1.0, %v4099_v63  ;;  %v1011_v9 = vmul.f32 -0.5, %v4099_v63  ;;  %v1004_v17 = vmul.f32 %v4097_v61, %v1003_v8  ;;  %v1014_v21 = vand.u32 2147483647, %v4099_v63  ;;  %3762 = vmatprep.subr.bf16.mxu1 %v4455_v1  ;;  %v4842_v8 = vld [vmem:[%s4642_s8] sm:$0xff] }
 0x2ed   :  { %4104 = vlog2.f32 %v1008_v0  ;;  %v1012_v19 = vadd.f32 1.0, %v1011_v9  ;;  %vm1015_vm14 = vcmp.lt.f32.partialorder %v1014_v21, 0.0004427343  ;;  %v325_v0 = vsel %vm324_vm15, 1.0, %v4455_v1 }
 0x2ee   :  { %v4833_v3 = vpack.c.bf16 %v325_v0, %v325_v0  ;;  %3763 = vmatpush3.bf16.msra.mxu1 %v4032_v6 }
 0x2ef   :  { %v1013_v32 = vmul.f32 %v4099_v63, %v1012_v19  ;;  %3776 = vmatprep.subr.bf16.mxu1 %v4842_v8 }
 0x2f4   :  { %v4101_v10 = vpop.eup %4100 }
 0x2f5   :  { %v1019_v12 = vmul.f32 0.6931472, %v4101_v10  ;;  %v3419_v10 = vld [vmem:[%s5123_s10] ss:$0 sm:$0xff] }
 0x2f6   :  { %v4103_v13 = vpop.eup %4102 }
 0x2f7   :  { %v1001_v16 = vmul.f32 0.6931472, %v4103_v13  ;;  %v1025_v20 = vsel %vm1024_vm12, %v1022_v14, %v1019_v12 }
 0x2f8   :  { %v1028_v30 = vadd.f32 %v1025_v20, %v986_v23 }
 0x2f9   :  { %v1007_v25 = vsel %vm1006_vm13, %v1004_v17, %v1001_v16 }
 0x2fa   :  { %v4105_v28 = vpop.eup %4104  ;;  %v1026_v33 = vadd.f32 %v1007_v25, %v984_v29  ;;  %v3408_v39 = vadd.f32 -0.6931472, %v1028_v30 }
 0x2fb   :  { %v1010_v31 = vmul.f32 0.6931472, %v4105_v28 }
 0x2fc   :  { %v3406_v18 = vadd.f32 -0.6931472, %v1026_v33  ;;  %v1037_v43 = vpack.c.bf16 %v3408_v39, %v3408_v39  ;;  %v4033_v39 = vld [vmem:[#allocation12 + $0x8] sm:$0xff]  }
 0x2fd   :  { %v1016_v36 = vsel %vm1015_vm14, %v1013_v32, %v1010_v31 }
 0x2fe   :  { %v1027_v38 = vadd.f32 %v1016_v36, %v985_v34 }
 0x300   :  { %v3407_v7 = vadd.f32 -0.6931472, %v1027_v38 }
 0x302   :  { %v1036_v15 = vpack.c.bf16 %v3407_v7, %v3406_v18  ;;  %v4034_v18 = vld [vmem:[#allocation12] sm:$0xff]   ;;  %v3421_v7 = vld [vmem:[%s5124_s11] ss:$0 sm:$0xff] }
 0x304   :  { %3740 = vmatprep.mubr.msk.bf16.mxu0 %vm1057_vm11, %v1036_v15 }
 0x305   :  { %3741 = vmatmul.mubr.msk.bf16.vlgmr.msra.gmra.mxu0 %vm1057_vm11, %v1037_v43 }
 0x306   :  { %3756 = vmatprep.mubr.msk.bf16.mxu0 %vm4456_vm10, %v4455_v1 }
 0x399   :  { %v3734_v27 = vpop.f32.mrf.mxu1 }
 0x39b   :  { %v970_v35 = vpop.f32.mrf.mxu1 }
 0x39d   :  { %v3735_v44 = vpop.f32.mrf.mxu1 }
 0x39f   :  { %v973_v46 = vpop.f32.mrf.mxu1 }
 0x3a1   :  { %v1188_v47 = vpop.f32.mrf.mxu1 }
 0x3a3   :  { %v3750_v41 = vpop.f32.mrf.mxu1 }
 0x3a5   :  { %v1191_v48 = vpop.f32.mrf.mxu1 }
 0x3a7   :  { %v3751_v49 = vpop.f32.mrf.mxu1 }
 0x3c5   :  { %v3742_v51 = vpop.f32.mrf.mxu0 }
 0x3c6   :  { %v1107_v22 = vadd.f32 %v3742_v51, %v3409_v45 }
 0x3c7   :  { %v1098_v52 = vpop.f32.mrf.mxu0 }
 0x3c8   :  { %v1114_v54 = vmul.f32 %v3734_v27, %v1107_v22  ;;  %v1099_v58 = vadd.f32 %v3409_v45, %v1098_v52 }
 0x3c9   :  { %v3743_v56 = vpop.f32.mrf.mxu0 }
 0x3ca   :  { %v1117_v57 = vpack.c.bf16 %v1114_v54, %v1114_v54  ;;  %v1112_v62 = vmul.f32 %v1099_v58, %v970_v35 }
 0x3cb   :  { %v1101_v59 = vpop.f32.mrf.mxu0 }
 0x3cc   :  { %v1102_v60 = vadd.f32 %v3409_v45, %v1101_v59  ;;  %v1199_v61 = vsel %vm356_vm0, %v1117_v57, 0 }
 0x3cd   :  { %3753 = vmatpush3.bf16.msra.mxu0 %v1199_v61  ;;  %v4035_v61 = vld [vmem:[#allocation13 + $0x8] sm:$0xff]  }
 0x3ce   :  { %v1113_v63 = vmul.f32 %v1102_v60, %v973_v46  ;;  %3754 = vmatprep.subr.bf16.mxu0 %v4455_v1 }
 0x3d0   :  { %v1116_v2 = vpack.c.bf16 %v1113_v63, %v1112_v62  ;;  %v4036_v62 = vld [vmem:[#allocation13] sm:$0xff]   ;;  %v3426_v63 = vld [vmem:[%s5125_s28] ss:$0 sm:$0xff] }
 0x3d2   :  { %3755 = vmatpush3.bf16.msra.mxu0 %v1116_v2 }
 0x3d3   :  { %3768 = vmatprep.subr.bf16.mxu0 %v4455_v1 }
 0x3d5   :  { %3757 = vmatmul.mubr.msk.bf16.vlgmr.msra.gmra.mxu0 %vm1194_vm1, %v4833_v3 }
 0x3d6   :  { %3772 = vmatprep.mubr.msk.bf16.mxu0 %vm4456_vm10, %v4455_v1  ;;  %3769 = vmatpush3.bf16.msra.mxu0 %v4033_v39  ;;  %v3435_v39 = vld [vmem:[%s5127_s1] ss:$0 sm:$0xff] }
 0x3d7   :  { %3770 = vmatprep.subr.bf16.mxu0 %v4842_v8 }
 0x3da   :  { %3771 = vmatpush3.bf16.msra.mxu0 %v4034_v18 }
 0x3db   :  { %3784 = vmatprep.subr.bf16.mxu0 %v4842_v8 }
 0x495   :  { %v1235_v9 = vpop.f32.mrf.mxu0 }
 0x496   :  { %v1236_v11 = vadd.f32 %v1235_v9, %v1188_v47 }
 0x497   :  { %v3758_v12 = vpop.f32.mrf.mxu0 }
 0x498   :  { %v4846_v13 = vadd.f32 %v3419_v10, %v1236_v11 }
 0x499   :  { %v1238_v14 = vpop.f32.mrf.mxu0 }
 0x49a   :  { %v1260_v16 = vand.u32 2147483647, %v4846_v13  ;;  %v1259_v32 = vmax.f32 %v4846_v13, 0.0 }
 0x49b   :  { %v3759_v17 = vpop.f32.mrf.mxu0 }
 0x49c   :  { %v1261_v19 = vsub.f32 0.0, %v1260_v16 }
 0x49e   :  { %v1262_v20 = vmul.f32 1.442695, %v1261_v19 }
 0x4a0   :  { %4106 = vpow2.f32 %v1262_v20 }
 0x4ad   :  { %v4107_v1 = vpop.eup %4106 }
 0x4ae   :  { %v1264_v21 = vadd.f32 1.0, %v4107_v1  ;;  %v1267_v23 = vmul.f32 -0.5, %v4107_v1  ;;  %v1270_v28 = vand.u32 2147483647, %v4107_v1 }
 0x4b0   :  { %4108 = vlog2.f32 %v1264_v21  ;;  %v1268_v25 = vadd.f32 1.0, %v1267_v23  ;;  %vm1271_vm2 = vcmp.lt.f32.partialorder %v1270_v28, 0.0004427343 }
 0x4b2   :  { %v1269_v31 = vmul.f32 %v4107_v1, %v1268_v25 }
 0x4bd   :  { %v4109_v29 = vpop.eup %4108 }
 0x4be   :  { %v1266_v30 = vmul.f32 0.6931472, %v4109_v29 }
 0x4c0   :  { %v1272_v33 = vsel %vm1271_vm2, %v1269_v31, %v1266_v30 }
 0x4c1   :  { %v1273_v34 = vadd.f32 %v1272_v33, %v1259_v32  ;;  %v4037_v32 = vld [vmem:[#allocation15 + $0x8] sm:$0xff]   ;;  %v4038_v33 = vld [vmem:[#allocation15] sm:$0xff]  }
 0x4c3   :  { %v3420_v36 = vadd.f32 -0.6931472, %v1273_v34  ;;  %v3430_v34 = vld [vmem:[%s5126_s0] ss:$0 sm:$0xff] }
 0x4c5   :  { %v1275_v38 = vpack.c.bf16 %v3420_v36, %v3420_v36  ;;  %v1423_v36 = vmul.f32 %v3430_v34, %v4750_v24 }
 0x4c7   :  { %3765 = vmatmul.mubr.msk.bf16.vlgmr.msra.gmra.mxu1 %vm1057_vm11, %v1275_v38 }
 0x4c8   :  { %3780 = vmatprep.mubr.msk.bf16.mxu1 %vm4456_vm10, %v4842_v8  ;;  %3777 = vmatpush3.bf16.msra.mxu1 %v4035_v61 }
 0x4c9   :  { %3778 = vmatprep.subr.bf16.mxu1 %v4842_v8 }
 0x4cc   :  { %3779 = vmatpush3.bf16.msra.mxu1 %v4036_v62 }
 0x4cd   :  { %3792 = vmatprep.subr.bf16.mxu1 %v4842_v8 }
 0x587   :  { %v1331_v15 = vpop.f32.mrf.mxu1 }
 0x588   :  { %v1332_v43 = vadd.f32 %v3421_v7, %v1331_v15 }
 0x589   :  { %v3766_v27 = vpop.f32.mrf.mxu1 }
 0x58a   :  { %v1338_v35 = vand.u32 2147483647, %v1332_v43  ;;  %v1337_v56 = vmax.f32 %v1332_v43, 0.0 }
 0x58b   :  { %v1334_v44 = vpop.f32.mrf.mxu1 }
 0x58c   :  { %v1339_v46 = vsub.f32 0.0, %v1338_v35 }
 0x58d   :  { %v3767_v47 = vpop.f32.mrf.mxu1 }
 0x58e   :  { %v1340_v41 = vmul.f32 1.442695, %v1339_v46 }
 0x590   :  { %4110 = vpow2.f32 %v1340_v41 }
 0x59d   :  { %v4111_v48 = vpop.eup %4110 }
 0x59e   :  { %v1342_v49 = vadd.f32 1.0, %v4111_v48  ;;  %v1345_v45 = vmul.f32 -0.5, %v4111_v48  ;;  %v1348_v22 = vand.u32 2147483647, %v4111_v48 }
 0x5a0   :  { %4112 = vlog2.f32 %v1342_v49  ;;  %v1346_v51 = vadd.f32 1.0, %v1345_v45  ;;  %vm1349_vm3 = vcmp.lt.f32.partialorder %v1348_v22, 0.0004427343 }
 0x5a2   :  { %v1347_v55 = vmul.f32 %v4111_v48, %v1346_v51 }
 0x5ad   :  { %v4113_v52 = vpop.eup %4112 }
 0x5ae   :  { %v1344_v54 = vmul.f32 0.6931472, %v4113_v52 }
 0x5b0   :  { %v1350_v57 = vsel %vm1349_vm3, %v1347_v55, %v1344_v54 }
 0x5b1   :  { %v1351_v58 = vadd.f32 %v1350_v57, %v1337_v56 }
 0x5b3   :  { %v3425_v59 = vadd.f32 -0.6931472, %v1351_v58  ;;  %v4039_v58 = vld [vmem:[#allocation16 + $0x8] sm:$0xff]  }
 0x5b5   :  { %v1353_v60 = vpack.c.bf16 %v3425_v59, %v3425_v59  ;;  %v4040_v59 = vld [vmem:[#allocation16] sm:$0xff]  }
 0x5b7   :  { %3773 = vmatmul.mubr.msk.bf16.vlgmr.msra.gmra.mxu0 %vm1057_vm11, %v1353_v60  ;;  %v3437_v60 = vld [vmem:[%s5128_s27] ss:$0 sm:$0xff] }
 0x5b8   :  { %3788 = vmatprep.mubr.msk.bf16.mxu0 %vm4456_vm10, %v4842_v8  ;;  %3785 = vmatpush3.bf16.msra.mxu0 %v4037_v32 }
 0x5b9   :  { %3786 = vmatprep.subr.bf16.mxu0 %v4842_v8 }
 0x5bc   :  { %3787 = vmatpush3.bf16.msra.mxu0 %v4038_v33 }
 0x5bd   :  { %3800 = vmatprep.subr.bf16.mxu0 %v4842_v8 }
 0x677   :  { %v1409_v0 = vpop.f32.mrf.mxu0 }
 0x678   :  { %v1410_v2 = vadd.f32 %v3426_v63, %v1409_v0 }
 0x679   :  { %v3774_v4 = vpop.f32.mrf.mxu0 }
 0x67a   :  { %v1415_v6 = vadd.f32 %v1410_v2, %v4846_v13 }
 0x67b   :  { %v1412_v9 = vpop.f32.mrf.mxu0 }
 0x67c   :  { %v1425_v10 = vand.u32 2147483647, %v1415_v6  ;;  %v1424_v28 = vmax.f32 %v1415_v6, 0.0 }
 0x67d   :  { %v3775_v11 = vpop.f32.mrf.mxu0 }
 0x67e   :  { %v1426_v12 = vsub.f32 0.0, %v1425_v10 }
 0x680   :  { %v1427_v14 = vmul.f32 1.442695, %v1426_v12 }
 0x682   :  { %4114 = vpow2.f32 %v1427_v14 }
 0x68f   :  { %v4115_v16 = vpop.eup %4114 }
 0x690   :  { %v1429_v17 = vadd.f32 1.0, %v4115_v16  ;;  %v1432_v19 = vmul.f32 -0.5, %v4115_v16  ;;  %v1435_v1 = vand.u32 2147483647, %v4115_v16 }
 0x692   :  { %4116 = vlog2.f32 %v1429_v17  ;;  %v1433_v20 = vadd.f32 1.0, %v1432_v19  ;;  %vm1436_vm4 = vcmp.lt.f32.partialorder %v1435_v1, 0.0004427343 }
 0x694   :  { %v1434_v25 = vmul.f32 %v4115_v16, %v1433_v20 }
 0x69f   :  { %v4117_v21 = vpop.eup %4116 }
 0x6a0   :  { %v1431_v23 = vmul.f32 0.6931472, %v4117_v21 }
 0x6a2   :  { %v1437_v13 = vsel %vm1436_vm4, %v1434_v25, %v1431_v23 }
 0x6a3   :  { %v1438_v29 = vadd.f32 %v1437_v13, %v1424_v28  ;;  %v4041_v13 = vld [vmem:[%s5129_s2 + $0x8] sm:$0xff]  }
 0x6a5   :  { %v3431_v30 = vadd.f32 -0.6931472, %v1438_v29  ;;  %v4042_v29 = vld [vmem:[%s5129_s2] sm:$0xff]  }
 0x6a7   :  { %v1444_v31 = vpack.c.bf16 %v3431_v30, %v3431_v30  ;;  %v3442_v30 = vld [vmem:[%s5130_s7] ss:$0 sm:$0xff] }
 0x6a9   :  { %3781 = vmatmul.mubr.msk.bf16.vlgmr.msra.gmra.mxu1 %vm1057_vm11, %v1444_v31 }
 0x6aa   :  { %3796 = vmatprep.mubr.msk.bf16.mxu1 %vm4456_vm10, %v4842_v8  ;;  %3793 = vmatpush3.bf16.msra.mxu1 %v4039_v58 }
 0x6ab   :  { %3794 = vmatprep.subr.bf16.mxu1 %v4842_v8 }
 0x6ae   :  { %3795 = vmatpush3.bf16.msra.mxu1 %v4040_v59 }
 0x6af   :  { %3808 = vmatprep.subr.bf16.mxu1 %v4842_v8 }
 0x769   :  { %v1494_v38 = vpop.f32.mrf.mxu1 }
 0x76a   :  { %v1500_v18 = vadd.f32 %v1494_v38, %v1423_v36 }
 0x76b   :  { %v3782_v7 = vpop.f32.mrf.mxu1 }
 0x76c   :  { %v4871_v15 = vadd.f32 %v3435_v39, %v1500_v18 }
 0x76d   :  { %v1497_v43 = vpop.f32.mrf.mxu1 }
 0x76e   :  { %v1520_v27 = vand.u32 2147483647, %v4871_v15  ;;  %v1519_v52 = vmax.f32 %v4871_v15, 0.0 }
 0x76f   :  { %v3783_v35 = vpop.f32.mrf.mxu1 }
 0x770   :  { %v1521_v44 = vsub.f32 0.0, %v1520_v27 }
 0x772   :  { %v1522_v46 = vmul.f32 1.442695, %v1521_v44 }
 0x774   :  { %4118 = vpow2.f32 %v1522_v46 }
 0x781   :  { %v4119_v47 = vpop.eup %4118 }
 0x782   :  { %v1524_v41 = vadd.f32 1.0, %v4119_v47  ;;  %v1527_v48 = vmul.f32 -0.5, %v4119_v47  ;;  %v1530_v45 = vand.u32 2147483647, %v4119_v47 }
 0x784   :  { %4120 = vlog2.f32 %v1524_v41  ;;  %v1528_v49 = vadd.f32 1.0, %v1527_v48  ;;  %vm1531_vm6 = vcmp.lt.f32.partialorder %v1530_v45, 0.0004427343 }
 0x786   :  { %v1529_v22 = vmul.f32 %v4119_v47, %v1528_v49 }
 0x791   :  { %v4121_v24 = vpop.eup %4120 }
 0x792   :  { %v1526_v51 = vmul.f32 0.6931472, %v4121_v24 }
 0x794   :  { %v1532_v54 = vsel %vm1531_vm6, %v1529_v22, %v1526_v51  ;;  %v4043_v51 = vld [vmem:[%s5131_s4 + $0x8] sm:$0xff]  }
 0x795   :  { %v1533_v55 = vadd.f32 %v1532_v54, %v1519_v52  ;;  %v4044_v52 = vld [vmem:[%s5131_s4] sm:$0xff]  }
 0x797   :  { %v3436_v56 = vadd.f32 -0.6931472, %v1533_v55  ;;  %v4045_v55 = vld [vmem:[%s5132_s15 + $0x8] sm:$0xff]  }
 0x799   :  { %v1535_v57 = vpack.c.bf16 %v3436_v56, %v3436_v56  ;;  %v4046_v56 = vld [vmem:[%s5132_s15] sm:$0xff]  }
 0x79b   :  { %3789 = vmatmul.mubr.msk.bf16.vlgmr.msra.gmra.mxu0 %vm1057_vm11, %v1535_v57  ;;  %v3447_v57 = vld [vmem:[%s5133_s16] ss:$0 sm:$0xff] }
 0x79c   :  { %3804 = vmatprep.mubr.msk.bf16.mxu0 %vm4456_vm10, %v4842_v8  ;;  %3801 = vmatpush3.bf16.msra.mxu0 %v4041_v13 }
 0x79d   :  { %3802 = vmatprep.subr.bf16.mxu0 %v4842_v8 }
 0x7a0   :  { %3803 = vmatpush3.bf16.msra.mxu0 %v4042_v29 }
 0x7a1   :  { %3816 = vmatprep.subr.bf16.mxu0 %v4842_v8 }
 0x85b   :  { %v1591_v61 = vpop.f32.mrf.mxu0 }
 0x85c   :  { %v1592_v62 = vadd.f32 %v3437_v60, %v1591_v61 }
 0x85d   :  { %v3790_v63 = vpop.f32.mrf.mxu0 }
 0x85e   :  { %v1598_v0 = vand.u32 2147483647, %v1592_v62  ;;  %v1597_v1 = vmax.f32 %v1592_v62, 0.0 }
 0x85f   :  { %v1594_v2 = vpop.f32.mrf.mxu0 }
 0x860   :  { %v1599_v4 = vsub.f32 0.0, %v1598_v0 }
 0x861   :  { %v3791_v6 = vpop.f32.mrf.mxu0 }
 0x862   :  { %v1600_v9 = vmul.f32 1.442695, %v1599_v4 }
 0x864   :  { %4122 = vpow2.f32 %v1600_v9 }
 0x871   :  { %v4123_v10 = vpop.eup %4122 }
 0x872   :  { %v1602_v11 = vadd.f32 1.0, %v4123_v10  ;;  %v1605_v12 = vmul.f32 -0.5, %v4123_v10  ;;  %v1608_v16 = vand.u32 2147483647, %v4123_v10 }
 0x874   :  { %4124 = vlog2.f32 %v1602_v11  ;;  %v1606_v14 = vadd.f32 1.0, %v1605_v12  ;;  %vm1609_vm8 = vcmp.lt.f32.partialorder %v1608_v16, 0.0004427343 }
 0x876   :  { %v1607_v20 = vmul.f32 %v4123_v10, %v1606_v14 }
 0x881   :  { %v4125_v17 = vpop.eup %4124 }
 0x882   :  { %v1604_v19 = vmul.f32 0.6931472, %v4125_v17 }
 0x884   :  { %v1610_v21 = vsel %vm1609_vm8, %v1607_v20, %v1604_v19 }
 0x885   :  { %v1611_v23 = vadd.f32 %v1610_v21, %v1597_v1 }
 0x887   :  { %v3441_v25 = vadd.f32 -0.6931472, %v1611_v23  ;;  %v3452_v23 = vld [vmem:[%s5134_s29] ss:$0 sm:$0xff] }
 0x889   :  { %v1613_v28 = vpack.c.bf16 %v3441_v25, %v3441_v25 }
 0x88b   :  { %3797 = vmatmul.mubr.msk.bf16.vlgmr.msra.gmra.mxu1 %vm1057_vm11, %v1613_v28 }
 0x88c   :  { %3812 = vmatprep.mubr.msk.bf16.mxu1 %vm4456_vm10, %v4842_v8  ;;  %3809 = vmatpush3.bf16.msra.mxu1 %v4045_v55 }
 0x88d   :  { %3810 = vmatprep.subr.bf16.mxu1 %v4842_v8 }
 0x890   :  { %3811 = vmatpush3.bf16.msra.mxu1 %v4046_v56 }
 0x891   :  { %3824 = vmatprep.subr.bf16.mxu1 %v4842_v8 }
 0x94b   :  { %v1669_v31 = vpop.f32.mrf.mxu1 }
 0x94c   :  { %v1670_v32 = vadd.f32 %v3442_v30, %v1669_v31 }
 0x94d   :  { %v3798_v33 = vpop.f32.mrf.mxu1 }
 0x94e   :  { %v4890_v34 = vadd.f32 %v1670_v32, %v4871_v15 }
 0x94f   :  { %v1672_v36 = vpop.f32.mrf.mxu1 }
 0x950   :  { %v1687_v38 = vand.u32 2147483647, %v4890_v34  ;;  %v1686_v15 = vmax.f32 %v4890_v34, 0.0  ;;  %v4905_v54 = vpack.c.bf16 %v4890_v34, %v4890_v34 }
 0x951   :  { %v3799_v39 = vpop.f32.mrf.mxu1 }
 0x952   :  { %v1688_v18 = vsub.f32 0.0, %v1687_v38 }
 0x954   :  { %v1689_v7 = vmul.f32 1.442695, %v1688_v18 }
 0x956   :  { %4126 = vpow2.f32 %v1689_v7 }
 0x963   :  { %v4127_v43 = vpop.eup %4126 }
 0x964   :  { %v1691_v27 = vadd.f32 1.0, %v4127_v43  ;;  %v1694_v35 = vmul.f32 -0.5, %v4127_v43  ;;  %v1697_v46 = vand.u32 2147483647, %v4127_v43 }
 0x966   :  { %4128 = vlog2.f32 %v1691_v27  ;;  %v1695_v44 = vadd.f32 1.0, %v1694_v35  ;;  %vm1698_vm9 = vcmp.lt.f32.partialorder %v1697_v46, 0.0004427343 }
 0x968   :  { %v1696_v48 = vmul.f32 %v4127_v43, %v1695_v44 }
 0x973   :  { %v4129_v47 = vpop.eup %4128 }
 0x974   :  { %v1693_v41 = vmul.f32 0.6931472, %v4129_v47 }
 0x976   :  { %v1699_v49 = vsel %vm1698_vm9, %v1696_v48, %v1693_v41 }
 0x977   :  { %v1700_v45 = vadd.f32 %v1699_v49, %v1686_v15  ;;  %v2011_v49 = vsel %vm356_vm0, %v4905_v54, 0 }
 0x979   :  { %v3446_v24 = vadd.f32 -0.6931472, %v1700_v45  ;;  %v4047_v45 = vld [vmem:[%s4632_s3 + $0x8] sm:$0xff]  }
 0x97b   :  { %v4895_v22 = vpack.c.bf16 %v3446_v24, %v3446_v24  ;;  %v4048_v24 = vld [vmem:[%s4632_s3] sm:$0xff]  }
 0x97d   :  { %3805 = vmatmul.mubr.msk.bf16.vlgmr.msra.gmra.mxu0 %vm1057_vm11, %v4895_v22 }
 0x97e   :  { %3817 = vmatpush3.bf16.msra.mxu0 %v4043_v51  ;;  %3820 = vmatprep.mubr.msk.bf16.mxu0 %vm4456_vm10, %v4842_v8  ;;  %v4930_v51 = vld [vmem:[%s5119_s9 + $0x8] sm:$0xff]  }
 0x97f   :  { %3818 = vmatprep.subr.bf16.mxu0 %v4842_v8 }
 0x982   :  { %3819 = vmatpush3.bf16.msra.mxu0 %v4044_v52  ;;  %v4050_v52 = vld [vmem:[#allocation7 + $0x18] sm:$0xff]  }
 0x983   :  { %3967 = vmatprep.subr.msk.bf16.mxu0 %vm356_vm0, %v4905_v54  ;;  %v4051_v54 = vld [vmem:[#allocation7 + $0x10] sm:$0xff]  }
 0xa3d   :  { %v1758_v58 = vpop.f32.mrf.mxu0 }
 0xa3e   :  { %v1759_v59 = vadd.f32 %v3447_v57, %v1758_v58 }
 0xa3f   :  { %v3806_v60 = vpop.f32.mrf.mxu0 }
 0xa40   :  { %v1765_v61 = vand.u32 2147483647, %v1759_v59  ;;  %v1764_v17 = vmax.f32 %v1759_v59, 0.0 }
 0xa41   :  { %v1761_v62 = vpop.f32.mrf.mxu0 }
 0xa42   :  { %v1766_v63 = vsub.f32 0.0, %v1765_v61 }
 0xa43   :  { %v3807_v0 = vpop.f32.mrf.mxu0 }
 0xa44   :  { %v1767_v2 = vmul.f32 1.442695, %v1766_v63 }
 0xa46   :  { %4130 = vpow2.f32 %v1767_v2 }
 0xa53   :  { %v4131_v4 = vpop.eup %4130 }
 0xa54   :  { %v1769_v6 = vadd.f32 1.0, %v4131_v4  ;;  %v1772_v9 = vmul.f32 -0.5, %v4131_v4  ;;  %v1775_v11 = vand.u32 2147483647, %v4131_v4 }
 0xa56   :  { %4132 = vlog2.f32 %v1769_v6  ;;  %v1773_v10 = vadd.f32 1.0, %v1772_v9  ;;  %vm1776_vm12 = vcmp.lt.f32.partialorder %v1775_v11, 0.0004427343 }
 0xa58   :  { %v1774_v16 = vmul.f32 %v4131_v4, %v1773_v10 }
 0xa63   :  { %v4133_v12 = vpop.eup %4132 }
 0xa64   :  { %v1771_v14 = vmul.f32 0.6931472, %v4133_v12 }
 0xa66   :  { %v1777_v19 = vsel %vm1776_vm12, %v1774_v16, %v1771_v14 }
 0xa67   :  { %v1778_v20 = vadd.f32 %v1777_v19, %v1764_v17 }
 0xa69   :  { %v3451_v1 = vadd.f32 -0.6931472, %v1778_v20 }
 0xa6b   :  { %v1780_v21 = vpack.c.bf16 %v3451_v1, %v3451_v1 }
 0xa6d   :  { %3813 = vmatmul.mubr.msk.bf16.vlgmr.msra.gmra.mxu1 %vm1057_vm11, %v1780_v21 }
 0xa6e   :  { %3828 = vmatprep.mubr.msk.bf16.mxu1 %vm4456_vm10, %v4842_v8  ;;  %3825 = vmatpush3.bf16.msra.mxu1 %v4047_v45 }
 0xa6f   :  { %3826 = vmatprep.subr.bf16.mxu1 %v4842_v8 }
 0xa72   :  { %3827 = vmatpush3.bf16.msra.mxu1 %v4048_v24 }
 0xa73   :  { %3838 = vmatprep.subr.bf16.mxu1 %v4930_v51 }
 0xb2d   :  { %v1836_v25 = vpop.f32.mrf.mxu1 }
 0xb2e   :  { %v1837_v28 = vadd.f32 %v3452_v23, %v1836_v25 }
 0xb2f   :  { %v3814_v13 = vpop.f32.mrf.mxu1 }
 0xb30   :  { %v1842_v29 = vadd.f32 %v1837_v28, %v4890_v34 }
 0xb31   :  { %v1839_v30 = vpop.f32.mrf.mxu1 }
 0xb32   :  { %v1844_v31 = vand.u32 2147483647, %v1842_v29  ;;  %v1843_v46 = vmax.f32 %v1842_v29, 0.0 }
 0xb33   :  { %v3815_v32 = vpop.f32.mrf.mxu1 }
 0xb34   :  { %v1845_v33 = vsub.f32 0.0, %v1844_v31 }
 0xb36   :  { %v1846_v36 = vmul.f32 1.442695, %v1845_v33 }
 0xb38   :  { %4134 = vpow2.f32 %v1846_v36 }
 0xb45   :  { %v4135_v38 = vpop.eup %4134 }
 0xb46   :  { %v1848_v39 = vadd.f32 1.0, %v4135_v38  ;;  %v1851_v18 = vmul.f32 -0.5, %v4135_v38  ;;  %v1854_v43 = vand.u32 2147483647, %v4135_v38 }
 0xb48   :  { %4136 = vlog2.f32 %v1848_v39  ;;  %v1852_v7 = vadd.f32 1.0, %v1851_v18  ;;  %vm1855_vm13 = vcmp.lt.f32.partialorder %v1854_v43, 0.0004427343 }
 0xb4a   :  { %v1853_v44 = vmul.f32 %v4135_v38, %v1852_v7 }
 0xb55   :  { %v4137_v27 = vpop.eup %4136 }
 0xb56   :  { %v1850_v35 = vmul.f32 0.6931472, %v4137_v27 }
 0xb58   :  { %v1856_v47 = vsel %vm1855_vm13, %v1853_v44, %v1850_v35 }
 0xb59   :  { %v1857_v41 = vadd.f32 %v1856_v47, %v1843_v46 }
 0xb5b   :  { %v3456_v48 = vadd.f32 -0.6931472, %v1857_v41 }
 0xb5d   :  { %v1863_v15 = vpack.c.bf16 %v3456_v48, %v3456_v48 }
 0xb5f   :  { %3821 = vmatmul.mubr.msk.bf16.vlgmr.msra.gmra.mxu0 %vm1057_vm11, %v1863_v15 }
 0xb60   :  { %3833 = vmatpush3.bf16.msra.mxu0 %v2011_v49  ;;  %3834 = vmatprep.mubr.msk.bf16.mxu0 %vm349_vm5, %v4744_v5  ;;  %v3457_v5 = vld [vmem:[%s4627_s6] ss:$0 sm:$0xff] }
 0xb61   :  { %3844 = vmatprep.subr.bf16.mxu0 %v4050_v52 }
 0xb67   :  { %3835 = vmatmul.mubr.msk.bf16.vlgmr.msra.gmra.mxu0 %vm349_vm5, %v4760_v37 }
 0xb68   :  { %3845 = vmatpush3.bf16.msra.mxu0 %v4050_v52 }
 0xb69   :  { %3846 = vmatprep.subr.bf16.mxu0 %v4051_v54 }
 0xb6c   :  { %3847 = vmatpush3.bf16.msra.mxu0 %v4051_v54 }
 0xb6d   :  { %3860 = vmatprep.subr.bf16.mxu0 %v4842_v8 }
 0xc1f   :  { %v1920_v37 = vpop.f32.mrf.mxu0 }
 0xc20   :  { %v1921_v55 = vadd.f32 %v3457_v5, %v1920_v37 }
 0xc21   :  { %v3822_v56 = vpop.f32.mrf.mxu0 }
 0xc22   :  { %v1927_v57 = vand.u32 2147483647, %v1921_v55  ;;  %v1926_v18 = vmax.f32 %v1921_v55, 0.0 }
 0xc23   :  { %v1923_v58 = vpop.f32.mrf.mxu0 }
 0xc24   :  { %v1928_v59 = vsub.f32 0.0, %v1927_v57 }
 0xc25   :  { %v3823_v60 = vpop.f32.mrf.mxu0 }
 0xc26   :  { %v1929_v61 = vmul.f32 1.442695, %v1928_v59 }
 0xc27   :  { %v4935_v62 = vpop.f32.mrf.mxu0 }
 0xc28   :  { %4138 = vpow2.f32 %v1929_v61  ;;  %v2123_v63 = vand.u32 2147483647, %v4935_v62  ;;  %v2120_v56 = vmax.f32 %v4935_v62, 0.0  ;;  %v4052_v62 = vld [vmem:[#allocation9 + $0x18] sm:$0xff]  }
 0xc29   :  { %v4938_v0 = vpop.f32.mrf.mxu0 }
 0xc2a   :  { %v2126_v2 = vsub.f32 0.0, %v2123_v63  ;;  %v2121_v4 = vand.u32 2147483647, %v4938_v0  ;;  %v2118_v59 = vmax.f32 %v4938_v0, 0.0 }
 0xc2b   :  { %v3837_v6 = vpop.f32.mrf.mxu0 }
 0xc2c   :  { %v2131_v9 = vmul.f32 1.442695, %v2126_v2  ;;  %v2124_v10 = vsub.f32 0.0, %v2121_v4 }
 0xc2d   :  { %v4941_v11 = vpop.f32.mrf.mxu0 }
 0xc2e   :  { %4140 = vpow2.f32 %v2131_v9  ;;  %v2127_v12 = vmul.f32 1.442695, %v2124_v10  ;;  %v2122_v14 = vand.u32 2147483647, %v4941_v11  ;;  %v2119_v4 = vmax.f32 %v4941_v11, 0.0 }
 0xc30   :  { %4142 = vpow2.f32 %v2127_v12  ;;  %v2125_v16 = vsub.f32 0.0, %v2122_v14 }
 0xc32   :  { %v2129_v17 = vmul.f32 1.442695, %v2125_v16 }
 0xc34   :  { %4144 = vpow2.f32 %v2129_v17 }
 0xc35   :  { %v4139_v19 = vpop.eup %4138 }
 0xc36   :  { %v1931_v20 = vadd.f32 1.0, %v4139_v19  ;;  %v1934_v25 = vmul.f32 -0.5, %v4139_v19  ;;  %v1937_v31 = vand.u32 2147483647, %v4139_v19 }
 0xc38   :  { %4146 = vlog2.f32 %v1931_v20  ;;  %v1935_v29 = vadd.f32 1.0, %v1934_v25  ;;  %vm1938_vm14 = vcmp.lt.f32.partialorder %v1937_v31, 0.0004427343 }
 0xc3a   :  { %v1936_v38 = vmul.f32 %v4139_v19, %v1935_v29 }
 0xc3b   :  { %v4141_v1 = vpop.eup %4140 }
 0xc3c   :  { %v2151_v21 = vadd.f32 1.0, %v4141_v1  ;;  %v2154_v33 = vmul.f32 -0.5, %v4141_v1  ;;  %v2157_v35 = vand.u32 2147483647, %v4141_v1 }
 0xc3d   :  { %v4143_v23 = vpop.eup %4142 }
 0xc3e   :  { %4148 = vlog2.f32 %v2151_v21  ;;  %v2133_v28 = vadd.f32 1.0, %v4143_v23  ;;  %v2136_v39 = vmul.f32 -0.5, %v4143_v23  ;;  %v2155_v27 = vadd.f32 1.0, %v2154_v33 }
 0xc3f   :  { %v2139_v48 = vand.u32 2147483647, %v4143_v23  ;;  %vm2158_vm15 = vcmp.lt.f32.partialorder %v2157_v35, 0.0004427343 }
 0xc40   :  { %4150 = vlog2.f32 %v2133_v28  ;;  %v2137_v44 = vadd.f32 1.0, %v2136_v39  ;;  %v2156_v24 = vmul.f32 %v4141_v1, %v2155_v27  ;;  %v3477_v1 = vld [vmem:[%s5121_s24 + $0x1] ss:$0 sm:$0xff] }
 0xc41   :  { %v4145_v13 = vpop.eup %4144  ;;  %vm2140_vm2 = vcmp.lt.f32.partialorder %v2139_v48, 0.0004427343 }
 0xc42   :  { %v2142_v30 = vadd.f32 1.0, %v4145_v13  ;;  %v2145_v46 = vmul.f32 -0.5, %v4145_v13  ;;  %v2138_v54 = vmul.f32 %v4143_v23, %v2137_v44  ;;  %v2148_v55 = vand.u32 2147483647, %v4145_v13  ;;  %v4054_v44 = vld [vmem:[#allocation10 + $0x18] sm:$0xff]  }
 0xc44   :  { %4152 = vlog2.f32 %v2142_v30  ;;  %v2146_v5 = vadd.f32 1.0, %v2145_v46  ;;  %vm2149_vm3 = vcmp.lt.f32.partialorder %v2148_v55, 0.0004427343  ;;  %v4055_v46 = vld [vmem:[#allocation10 + $0x10] sm:$0xff]  }
 0xc45   :  { %v4147_v32 = vpop.eup %4146 }
 0xc46   :  { %v1933_v36 = vmul.f32 0.6931472, %v4147_v32  ;;  %v2147_v63 = vmul.f32 %v4145_v13, %v2146_v5 }
 0xc48   :  { %v1939_v7 = vsel %vm1938_vm14, %v1936_v38, %v1933_v36 }
 0xc49   :  { %v1940_v43 = vadd.f32 %v1939_v7, %v1926_v18 }
 0xc4b   :  { %v4149_v47 = vpop.eup %4148  ;;  %v3461_v41 = vadd.f32 -0.6931472, %v1940_v43 }
 0xc4c   :  { %v2153_v15 = vmul.f32 0.6931472, %v4149_v47 }
 0xc4d   :  { %v4151_v49 = vpop.eup %4150  ;;  %v1946_v45 = vpack.c.bf16 %v3461_v41, %v3461_v41  ;;  %v3487_v41 = vld [vmem:[%s5123_s10 + $0x1] ss:$0 sm:$0xff] }
 0xc4e   :  { %v2135_v52 = vmul.f32 0.6931472, %v4151_v49  ;;  %v2159_v37 = vsel %vm2158_vm15, %v2156_v24, %v2153_v15 }
 0xc4f   :  { %3829 = vmatmul.mubr.msk.bf16.vlgmr.msra.gmra.mxu1 %vm1057_vm11, %v1946_v45  ;;  %v2162_v60 = vadd.f32 %v2159_v37, %v2120_v56 }
 0xc50   :  { %v2141_v57 = vsel %vm2140_vm2, %v2138_v54, %v2135_v52  ;;  %3840 = vmatprep.mubr.msk.bf16.mxu1 %vm929_vm7, %v4805_v42  ;;  %3839 = vmatpush3.bf16.msra.mxu1 %v4930_v51  ;;  %v4053_v51 = vld [vmem:[#allocation9 + $0x10] sm:$0xff]  }
 0xc51   :  { %v4153_v58 = vpop.eup %4152  ;;  %3852 = vmatprep.subr.bf16.mxu1 %v4842_v8  ;;  %v2160_v2 = vadd.f32 %v2141_v57, %v2118_v59  ;;  %v3475_v10 = vadd.f32 -0.6931472, %v2162_v60 }
 0xc52   :  { %v2144_v61 = vmul.f32 0.6931472, %v4153_v58 }
 0xc53   :  { %v3473_v12 = vadd.f32 -0.6931472, %v2160_v2  ;;  %v2172_v11 = vpack.c.bf16 %v3475_v10, %v3475_v10  ;;  %v3491_v10 = vld [vmem:[%s5124_s11 + $0x1] ss:$0 sm:$0xff] }
 0xc54   :  { %v2150_v6 = vsel %vm2149_vm3, %v2147_v63, %v2144_v61 }
 0xc55   :  { %v2161_v9 = vadd.f32 %v2150_v6, %v2119_v4 }
 0xc57   :  { %v3474_v42 = vadd.f32 -0.6931472, %v2161_v9  ;;  %3841 = vmatmul.mubr.msk.bf16.vlgmr.msra.gmra.mxu1 %vm929_vm7, %v4810_v53  ;;  %v4057_v9 = vld [vmem:[#allocation12 + $0x10] sm:$0xff]  }
 0xc58   :  { %3853 = vmatpush3.bf16.msra.mxu1 %v4052_v62  ;;  %3856 = vmatprep.mubr.msk.bf16.mxu1 %vm4456_vm10, %v4842_v8  ;;  %v4056_v62 = vld [vmem:[#allocation12 + $0x18] sm:$0xff]  }
 0xc59   :  { %v2171_v0 = vpack.c.bf16 %v3474_v42, %v3473_v12  ;;  %3854 = vmatprep.subr.bf16.mxu1 %v4842_v8 }
 0xc5b   :  { %3848 = vmatprep.mubr.msk.bf16.mxu0 %vm1057_vm11, %v2171_v0 }
 0xc5c   :  { %3849 = vmatmul.mubr.msk.bf16.vlgmr.msra.gmra.mxu0 %vm1057_vm11, %v2172_v11  ;;  %3855 = vmatpush3.bf16.msra.mxu1 %v4053_v51 }
 0xc5d   :  { %3864 = vmatprep.mubr.msk.bf16.mxu0 %vm4456_vm10, %v4842_v8  ;;  %3868 = vmatprep.subr.bf16.mxu1 %v4842_v8 }
 0xc5f   :  { %3857 = vmatmul.mubr.msk.bf16.vlgmr.msra.gmra.mxu1 %vm1057_vm11, %v4895_v22 }
 0xc60   :  { %3872 = vmatprep.mubr.msk.bf16.mxu1 %vm4456_vm10, %v4842_v8  ;;  %3869 = vmatpush3.bf16.msra.mxu1 %v4054_v44 }
 0xc61   :  { %3870 = vmatprep.subr.bf16.mxu1 %v4842_v8 }
 0xc64   :  { %3871 = vmatpush3.bf16.msra.mxu1 %v4055_v46 }
 0xc65   :  { %3884 = vmatprep.subr.bf16.mxu1 %v4842_v8 }
 0xd0f   :  { %v4966_v53 = vpop.f32.mrf.mxu1 }
 0xd11   :  { %v3830_v14 = vpop.f32.mrf.mxu1 }
 0xd13   :  { %v2006_v16 = vpop.f32.mrf.mxu1 }
 0xd15   :  { %v3831_v17 = vpop.f32.mrf.mxu1 }
 0xd17   :  { %v3842_v19 = vpop.f32.mrf.mxu1 }
 0xd19   :  { %v2104_v20 = vpop.f32.mrf.mxu1 }
 0xd1b   :  { %v3843_v21 = vpop.f32.mrf.mxu1 }
 0xd1c   :  { %v3850_v23 = vpop.f32.mrf.mxu0 }
 0xd1d   :  { %v2242_v25 = vadd.f32 %v3850_v23, %v3477_v1  ;;  %v2107_v28 = vpop.f32.mrf.mxu1 }
 0xd1e   :  { %v2233_v13 = vpop.f32.mrf.mxu0 }
 0xd1f   :  { %v2249_v29 = vmul.f32 %v3842_v19, %v2242_v25  ;;  %v2303_v30 = vpop.f32.mrf.mxu1  ;;  %v2234_v32 = vadd.f32 %v3477_v1, %v2233_v13 }
 0xd20   :  { %v3851_v31 = vpop.f32.mrf.mxu0 }
 0xd21   :  { %v2251_v22 = vpack.c.bf16 %v2249_v29, %v2249_v29  ;;  %v3858_v33 = vpop.f32.mrf.mxu1  ;;  %v2247_v7 = vmul.f32 %v2234_v32, %v2104_v20 }
 0xd22   :  { %v2236_v36 = vpop.f32.mrf.mxu0  ;;  %v4058_v33 = vld [vmem:[#allocation13 + $0x18] sm:$0xff]  }
 0xd23   :  { %v2237_v38 = vadd.f32 %v3477_v1, %v2236_v36  ;;  %v2306_v39 = vpop.f32.mrf.mxu1  ;;  %v2310_v18 = vsel %vm356_vm0, %v2251_v22, 0  ;;  %v4059_v36 = vld [vmem:[#allocation13 + $0x10] sm:$0xff]  }
 0xd24   :  { %3861 = vmatpush3.bf16.msra.mxu0 %v2310_v18 }
 0xd25   :  { %v2248_v43 = vmul.f32 %v2237_v38, %v2107_v28  ;;  %v3859_v27 = vpop.f32.mrf.mxu1  ;;  %3862 = vmatprep.subr.bf16.mxu0 %v4842_v8  ;;  %v3496_v38 = vld [vmem:[%s5125_s28 + $0x1] ss:$0 sm:$0xff] }
 0xd27   :  { %v2250_v35 = vpack.c.bf16 %v2248_v43, %v2247_v7 }
 0xd29   :  { %3863 = vmatpush3.bf16.msra.mxu0 %v2250_v35 }
 0xd2a   :  { %3876 = vmatprep.subr.bf16.mxu0 %v4842_v8 }
 0xd2c   :  { %3865 = vmatmul.mubr.msk.bf16.vlgmr.msra.gmra.mxu0 %vm1194_vm1, %v4833_v3 }
 0xd2d   :  { %3880 = vmatprep.mubr.msk.bf16.mxu0 %vm4456_vm10, %v4842_v8  ;;  %3877 = vmatpush3.bf16.msra.mxu0 %v4056_v62 }
 0xd2e   :  { %3878 = vmatprep.subr.bf16.mxu0 %v4842_v8 }
 0xd31   :  { %3879 = vmatpush3.bf16.msra.mxu0 %v4057_v9 }
 0xd32   :  { %3892 = vmatprep.subr.bf16.mxu0 %v4842_v8 }
 0xdec   :  { %v2346_v47 = vpop.f32.mrf.mxu0 }
 0xded   :  { %v2347_v48 = vadd.f32 %v2346_v47, %v2303_v30 }
 0xdee   :  { %v3866_v15 = vpop.f32.mrf.mxu0 }
 0xdef   :  { %v4979_v49 = vadd.f32 %v3487_v41, %v2347_v48 }
 0xdf0   :  { %v2349_v45 = vpop.f32.mrf.mxu0 }
 0xdf1   :  { %v2376_v3 = vand.u32 2147483647, %v4979_v49  ;;  %v2375_v61 = vmax.f32 %v4979_v49, 0.0 }
 0xdf2   :  { %v3867_v24 = vpop.f32.mrf.mxu0 }
 0xdf3   :  { %v2377_v52 = vsub.f32 0.0, %v2376_v3 }
 0xdf5   :  { %v2378_v54 = vmul.f32 1.442695, %v2377_v52 }
 0xdf7   :  { %4154 = vpow2.f32 %v2378_v54 }
 0xe04   :  { %v4155_v5 = vpop.eup %4154 }
 0xe05   :  { %v2380_v37 = vadd.f32 1.0, %v4155_v5  ;;  %v2383_v55 = vmul.f32 -0.5, %v4155_v5  ;;  %v2386_v57 = vand.u32 2147483647, %v4155_v5 }
 0xe07   :  { %4156 = vlog2.f32 %v2380_v37  ;;  %v2384_v56 = vadd.f32 1.0, %v2383_v55  ;;  %vm2387_vm7 = vcmp.lt.f32.partialorder %v2386_v57, 0.0004427343  ;;  %v4060_v57 = vld [vmem:[#allocation15 + $0x18] sm:$0xff]  }
 0xe09   :  { %v2385_v60 = vmul.f32 %v4155_v5, %v2384_v56  ;;  %v4998_v56 = vld [vmem:[%s4642_s8] sm:$0xff] }
 0xe14   :  { %v4157_v58 = vpop.eup %4156 }
 0xe15   :  { %v2382_v59 = vmul.f32 0.6931472, %v4157_v58  ;;  %v4061_v58 = vld [vmem:[#allocation15 + $0x10] sm:$0xff]  }
 0xe17   :  { %v2388_v63 = vsel %vm2387_vm7, %v2385_v60, %v2382_v59  ;;  %v3501_v59 = vld [vmem:[%s5126_s0 + $0x1] ss:$0 sm:$0xff] }
 0xe18   :  { %v2389_v2 = vadd.f32 %v2388_v63, %v2375_v61  ;;  %v2540_v60 = vmul.f32 %v3501_v59, %v4890_v34  ;;  %v3507_v63 = vld [vmem:[%s5127_s1 + $0x1] ss:$0 sm:$0xff] }
 0xe1a   :  { %v3490_v4 = vadd.f32 -0.6931472, %v2389_v2 }
 0xe1c   :  { %v2391_v6 = vpack.c.bf16 %v3490_v4, %v3490_v4 }
 0xe1e   :  { %3873 = vmatmul.mubr.msk.bf16.vlgmr.msra.gmra.mxu1 %vm1057_vm11, %v2391_v6 }
 0xe1f   :  { %3888 = vmatprep.mubr.msk.bf16.mxu1 %vm4456_vm10, %v4842_v8  ;;  %3885 = vmatpush3.bf16.msra.mxu1 %v4058_v33 }
 0xe20   :  { %3886 = vmatprep.subr.bf16.mxu1 %v4842_v8 }
 0xe23   :  { %3887 = vmatpush3.bf16.msra.mxu1 %v4059_v36 }
 0xe24   :  { %3900 = vmatprep.subr.bf16.mxu1 %v4842_v8 }
 0xede   :  { %v2447_v12 = vpop.f32.mrf.mxu1 }
 0xedf   :  { %v2448_v42 = vadd.f32 %v3491_v10, %v2447_v12 }
 0xee0   :  { %v3874_v51 = vpop.f32.mrf.mxu1 }
 0xee1   :  { %v2454_v0 = vand.u32 2147483647, %v2448_v42  ;;  %v2453_v29 = vmax.f32 %v2448_v42, 0.0 }
 0xee2   :  { %v2450_v11 = vpop.f32.mrf.mxu1 }
 0xee3   :  { %v2455_v14 = vsub.f32 0.0, %v2454_v0 }
 0xee4   :  { %v3875_v16 = vpop.f32.mrf.mxu1 }
 0xee5   :  { %v2456_v17 = vmul.f32 1.442695, %v2455_v14 }
 0xee7   :  { %4158 = vpow2.f32 %v2456_v17 }
 0xef4   :  { %v4159_v19 = vpop.eup %4158 }
 0xef5   :  { %v2458_v20 = vadd.f32 1.0, %v4159_v19  ;;  %v2461_v1 = vmul.f32 -0.5, %v4159_v19  ;;  %v2464_v23 = vand.u32 2147483647, %v4159_v19 }
 0xef7   :  { %4160 = vlog2.f32 %v2458_v20  ;;  %v2462_v21 = vadd.f32 1.0, %v2461_v1  ;;  %vm2465_vm1 = vcmp.lt.f32.partialorder %v2464_v23, 0.0004427343 }
 0xef9   :  { %v2463_v13 = vmul.f32 %v4159_v19, %v2462_v21 }
 0xf04   :  { %v4161_v25 = vpop.eup %4160 }
 0xf05   :  { %v2460_v28 = vmul.f32 0.6931472, %v4161_v25 }
 0xf07   :  { %v2466_v30 = vsel %vm2465_vm1, %v2463_v13, %v2460_v28  ;;  %v4062_v28 = vld [vmem:[#allocation16 + $0x18] sm:$0xff]   ;;  %v4063_v13 = vld [vmem:[#allocation16 + $0x10] sm:$0xff]  }
 0xf08   :  { %v2467_v31 = vadd.f32 %v2466_v30, %v2453_v29  ;;  %v3511_v29 = vld [vmem:[%s5128_s27 + $0x1] ss:$0 sm:$0xff] }
 0xf0a   :  { %v3495_v22 = vadd.f32 -0.6931472, %v2467_v31 }
 0xf0c   :  { %v2469_v32 = vpack.c.bf16 %v3495_v22, %v3495_v22 }
 0xf0e   :  { %3881 = vmatmul.mubr.msk.bf16.vlgmr.msra.gmra.mxu0 %vm1057_vm11, %v2469_v32 }
 0xf0f   :  { %3896 = vmatprep.mubr.msk.bf16.mxu0 %vm4456_vm10, %v4842_v8  ;;  %3893 = vmatpush3.bf16.msra.mxu0 %v4060_v57 }
 0xf10   :  { %3894 = vmatprep.subr.bf16.mxu0 %v4998_v56 }
 0xf13   :  { %3895 = vmatpush3.bf16.msra.mxu0 %v4061_v58 }
 0xf14   :  { %3908 = vmatprep.subr.bf16.mxu0 %v4998_v56 }
 0xfce   :  { %v2525_v39 = vpop.f32.mrf.mxu0 }
 0xfcf   :  { %v2526_v18 = vadd.f32 %v3496_v38, %v2525_v39 }
 0xfd0   :  { %v3882_v7 = vpop.f32.mrf.mxu0 }
 0xfd1   :  { %v2531_v43 = vadd.f32 %v2526_v18, %v4979_v49 }
 0xfd2   :  { %v2528_v27 = vpop.f32.mrf.mxu0 }
 0xfd3   :  { %v2542_v35 = vand.u32 2147483647, %v2531_v43  ;;  %v2541_v54 = vmax.f32 %v2531_v43, 0.0 }
 0xfd4   :  { %v3883_v44 = vpop.f32.mrf.mxu0 }
 0xfd5   :  { %v2543_v46 = vsub.f32 0.0, %v2542_v35 }
 0xfd7   :  { %v2544_v47 = vmul.f32 1.442695, %v2543_v46 }
 0xfd9   :  { %4162 = vpow2.f32 %v2544_v47 }
 0xfe6   :  { %v4163_v41 = vpop.eup %4162 }
 0xfe7   :  { %v2546_v48 = vadd.f32 1.0, %v4163_v41  ;;  %v2549_v15 = vmul.f32 -0.5, %v4163_v41  ;;  %v2552_v3 = vand.u32 2147483647, %v4163_v41 }
 0xfe9   :  { %4164 = vlog2.f32 %v2546_v48  ;;  %v2550_v45 = vadd.f32 1.0, %v2549_v15  ;;  %vm2553_vm4 = vcmp.lt.f32.partialorder %v2552_v3, 0.0004427343 }
 0xfeb   :  { %v2551_v52 = vmul.f32 %v4163_v41, %v2550_v45 }
 0xff6   :  { %v4165_v8 = vpop.eup %4164 }
 0xff7   :  { %v2548_v24 = vmul.f32 0.6931472, %v4165_v8  ;;  %v4064_v8 = vld [vmem:[%s5129_s2 + $0x18] sm:$0xff]  }
 0xff9   :  { %v2554_v49 = vsel %vm2553_vm4, %v2551_v52, %v2548_v24  ;;  %v4065_v24 = vld [vmem:[%s5129_s2 + $0x10] sm:$0xff]   ;;  %v3516_v52 = vld [vmem:[%s5130_s7 + $0x1] ss:$0 sm:$0xff] }
 0xffa   :  { %v2555_v5 = vadd.f32 %v2554_v49, %v2541_v54 }
 0xffc   :  { %v3502_v37 = vadd.f32 -0.6931472, %v2555_v5 }
 0xffe   :  { %v2562_v55 = vpack.c.bf16 %v3502_v37, %v3502_v37 }
0x1000   :  { %3889 = vmatmul.mubr.msk.bf16.vlgmr.msra.gmra.mxu1 %vm1057_vm11, %v2562_v55 }
0x1001   :  { %3904 = vmatprep.mubr.msk.bf16.mxu1 %vm4456_vm10, %v4998_v56  ;;  %3901 = vmatpush3.bf16.msra.mxu1 %v4062_v28 }
0x1002   :  { %3902 = vmatprep.subr.bf16.mxu1 %v4998_v56 }
0x1005   :  { %3903 = vmatpush3.bf16.msra.mxu1 %v4063_v13 }
0x1006   :  { %3916 = vmatprep.subr.bf16.mxu1 %v4998_v56 }
0x10c0   :  { %v2612_v61 = vpop.f32.mrf.mxu1 }
0x10c1   :  { %v2618_v2 = vadd.f32 %v2612_v61, %v2540_v60 }
0x10c2   :  { %v3890_v4 = vpop.f32.mrf.mxu1 }
0x10c3   :  { %v5007_v6 = vadd.f32 %v3507_v63, %v2618_v2 }
0x10c4   :  { %v2615_v62 = vpop.f32.mrf.mxu1 }
0x10c5   :  { %v2643_v9 = vand.u32 2147483647, %v5007_v6  ;;  %v2642_v20 = vmax.f32 %v5007_v6, 0.0 }
0x10c6   :  { %v3891_v10 = vpop.f32.mrf.mxu1 }
0x10c7   :  { %v2644_v12 = vsub.f32 0.0, %v2643_v9 }
0x10c9   :  { %v2645_v42 = vmul.f32 1.442695, %v2644_v12 }
0x10cb   :  { %4166 = vpow2.f32 %v2645_v42 }
0x10d8   :  { %v4167_v51 = vpop.eup %4166 }
0x10d9   :  { %v2647_v0 = vadd.f32 1.0, %v4167_v51  ;;  %v2650_v11 = vmul.f32 -0.5, %v4167_v51  ;;  %v2653_v16 = vand.u32 2147483647, %v4167_v51 }
0x10db   :  { %4168 = vlog2.f32 %v2647_v0  ;;  %v2651_v14 = vadd.f32 1.0, %v2650_v11  ;;  %vm2654_vm6 = vcmp.lt.f32.partialorder %v2653_v16, 0.0004427343  ;;  %v4067_v16 = vld [vmem:[%s5132_s15 + $0x10] sm:$0xff]  }
0x10dd   :  { %v2652_v19 = vmul.f32 %v4167_v51, %v2651_v14  ;;  %v4066_v14 = vld [vmem:[%s5132_s15 + $0x18] sm:$0xff]  }
0x10e8   :  { %v4169_v34 = vpop.eup %4168 }
0x10e9   :  { %v2649_v17 = vmul.f32 0.6931472, %v4169_v34  ;;  %v3531_v34 = vld [vmem:[%s5133_s16 + $0x1] ss:$0 sm:$0xff] }
0x10eb   :  { %v2655_v1 = vsel %vm2654_vm6, %v2652_v19, %v2649_v17 }
0x10ec   :  { %v2656_v21 = vadd.f32 %v2655_v1, %v2642_v20 }
0x10ee   :  { %v3510_v23 = vadd.f32 -0.6931472, %v2656_v21 }
0x10f0   :  { %v2658_v25 = vpack.c.bf16 %v3510_v23, %v3510_v23 }
0x10f2   :  { %3897 = vmatmul.mubr.msk.bf16.vlgmr.msra.gmra.mxu0 %vm1057_vm11, %v2658_v25 }
0x10f3   :  { %3912 = vmatprep.mubr.msk.bf16.mxu0 %vm4456_vm10, %v4998_v56  ;;  %3909 = vmatpush3.bf16.msra.mxu0 %v4064_v8 }
0x10f4   :  { %3910 = vmatprep.subr.bf16.mxu0 %v4998_v56 }
0x10f7   :  { %3911 = vmatpush3.bf16.msra.mxu0 %v4065_v24 }
0x10f8   :  { %3924 = vmatprep.subr.bf16.mxu0 %v4998_v56 }
0x11b2   :  { %v2714_v30 = vpop.f32.mrf.mxu0 }
0x11b3   :  { %v2715_v31 = vadd.f32 %v3511_v29, %v2714_v30 }
0x11b4   :  { %v3898_v22 = vpop.f32.mrf.mxu0 }
0x11b5   :  { %v2721_v32 = vand.u32 2147483647, %v2715_v31  ;;  %v2720_v41 = vmax.f32 %v2715_v31, 0.0 }
0x11b6   :  { %v2717_v33 = vpop.f32.mrf.mxu0 }
0x11b7   :  { %v2722_v36 = vsub.f32 0.0, %v2721_v32 }
0x11b8   :  { %v3899_v38 = vpop.f32.mrf.mxu0 }
0x11b9   :  { %v2723_v39 = vmul.f32 1.442695, %v2722_v36 }
0x11bb   :  { %4170 = vpow2.f32 %v2723_v39 }
0x11c8   :  { %v4171_v18 = vpop.eup %4170 }
0x11c9   :  { %v2725_v7 = vadd.f32 1.0, %v4171_v18  ;;  %v2728_v43 = vmul.f32 -0.5, %v4171_v18  ;;  %v2731_v35 = vand.u32 2147483647, %v4171_v18 }
0x11cb   :  { %4172 = vlog2.f32 %v2725_v7  ;;  %v2729_v27 = vadd.f32 1.0, %v2728_v43  ;;  %vm2732_vm8 = vcmp.lt.f32.partialorder %v2731_v35, 0.0004427343  ;;  %v4069_v35 = vld [vmem:[%s5131_s4 + $0x10] sm:$0xff]  }
0x11cd   :  { %v2730_v47 = vmul.f32 %v4171_v18, %v2729_v27  ;;  %v4068_v27 = vld [vmem:[%s5131_s4 + $0x18] sm:$0xff]  }
0x11d8   :  { %v4173_v44 = vpop.eup %4172 }
0x11d9   :  { %v2727_v46 = vmul.f32 0.6931472, %v4173_v44  ;;  %v3536_v44 = vld [vmem:[%s5134_s29 + $0x1] ss:$0 sm:$0xff] }
0x11db   :  { %v2733_v48 = vsel %vm2732_vm8, %v2730_v47, %v2727_v46 }
0x11dc   :  { %v2734_v15 = vadd.f32 %v2733_v48, %v2720_v41 }
0x11de   :  { %v3515_v45 = vadd.f32 -0.6931472, %v2734_v15 }
0x11e0   :  { %v2736_v3 = vpack.c.bf16 %v3515_v45, %v3515_v45 }
0x11e2   :  { %3905 = vmatmul.mubr.msk.bf16.vlgmr.msra.gmra.mxu1 %vm1057_vm11, %v2736_v3 }
0x11e3   :  { %3920 = vmatprep.mubr.msk.bf16.mxu1 %vm4456_vm10, %v4998_v56  ;;  %3917 = vmatpush3.bf16.msra.mxu1 %v4066_v14 }
0x11e4   :  { %3918 = vmatprep.subr.bf16.mxu1 %v4998_v56 }
0x11e7   :  { %3919 = vmatpush3.bf16.msra.mxu1 %v4067_v16 }
0x11e8   :  { %3932 = vmatprep.subr.bf16.mxu1 %v4998_v56 }
0x12a2   :  { %v2792_v54 = vpop.f32.mrf.mxu1 }
0x12a3   :  { %v2793_v49 = vadd.f32 %v3516_v52, %v2792_v54 }
0x12a4   :  { %v3906_v5 = vpop.f32.mrf.mxu1 }
0x12a5   :  { %v5026_v37 = vadd.f32 %v2793_v49, %v5007_v6 }
0x12a6   :  { %v2795_v55 = vpop.f32.mrf.mxu1 }
0x12a7   :  { %v2814_v57 = vand.u32 2147483647, %v5026_v37  ;;  %v2813_v12 = vmax.f32 %v5026_v37, 0.0 }
0x12a8   :  { %v3907_v58 = vpop.f32.mrf.mxu1 }
0x12a9   :  { %v2815_v59 = vsub.f32 0.0, %v2814_v57 }
0x12ab   :  { %v2816_v60 = vmul.f32 1.442695, %v2815_v59 }
0x12ad   :  { %4174 = vpow2.f32 %v2816_v60 }
0x12ba   :  { %v4175_v61 = vpop.eup %4174 }
0x12bb   :  { %v2818_v63 = vadd.f32 1.0, %v4175_v61  ;;  %v2821_v2 = vmul.f32 -0.5, %v4175_v61  ;;  %v2824_v62 = vand.u32 2147483647, %v4175_v61 }
0x12bd   :  { %4176 = vlog2.f32 %v2818_v63  ;;  %v2822_v4 = vadd.f32 1.0, %v2821_v2  ;;  %vm2825_vm9 = vcmp.lt.f32.partialorder %v2824_v62, 0.0004427343  ;;  %v4071_v62 = vld [vmem:[%s4632_s3 + $0x10] sm:$0xff]  }
0x12bf   :  { %v2823_v6 = vmul.f32 %v4175_v61, %v2822_v4  ;;  %v4070_v4 = vld [vmem:[%s4632_s3 + $0x18] sm:$0xff]  }
0x12ca   :  { %v4177_v9 = vpop.eup %4176 }
0x12cb   :  { %v2820_v10 = vmul.f32 0.6931472, %v4177_v9  ;;  %v3546_v9 = vld [vmem:[%s4627_s6 + $0x1] ss:$0 sm:$0xff] }
0x12cd   :  { %v2826_v42 = vsel %vm2825_vm9, %v2823_v6, %v2820_v10 }
0x12ce   :  { %v2827_v51 = vadd.f32 %v2826_v42, %v2813_v12 }
0x12d0   :  { %v3530_v0 = vadd.f32 -0.6931472, %v2827_v51 }
0x12d2   :  { %v2829_v11 = vpack.c.bf16 %v3530_v0, %v3530_v0 }
0x12d4   :  { %3913 = vmatmul.mubr.msk.bf16.vlgmr.msra.gmra.mxu0 %vm1057_vm11, %v2829_v11 }
0x12d5   :  { %3928 = vmatprep.mubr.msk.bf16.mxu0 %vm4456_vm10, %v4998_v56  ;;  %3925 = vmatpush3.bf16.msra.mxu0 %v4068_v27 }
0x12d6   :  { %3926 = vmatprep.subr.bf16.mxu0 %v4998_v56 }
0x12d9   :  { %3927 = vmatpush3.bf16.msra.mxu0 %v4069_v35 }
0x12da   :  { %3940 = vmatprep.subr.bf16.mxu0 %v4998_v56 }
0x1394   :  { %v2885_v17 = vpop.f32.mrf.mxu0 }
0x1395   :  { %v2886_v19 = vadd.f32 %v3531_v34, %v2885_v17 }
0x1396   :  { %v3914_v20 = vpop.f32.mrf.mxu0 }
0x1397   :  { %v2892_v1 = vand.u32 2147483647, %v2886_v19  ;;  %v2891_v38 = vmax.f32 %v2886_v19, 0.0 }
0x1398   :  { %v2888_v21 = vpop.f32.mrf.mxu0 }
0x1399   :  { %v2893_v23 = vsub.f32 0.0, %v2892_v1 }
0x139a   :  { %v3915_v25 = vpop.f32.mrf.mxu0 }
0x139b   :  { %v2894_v28 = vmul.f32 1.442695, %v2893_v23 }
0x139d   :  { %4178 = vpow2.f32 %v2894_v28 }
0x13aa   :  { %v4179_v13 = vpop.eup %4178 }
0x13ab   :  { %v2896_v29 = vadd.f32 1.0, %v4179_v13  ;;  %v2899_v30 = vmul.f32 -0.5, %v4179_v13  ;;  %v2902_v22 = vand.u32 2147483647, %v4179_v13 }
0x13ad   :  { %4180 = vlog2.f32 %v2896_v29  ;;  %v2900_v31 = vadd.f32 1.0, %v2899_v30  ;;  %vm2903_vm12 = vcmp.lt.f32.partialorder %v2902_v22, 0.0004427343  ;;  %v3462_v22 = vld [vmem:[%s4637_s19] ss:$0 sm:$0xff] }
0x13af   :  { %v2901_v36 = vmul.f32 %v4179_v13, %v2900_v31  ;;  %v4457_v31 = vmov 1  }
0x13b0   :  { %4024 = vset.pattern.permute.xlu1 %v4457_v31  ;;  %4025 = vset.pattern.permute.xlu0 %v4457_v31 }
0x13ba   :  { %v4181_v32 = vpop.eup %4180 }
0x13bb   :  { %v2898_v33 = vmul.f32 0.6931472, %v4181_v32  ;;  %v2004_v32 = vadd.f32 %v3462_v22, %v4966_v53 }
0x13bd   :  { %v2904_v39 = vsel %vm2903_vm12, %v2901_v36, %v2898_v33  ;;  %v3559_v36 = vld [vmem:[%s4637_s19 + $0x1] ss:$0 sm:$0xff] }
0x13be   :  { %v2905_v18 = vadd.f32 %v2904_v39, %v2891_v38 }
0x13c0   :  { %v3535_v7 = vadd.f32 -0.6931472, %v2905_v18  ;;  %v3389_v18 = vld [vmem:[#allocation2] ss:$0 sm:$0xff] }
0x13c2   :  { %v2907_v43 = vpack.c.bf16 %v3535_v7, %v3535_v7 }
0x13c4   :  { %3921 = vmatmul.mubr.msk.bf16.vlgmr.msra.gmra.mxu1 %vm1057_vm11, %v2907_v43 }
0x13c5   :  { %3936 = vmatprep.mubr.msk.bf16.mxu1 %vm4456_vm10, %v4998_v56  ;;  %3933 = vmatpush3.bf16.msra.mxu1 %v4070_v4 }
0x13c6   :  { %3934 = vmatprep.subr.bf16.mxu1 %v4998_v56 }
0x13c9   :  { %3935 = vmatpush3.bf16.msra.mxu1 %v4071_v62 }
0x13ca   :  { %3946 = vmatprep.subr.bf16.mxu1 %v4998_v56 }
0x1484   :  { %v2963_v46 = vpop.f32.mrf.mxu1 }
0x1485   :  { %v2964_v47 = vadd.f32 %v3536_v44, %v2963_v46 }
0x1486   :  { %v3922_v41 = vpop.f32.mrf.mxu1 }
0x1487   :  { %v2969_v48 = vadd.f32 %v2964_v47, %v5026_v37 }
0x1488   :  { %v2966_v15 = vpop.f32.mrf.mxu1 }
0x1489   :  { %v2971_v45 = vand.u32 2147483647, %v2969_v48  ;;  %v2970_v60 = vmax.f32 %v2969_v48, 0.0 }
0x148a   :  { %v3923_v3 = vpop.f32.mrf.mxu1 }
0x148b   :  { %v2972_v8 = vsub.f32 0.0, %v2971_v45 }
0x148d   :  { %v2973_v24 = vmul.f32 1.442695, %v2972_v8 }
0x148f   :  { %4182 = vpow2.f32 %v2973_v24 }
0x149c   :  { %v4183_v52 = vpop.eup %4182 }
0x149d   :  { %v2975_v54 = vadd.f32 1.0, %v4183_v52  ;;  %v2978_v49 = vmul.f32 -0.5, %v4183_v52  ;;  %v2981_v55 = vand.u32 2147483647, %v4183_v52 }
0x149f   :  { %4184 = vlog2.f32 %v2975_v54  ;;  %v2979_v5 = vadd.f32 1.0, %v2978_v49  ;;  %vm2982_vm13 = vcmp.lt.f32.partialorder %v2981_v55, 0.0004427343 }
0x14a1   :  { %v2980_v59 = vmul.f32 %v4183_v52, %v2979_v5 }
0x14ac   :  { %v4185_v57 = vpop.eup %4184 }
0x14ad   :  { %v2977_v58 = vmul.f32 0.6931472, %v4185_v57 }
0x14af   :  { %v2983_v37 = vsel %vm2982_vm13, %v2980_v59, %v2977_v58 }
0x14b0   :  { %v2984_v61 = vadd.f32 %v2983_v37, %v2970_v60 }
0x14b2   :  { %v3540_v63 = vadd.f32 -0.6931472, %v2984_v61 }
0x14b4   :  { %v2991_v2 = vpack.c.bf16 %v3540_v63, %v3540_v63 }
0x14b6   :  { %3929 = vmatmul.mubr.msk.bf16.vlgmr.msra.gmra.mxu0 %vm1057_vm11, %v2991_v2 }
0x14b7   :  { %3942 = vmatprep.mubr.msk.bf16.mxu0 %vm4456_vm10, %v4998_v56 }
0x1576   :  { %v3049_v10 = vpop.f32.mrf.mxu0 }
0x1577   :  { %v3050_v6 = vadd.f32 %v3546_v9, %v3049_v10 }
0x1578   :  { %v3930_v12 = vpop.f32.mrf.mxu0 }
0x1579   :  { %v3056_v42 = vand.u32 2147483647, %v3050_v6  ;;  %v3055_v25 = vmax.f32 %v3050_v6, 0.0 }
0x157a   :  { %v3052_v51 = vpop.f32.mrf.mxu0 }
0x157b   :  { %v3057_v0 = vsub.f32 0.0, %v3056_v42 }
0x157c   :  { %v3931_v11 = vpop.f32.mrf.mxu0 }
0x157d   :  { %v3058_v14 = vmul.f32 1.442695, %v3057_v0 }
0x157f   :  { %4186 = vpow2.f32 %v3058_v14 }
0x158c   :  { %v4187_v16 = vpop.eup %4186 }
0x158d   :  { %v3060_v34 = vadd.f32 1.0, %v4187_v16  ;;  %v3063_v17 = vmul.f32 -0.5, %v4187_v16  ;;  %v3066_v20 = vand.u32 2147483647, %v4187_v16 }
0x158f   :  { %4188 = vlog2.f32 %v3060_v34  ;;  %v3064_v19 = vadd.f32 1.0, %v3063_v17  ;;  %vm3067_vm14 = vcmp.lt.f32.partialorder %v3066_v20, 0.0004427343 }
0x1591   :  { %v3065_v23 = vmul.f32 %v4187_v16, %v3064_v19 }
0x159c   :  { %v4189_v1 = vpop.eup %4188 }
0x159d   :  { %v3062_v21 = vmul.f32 0.6931472, %v4189_v1 }
0x159f   :  { %v3068_v28 = vsel %vm3067_vm14, %v3065_v23, %v3062_v21 }
0x15a0   :  { %v3069_v13 = vadd.f32 %v3068_v28, %v3055_v25 }
0x15a2   :  { %v3550_v29 = vadd.f32 -0.6931472, %v3069_v13 }
0x15a4   :  { %v3076_v30 = vpack.c.bf16 %v3550_v29, %v3550_v29 }
0x15a6   :  { %3937 = vmatmul.mubr.msk.bf16.vlgmr.msra.gmra.mxu1 %vm1057_vm11, %v3076_v30  ;;  %vm337_vm11 = vcmp.eq.s32.totalorder %v4783_v26, %v3389_v18  ;;  %v4192_v26 = vld [vmem:[%s4492_s25] sm:$0xff]  ;;  %s4458_s25 = smov 2  }
0x15a7   :  { %3948 = vmatprep.mubr.msk.bf16.mxu1 %vm4456_vm10, %v4998_v56  ;;  %v338_v46 = vsel %vm337_vm11, 1.0, %v4998_v56 }
0x15a8   :  { %v3145_v48 = vpack.c.bf16 %v338_v46, %v338_v46 }
0x1666   :  { %v3126_v33 = vpop.f32.mrf.mxu1 }
0x1667   :  { %v3132_v38 = vadd.f32 %v3126_v33, %v2004_v32 }
0x1668   :  { %v3938_v39 = vpop.f32.mrf.mxu1 }
0x1669   :  { %v3141_v7 = vadd.f32 %v3559_v36, %v3132_v38 }
0x166a   :  { %v3129_v43 = vpop.f32.mrf.mxu1 }
0x166b   :  { %v3142_v27 = vmul.f32 %v3141_v7, %v4762_v40 }
0x166c   :  { %v3939_v35 = vpop.f32.mrf.mxu1 }
0x166d   :  { %v3143_v44 = vadd.f32 %v3142_v27, %v4767_v50 }
0x166f   :  { %3243 = vperm.xlu1 %4024, %v3143_v44   ;;  %v3146_v47 = vpack.c.bf16 %v3143_v44, %v3143_v44 }
0x1671   :  { %v3147_v53 = vunpack.c.l.bf16 %v3146_v47  ;;  %v3197_v41 = vsel %vm356_vm0, %v3146_v47, 0 }
0x1672   :  { %3947 = vmatpush3.bf16.msra.mxu1 %v3197_v41 }
0x1673   :  { %v3148_v15 = vsub.f32 %v3143_v44, %v3147_v53  ;;  %3958 = vmatprep.subr.bf16.mxu1 %v4998_v56 }
0x1675   :  { %v3149_v45 = vpack.c.bf16 %v3148_v15, %v3148_v15  ;;  %3949 = vmatmul.mubr.msk.bf16.vlgmr.msra.gmra.mxu1 %vm349_vm5, %v3145_v48 }
0x1676   :  { %3960 = vmatprep.mubr.msk.bf16.mxu1 %vm4456_vm10, %v4998_v56 }
0x1677   :  { %v3154_v40 = vsel %vm356_vm0, %v3149_v45, 0 }
0x1678   :  { %3941 = vmatpush3.bf16.msra.mxu0 %v3154_v40 }
0x1679   :  { %3952 = vmatprep.subr.bf16.mxu0 %v4998_v56 }
0x167b   :  { %3943 = vmatmul.mubr.msk.bf16.vlgmr.msra.gmra.mxu0 %vm349_vm5, %v3145_v48 }
0x167c   :  { %3954 = vmatprep.mubr.msk.bf16.mxu0 %vm4456_vm10, %v4998_v56  ;;  %vm3239_vm10 = vcmask 15360  }
0x16ea   :  { %v3244_v50 = vpop.permute.xlu1 %3243 }
0x16eb   :  { %v3246_v3 = vmul.f32 %v4192_v26, %v3244_v50 }
0x16ed   :  { %v3247_v8 = vpack.c.bf16 %v3246_v3, %v3246_v3 }
0x16ef   :  { %v3248_v24 = vunpack.c.l.bf16 %v3247_v8  ;;  %v3295_v52 = vsel %vm356_vm0, %v3247_v8, 0 }
0x16f0   :  { %3959 = vmatpush3.bf16.msra.mxu1 %v3295_v52 }
0x16f1   :  { %v3249_v54 = vsub.f32 %v3246_v3, %v3248_v24 }
0x16f3   :  { %v3250_v49 = vpack.c.bf16 %v3249_v54, %v3249_v54  ;;  %3961 = vmatmul.mubr.msk.bf16.vlgmr.msra.gmra.mxu1 %vm349_vm5, %v3145_v48 }
0x16f5   :  { %v3252_v5 = vsel %vm356_vm0, %v3250_v49, 0  ;;  %vm3341_vm0 = vcmask 39952  }
0x16f6   :  { %3953 = vmatpush3.bf16.msra.mxu0 %v3252_v5 }
0x16f9   :  { %3955 = vmatmul.mubr.msk.bf16.vlgmr.msra.gmra.mxu0 %vm349_vm5, %v3145_v48 }
0x1735   :  { %v3233_v55 = vpop.f32.mrf.mxu1 }
0x1737   :  { %v3950_v56 = vpop.f32.mrf.mxu1 }
0x1739   :  { %v3236_v57 = vpop.f32.mrf.mxu1 }
0x173b   :  { %v3190_v58 = vpop.f32.mrf.mxu0  ;;  %v3951_v59 = vpop.f32.mrf.mxu1 }
0x173c   :  { %v3234_v60 = vadd.f32 %v3233_v55, %v3190_v58 }
0x173d   :  { %v3944_v37 = vpop.f32.mrf.mxu0 }
0x173e   :  { %3240 = vst.msk [vmem:[%s4642_s8] sm:$0xff] %vm3239_vm10, %v3234_v60 }
0x173f   :  { %v3193_v61 = vpop.f32.mrf.mxu0 }
0x1741   :  { %v3945_v63 = vpop.f32.mrf.mxu0 }
0x17b3   :  { %v3331_v2 = vpop.f32.mrf.mxu1 }
0x17b5   :  { %v3962_v4 = vpop.f32.mrf.mxu1 }
0x17b7   :  { %v3334_v62 = vpop.f32.mrf.mxu1 }
0x17b9   :  { %v3288_v9 = vpop.f32.mrf.mxu0  ;;  %v3963_v10 = vpop.f32.mrf.mxu1 }
0x17ba   :  { %v3332_v6 = vadd.f32 %v3331_v2, %v3288_v9 }
0x17bb   :  { %v3956_v12 = vpop.f32.mrf.mxu0 }
0x17bc   :  { %3338 = vrot.lane.b32.xlu0 %v3332_v6, %s4458_s25 }
0x17bd   :  { %v3291_v42 = vpop.f32.mrf.mxu0 }
0x17bf   :  { %v3957_v51 = vpop.f32.mrf.mxu0 }
0x182e   :  { %v3339_v0 = vpop.permute.xlu0 %3338 }
0x182f   :  { %3342 = vst.msk [vmem:[%s4642_s8] sm:$0xff] %vm3341_vm0, %v3339_v0 }
0x1830   :  { %3347 = vsyncpa [#allocation3], 1 }
0x1831   :  { %3348 = vsyncpa [#allocation5], 1 }
0x1832   :  { %3349 = vsyncpa [#allocation8], 1 }
0x1833   :  { %3350 = vsyncpa [#allocation11], 1 }
0x1834   :  { %3351 = vsyncpa [#allocation14], 1 }
0x1835   :  { %3352 = vsyncpa [#allocation17], 1 }

</bundles_post_ra>
